<compile_context>
chip_gen: v5e
topology: v5e:2x2
jax: 0.10.0
libtpu: 0.0.40
codegen_flags: <defaults>
</compile_context>

<pallas_src>
import math

import jax
import jax.numpy as jnp
from jax.experimental import pallas as pl
from jax.experimental.pallas import tpu as pltpu

EPS = 1e-5                 # PyTorch InstanceNorm2d default
MM_DTYPE = jnp.bfloat16    # MXU operand dtype; accumulation / epilogue stay f32


# ----------------------------------------------------------------------------
# In-kernel helpers
# ----------------------------------------------------------------------------
def _in_relu(y, g, be, axis):
    """InstanceNorm (biased var, affine) + ReLU with gamma folded into the scale."""
    mu = jnp.mean(y, axis=axis, keepdims=True)
    var = jnp.mean(jnp.square(y - mu), axis=axis, keepdims=True)
    s = g * jax.lax.rsqrt(var + EPS)
    t = be - mu * s
    return jnp.maximum(y * s + t, 0.0)


# ----------------------------------------------------------------------------
# Pallas kernels
# ----------------------------------------------------------------------------
def _make_conv_cf_kernel(residual):
    """Channels-first conv: out (Cout, HW) = W (Cout, K) @ P (K, HW), IN over lanes."""

    def kernel(*refs):
        if residual:
            p_ref, w_ref, b_ref, g_ref, be_ref, xr_ref, wd_ref, o_ref = refs
        else:
            p_ref, w_ref, b_ref, g_ref, be_ref, o_ref = refs
        p = p_ref[0].astype(MM_DTYPE)                       # (K, HW)
        w = w_ref[...].astype(MM_DTYPE)                     # (Cout, K)
        y = jnp.dot(w, p, preferred_element_type=jnp.float32)   # (Cout, HW)  lane-dense
        y = y + b_ref[...]                                  # (Cout, 1) broadcast
        out = _in_relu(y, g_ref[...], be_ref[...], axis=1)
        if residual:                                        # 1x1-conv residual (post-ReLU)
            out = out + jnp.dot(wd_ref[...].astype(MM_DTYPE),
                                xr_ref[0].astype(MM_DTYPE),
                                preferred_element_type=jnp.float32)
        o_ref[0] = out

    return kernel


def _make_conv_cl_kernel(residual):
    """Channels-last conv: out (HW, Cout) = P (HW, K) @ W (K, Cout), IN over sublanes."""

    def kernel(*refs):
        if residual:
            p_ref, w_ref, b_ref, g_ref, be_ref, xr_ref, wd_ref, o_ref = refs
        else:
            p_ref, w_ref, b_ref, g_ref, be_ref, o_ref = refs
        p = p_ref[0].astype(MM_DTYPE)                       # (HW, K)
        w = w_ref[...].astype(MM_DTYPE)                     # (K, Cout)
        y = jnp.dot(p, w, preferred_element_type=jnp.float32)   # (HW, Cout=128)
        y = y + b_ref[...]
        out = _in_relu(y, g_ref[...], be_ref[...], axis=0)
        if residual:                                        # 1x1-conv residual (post-ReLU)
            out = out + jnp.dot(xr_ref[0].astype(MM_DTYPE),
                                wd_ref[...].astype(MM_DTYPE),
                                preferred_element_type=jnp.float32)
        o_ref[0] = out

    return kernel


def _tail_kernel(p_ref, w_ref, b_ref, g_ref, be_ref, r_ref, o_ref):
    """rb3 conv+IN+ReLU, + identity residual, + 2x2 maxpool -> pooled (1, C) feature.

    AdaptiveAvgPool2d(1) on the resulting 1x1 map is the identity, Flatten is a reshape.
    """
    p = p_ref[0].astype(MM_DTYPE)                           # (4, K)
    w = w_ref[...].astype(MM_DTYPE)                         # (K, C)
    y = jnp.dot(p, w, preferred_element_type=jnp.float32) + b_ref[...]
    out = _in_relu(y, g_ref[...], be_ref[...], axis=0)      # (4, C)
    out = out + r_ref[0]                                    # block_2_1(x) + x
    o_ref[0] = jnp.max(out, axis=0, keepdims=True)          # block_2_pool (2x2 max)


def _head_kernel(f_ref, fcw_ref, fcb_ref, w1_ref, b1_ref, w2_ref, b2_ref,
                 w3_ref, b3_ref, o_ref):
    """Encoder fc (128->128, per view) + fusion MLP fc1/fc2/fc3 in one kernel.

    fc1(concat(e1,e2,e3)) is computed as sum_k e_k @ W1[k], avoiding the concat.
    """
    fcw = fcw_ref[...].astype(MM_DTYPE)
    h1 = b1_ref[...]                                        # (1, 256), broadcasts over B
    for k in range(3):
        e = jnp.dot(f_ref[k].astype(MM_DTYPE), fcw,
                    preferred_element_type=jnp.float32) + fcb_ref[...]      # (B, 128)
        h1 = h1 + jnp.dot(e.astype(MM_DTYPE), w1_ref[k].astype(MM_DTYPE),
                          preferred_element_type=jnp.float32)               # (B, 256)
    h1 = jnp.maximum(h1, 0.0)
    h2 = jnp.maximum(
        jnp.dot(h1.astype(MM_DTYPE), w2_ref[...].astype(MM_DTYPE),
                preferred_element_type=jnp.float32) + b2_ref[...], 0.0)     # (B, 128)
    o_ref[...] = jnp.dot(h2.astype(MM_DTYPE), w3_ref[...].astype(MM_DTYPE),
                         preferred_element_type=jnp.float32) + b3_ref[...]  # (B, 1)


# ----------------------------------------------------------------------------
# Wrappers around pallas_call
# ----------------------------------------------------------------------------
_PARALLEL = pltpu.CompilerParams(dimension_semantics=("parallel",))


def conv_cf(x, p):
    """Channels-first fused conv layer.  x: (N, Cin, H, W) -> (N, Cout, H, W)."""
    N, Cin, H, W_ = x.shape
    Cout = p["w"].shape[0]
    K, HW = 9 * Cin, H * W_

    # im2col glue (padding=1, stride=1); K index order = (cin, dy, dx).
    xp = jnp.pad(x, ((0, 0), (0, 0), (1, 1), (1, 1)))
    taps = [xp[:, :, dy:dy + H, dx:dx + W_] for dy in range(3) for dx in range(3)]
    patches = jnp.stack(taps, axis=2).reshape(N, K, HW)

    inputs = [patches, p["w"], p["b"].reshape(Cout, 1),
              p["g"].reshape(Cout, 1), p["be"].reshape(Cout, 1)]
    in_specs = [
        pl.BlockSpec((1, K, HW), lambda n: (n, 0, 0)),
        pl.BlockSpec((Cout, K), lambda n: (0, 0)),
        pl.BlockSpec((Cout, 1), lambda n: (0, 0)),
        pl.BlockSpec((Cout, 1), lambda n: (0, 0)),
        pl.BlockSpec((Cout, 1), lambda n: (0, 0)),
    ]
    residual = "wd" in p
    if residual:
        inputs += [x.reshape(N, Cin, HW), p["wd"]]
        in_specs += [pl.BlockSpec((1, Cin, HW), lambda n: (n, 0, 0)),
                     pl.BlockSpec((Cout, Cin), lambda n: (0, 0))]

    out = pl.pallas_call(
        _make_conv_cf_kernel(residual),
        out_shape=jax.ShapeDtypeStruct((N, Cout, HW), jnp.float32),
        grid=(N,),
        in_specs=in_specs,
        out_specs=pl.BlockSpec((1, Cout, HW), lambda n: (n, 0, 0)),
        compiler_params=_PARALLEL,
    )(*inputs)
    return out.reshape(N, Cout, H, W_)


def conv_cl(x, p):
    """Channels-last fused conv layer.  x: (N, H, W, Cin) -> (N, H, W, Cout)."""
    N, H, W_, Cin = x.shape
    Cout = p["w"].shape[1]
    K, HW = 9 * Cin, H * W_

    # im2col glue; K index order = (dy, dx, cin).
    xp = jnp.pad(x, ((0, 0), (1, 1), (1, 1), (0, 0)))
    taps = [xp[:, dy:dy + H, dx:dx + W_, :] for dy in range(3) for dx in range(3)]
    patches = jnp.concatenate(taps, axis=-1).reshape(N, HW, K)

    inputs = [patches, p["w"], p["b"].reshape(1, Cout),
              p["g"].reshape(1, Cout), p["be"].reshape(1, Cout)]
    in_specs = [
        pl.BlockSpec((1, HW, K), lambda n: (n, 0, 0)),
        pl.BlockSpec((K, Cout), lambda n: (0, 0)),
        pl.BlockSpec((1, Cout), lambda n: (0, 0)),
        pl.BlockSpec((1, Cout), lambda n: (0, 0)),
        pl.BlockSpec((1, Cout), lambda n: (0, 0)),
    ]
    residual = "wd" in p
    if residual:
        inputs += [x.reshape(N, HW, Cin), p["wd"]]
        in_specs += [pl.BlockSpec((1, HW, Cin), lambda n: (n, 0, 0)),
                     pl.BlockSpec((Cin, Cout), lambda n: (0, 0))]

    out = pl.pallas_call(
        _make_conv_cl_kernel(residual),
        out_shape=jax.ShapeDtypeStruct((N, HW, Cout), jnp.float32),
        grid=(N,),
        in_specs=in_specs,
        out_specs=pl.BlockSpec((1, HW, Cout), lambda n: (n, 0, 0)),
        compiler_params=_PARALLEL,
    )(*inputs)
    return out.reshape(N, H, W_, Cout)


def tail(x, p, res):
    """rb3 + residual add + block_2_pool, fused.  x, res: (N, 2, 2, C) -> (N, C)."""
    N, H, W_, C = x.shape
    K, HW = 9 * C, H * W_
    xp = jnp.pad(x, ((0, 0), (1, 1), (1, 1), (0, 0)))
    taps = [xp[:, dy:dy + H, dx:dx + W_, :] for dy in range(3) for dx in range(3)]
    patches = jnp.concatenate(taps, axis=-1).reshape(N, HW, K)

    out = pl.pallas_call(
        _tail_kernel,
        out_shape=jax.ShapeDtypeStruct((N, 1, C), jnp.float32),
        grid=(N,),
        in_specs=[
            pl.BlockSpec((1, HW, K), lambda n: (n, 0, 0)),
            pl.BlockSpec((K, C), lambda n: (0, 0)),
            pl.BlockSpec((1, C), lambda n: (0, 0)),
            pl.BlockSpec((1, C), lambda n: (0, 0)),
            pl.BlockSpec((1, C), lambda n: (0, 0)),
            pl.BlockSpec((1, HW, C), lambda n: (n, 0, 0)),
        ],
        out_specs=pl.BlockSpec((1, 1, C), lambda n: (n, 0, 0)),
        compiler_params=_PARALLEL,
    )(patches, p["w"], p["b"].reshape(1, C), p["g"].reshape(1, C),
      p["be"].reshape(1, C), res.reshape(N, HW, C))
    return out.reshape(N, C)


def head(feats, fc, fus):
    """Encoder fc + fusion MLP in one call.  feats: (3, B, 128) -> (B, 1)."""
    _, B, D = feats.shape
    H1 = fus["w1"].shape[2]
    H2 = fus["w2"].shape[1]
    return pl.pallas_call(
        _head_kernel,
        out_shape=jax.ShapeDtypeStruct((B, 1), jnp.float32),
        grid=(1,),
        in_specs=[
            pl.BlockSpec((3, B, D), lambda i: (0, 0, 0)),
            pl.BlockSpec((D, D), lambda i: (0, 0)),
            pl.BlockSpec((1, D), lambda i: (0, 0)),
            pl.BlockSpec((3, D, H1), lambda i: (0, 0, 0)),
            pl.BlockSpec((1, H1), lambda i: (0, 0)),
            pl.BlockSpec((H1, H2), lambda i: (0, 0)),
            pl.BlockSpec((1, H2), lambda i: (0, 0)),
            pl.BlockSpec((H2, 1), lambda i: (0, 0)),
            pl.BlockSpec((1, 1), lambda i: (0, 0)),
        ],
        out_specs=pl.BlockSpec((B, 1), lambda i: (0, 0)),
    )(feats, fc["w"], fc["b"].reshape(1, D),
      fus["w1"], fus["b1"].reshape(1, H1),
      fus["w2"], fus["b2"].reshape(1, H2),
      fus["w3"], fus["b3"].reshape(1, 1))


def maxpool_cf(x):
    N, C, H, W = x.shape
    return x.reshape(N, C, H // 2, 2, W // 2, 2).max(axis=(3, 5))


def maxpool_cl(x):
    N, H, W, C = x.shape
    return x.reshape(N, H // 2, 2, W // 2, 2, C).max(axis=(2, 4))


# ----------------------------------------------------------------------------
# Parameter init (deterministic, synthetic; layouts pre-arranged for the kernels)
# ----------------------------------------------------------------------------
def init_params(key):
    keys = iter(jax.random.split(key, 64))

    def conv_w(cin, cout):  # PyTorch layout (cout, cin, 3, 3)
        w = jax.random.normal(next(keys), (cout, cin, 3, 3), jnp.float32)
        return w * (1.0 / math.sqrt(9 * cin))

    def conv_p_cf(cin, cout, residual=False):
        p = dict(w=conv_w(cin, cout).reshape(cout, cin * 9),            # (Cout, K)
                 b=jax.random.normal(next(keys), (cout,), jnp.float32) * 0.01,
                 g=jnp.ones((cout,), jnp.float32),
                 be=jnp.zeros((cout,), jnp.float32))
        if residual:
            p["wd"] = jax.random.normal(next(keys), (cout, cin), jnp.float32) * (
                1.0 / math.sqrt(cin))
        return p

    def conv_p_cl(cin, cout, residual=False):
        w = conv_w(cin, cout)
        p = dict(w=jnp.transpose(w, (2, 3, 1, 0)).reshape(9 * cin, cout),  # (K, Cout)
                 b=jax.random.normal(next(keys), (cout,), jnp.float32) * 0.01,
                 g=jnp.ones((cout,), jnp.float32),
                 be=jnp.zeros((cout,), jnp.float32))
        if residual:
            p["wd"] = jax.random.normal(next(keys), (cin, cout), jnp.float32) * (
                1.0 / math.sqrt(cin))
        return p

    def lin_p(din, dout):
        return dict(
            w=jax.random.normal(next(keys), (din, dout), jnp.float32) * (
                1.0 / math.sqrt(din)),
            b=jax.random.normal(next(keys), (dout,), jnp.float32) * 0.01)

    feats = [16, 32, 64, 128]
    enc = dict(
        in_tr=conv_p_cf(1, feats[0]),
        bk2=conv_p_cf(feats[0], feats[1], residual=True),
        bk3=conv_p_cf(feats[1], feats[2], residual=True),
        bk4=conv_p_cl(feats[2], feats[3], residual=True),
        rb1=conv_p_cl(feats[3], feats[3]),
        rb2=conv_p_cl(feats[3], feats[3]),
        rb3=conv_p_cl(feats[3], feats[3]),
        fc=lin_p(feats[3], feats[3]),
    )
    fus = dict(
        # fc1 weight split into 3 per-view (128, 256) chunks (== Linear(384, 256)).
        w1=jax.random.normal(next(keys), (3, feats[3], 2 * feats[3]), jnp.float32) * (
            1.0 / math.sqrt(3 * feats[3])),
        b1=jax.random.normal(next(keys), (2 * feats[3],), jnp.float32) * 0.01,
        w2=jax.random.normal(next(keys), (2 * feats[3], feats[3]), jnp.float32) * (
            1.0 / math.sqrt(2 * feats[3])),
        b2=jax.random.normal(next(keys), (feats[3],), jnp.float32) * 0.01,
        w3=jax.random.normal(next(keys), (feats[3], 1), jnp.float32) * (
            1.0 / math.sqrt(feats[3])),
        b3=jax.random.normal(next(keys), (1,), jnp.float32) * 0.01,
    )
    return enc, fus


# ----------------------------------------------------------------------------
# Forward pass (shared encoder on the stacked 3B batch, then fused head)
# ----------------------------------------------------------------------------
def threeview_forward(x1, x2, x3, enc, fus):
    B = x1.shape[0]
    x = jnp.concatenate([x1, x2, x3], axis=0)          # (3B, 1, 32, 32), shared encoder

    # --- channels-first stages (lane axis = spatial) ---
    h = conv_cf(x, enc["in_tr"])                       # (3B, 16, 32, 32)
    h = maxpool_cf(h)                                  # pool1 -> 16x16
    h = conv_cf(h, enc["bk2"])                         # (3B, 32, 16, 16)
    h = maxpool_cf(h)                                  # pool2 -> 8x8
    h = conv_cf(h, enc["bk3"])                         # (3B, 64, 8, 8)
    h = maxpool_cf(h)                                  # pool3 -> 4x4

    # --- switch to channels-last (lane axis = 128 channels) ---
    h = jnp.transpose(h, (0, 2, 3, 1))                 # (3B, 4, 4, 64)
    h = conv_cl(h, enc["bk4"])                         # (3B, 4, 4, 128)
    h = maxpool_cl(h)                                  # block_1_pool -> 2x2

    r = h                                              # residual for block_2_1(x) + x
    h = conv_cl(h, enc["rb1"])
    h = conv_cl(h, enc["rb2"])
    feat = tail(h, enc["rb3"], r)                      # (3B, 128) pooled features

    feats = feat.reshape(3, B, feat.shape[-1])         # regroup by view
    return head(feats, enc["fc"], fus)                 # (B, 1)


# ----------------------------------------------------------------------------
if __name__ == "__main__":
    key = jax.random.PRNGKey(0)
    k_p, k1, k2, k3 = jax.random.split(key, 4)

    enc_p, fus_p = init_params(k_p)

    # Three single-channel views, 32x32 so the 5 halvings + global pool line up.
    B, C, H, W = 2, 1, 32, 32
    x1 = jax.random.normal(k1, (B, C, H, W), jnp.float32)
    x2 = jax.random.normal(k2, (B, C, H, W), jnp.float32)
    x3 = jax.random.normal(k3, (B, C, H, W), jnp.float32)

    fwd = jax.jit(lambda a, b, c: threeview_forward(a, b, c, enc_p, fus_p))
    out = jax.block_until_ready(fwd(x1, x2, x3))

    assert out.shape == (B, 1), out.shape
    assert out.dtype == jnp.float32
    print("KERNEL_OK")
</pallas_src>

<mosaic_0001>
module attributes {stable_mosaic.version = 11 : i64} {
  func.func @kernel(%arg0: i32, %arg1: memref<1x9x1024xf32, #tpu.memory_space<vmem>>, %arg2: memref<16x9xf32, #tpu.memory_space<vmem>>, %arg3: memref<16x1xf32, #tpu.memory_space<vmem>>, %arg4: memref<16x1xf32, #tpu.memory_space<vmem>>, %arg5: memref<16x1xf32, #tpu.memory_space<vmem>>, %arg6: memref<1x16x1024xf32, #tpu.memory_space<vmem>>) attributes {dimension_semantics = [#tpu.dimension_semantics<parallel>], iteration_bounds = array<i64: 6>, scalar_prefetch = 0 : i64, scratch_operands = 0 : i64, tpu.core_type = #tpu.core_type<tc>, window_params = [{transform_indices = @transform_0, window_bounds = array<i64: 1, 9, 1024>}, {pipeline_mode = #tpu.pipeline_mode<synchronous>, transform_indices = @transform_1, window_bounds = array<i64: 16, 9>}, {pipeline_mode = #tpu.pipeline_mode<synchronous>, transform_indices = @transform_2, window_bounds = array<i64: 16, 1>}, {pipeline_mode = #tpu.pipeline_mode<synchronous>, transform_indices = @transform_3, window_bounds = array<i64: 16, 1>}, {pipeline_mode = #tpu.pipeline_mode<synchronous>, transform_indices = @transform_4, window_bounds = array<i64: 16, 1>}, {transform_indices = @transform_5, window_bounds = array<i64: 1, 16, 1024>}]} {
    %c0 = arith.constant 0 : index
    %c0_0 = arith.constant 0 : index
    %c0_1 = arith.constant 0 : index
    %0 = vector.load %arg1[%c0, %c0_0, %c0_1] : memref<1x9x1024xf32, #tpu.memory_space<vmem>>, vector<1x9x1024xf32>
    %1 = vector.shape_cast %0 : vector<1x9x1024xf32> to vector<9x1024xf32>
    %2 = arith.truncf %1 : vector<9x1024xf32> to vector<9x1024xbf16>
    %c0_2 = arith.constant 0 : index
    %c0_3 = arith.constant 0 : index
    %3 = vector.load %arg2[%c0_2, %c0_3] : memref<16x9xf32, #tpu.memory_space<vmem>>, vector<16x9xf32>
    %4 = arith.truncf %3 : vector<16x9xf32> to vector<16x9xbf16>
    %cst = arith.constant dense<0.000000e+00> : vector<16x1024xf32>
    %5 = tpu.matmul %4, %2, %cst {dimension_numbers = #tpu.dot_dimension_numbers<[1], [0], [0], [1], [0, 0, 1, 1], [], []>} : vector<16x9xbf16>, vector<9x1024xbf16>, vector<16x1024xf32> -> vector<16x1024xf32>
    %c0_4 = arith.constant 0 : index
    %c0_5 = arith.constant 0 : index
    %6 = vector.load %arg3[%c0_4, %c0_5] : memref<16x1xf32, #tpu.memory_space<vmem>>, vector<16x1xf32>
    %7 = vector.broadcast %6 : vector<16x1xf32> to vector<16x1024xf32>
    %8 = arith.addf %5, %7 : vector<16x1024xf32>
    %c0_6 = arith.constant 0 : index
    %c0_7 = arith.constant 0 : index
    %9 = vector.load %arg4[%c0_6, %c0_7] : memref<16x1xf32, #tpu.memory_space<vmem>>, vector<16x1xf32>
    %c0_8 = arith.constant 0 : index
    %c0_9 = arith.constant 0 : index
    %10 = vector.load %arg5[%c0_8, %c0_9] : memref<16x1xf32, #tpu.memory_space<vmem>>, vector<16x1xf32>
    %cst_10 = arith.constant dense<0.000000e+00> : vector<16xf32>
    %11 = vector.multi_reduction <add>, %8, %cst_10 [1] : vector<16x1024xf32> to vector<16xf32>
    %12 = vector.shape_cast %11 : vector<16xf32> to vector<16x1xf32>
    %cst_11 = arith.constant 1.024000e+03 : f32
    %13 = vector.broadcast %cst_11 : f32 to vector<16x1xf32>
    %14 = arith.divf %12, %13 : vector<16x1xf32>
    %15 = vector.broadcast %14 : vector<16x1xf32> to vector<16x1024xf32>
    %16 = arith.subf %8, %15 : vector<16x1024xf32>
    %17 = arith.mulf %16, %16 : vector<16x1024xf32>
    %cst_12 = arith.constant dense<0.000000e+00> : vector<16xf32>
    %18 = vector.multi_reduction <add>, %17, %cst_12 [1] : vector<16x1024xf32> to vector<16xf32>
    %19 = vector.shape_cast %18 : vector<16xf32> to vector<16x1xf32>
    %cst_13 = arith.constant 1.024000e+03 : f32
    %20 = vector.broadcast %cst_13 : f32 to vector<16x1xf32>
    %21 = arith.divf %19, %20 : vector<16x1xf32>
    %cst_14 = arith.constant 9.99999974E-6 : f32
    %22 = vector.broadcast %cst_14 : f32 to vector<16x1xf32>
    %23 = arith.addf %21, %22 : vector<16x1xf32>
    %24 = math.rsqrt %23 : vector<16x1xf32>
    %25 = arith.mulf %9, %24 : vector<16x1xf32>
    %26 = arith.mulf %14, %25 : vector<16x1xf32>
    %27 = arith.subf %10, %26 : vector<16x1xf32>
    %28 = vector.broadcast %25 : vector<16x1xf32> to vector<16x1024xf32>
    %29 = arith.mulf %8, %28 : vector<16x1024xf32>
    %30 = vector.broadcast %27 : vector<16x1xf32> to vector<16x1024xf32>
    %31 = arith.addf %29, %30 : vector<16x1024xf32>
    %cst_15 = arith.constant 0.000000e+00 : f32
    %32 = vector.broadcast %cst_15 : f32 to vector<16x1024xf32>
    %33 = arith.maximumf %31, %32 : vector<16x1024xf32>
    %c0_16 = arith.constant 0 : index
    %c0_17 = arith.constant 0 : index
    %c0_18 = arith.constant 0 : index
    %34 = vector.load %arg6[%c0_16, %c0_17, %c0_18] : memref<1x16x1024xf32, #tpu.memory_space<vmem>>, vector<1x16x1024xf32>
    %35 = vector.shape_cast %34 : vector<1x16x1024xf32> to vector<16x1024xf32>
    %36 = vector.shape_cast %33 : vector<16x1024xf32> to vector<1x16x1024xf32>
    tpu.vector_store %arg6[%c0_16, %c0_17, %c0_18], %36 {strides = array<i32>} : memref<1x16x1024xf32, #tpu.memory_space<vmem>>, vector<1x16x1024xf32>,
    return
  }
  func.func @transform_0(%arg0: i32) -> (i32, i32, i32) {
    %c0_i32 = arith.constant 0 : i32
    %c0_i32_0 = arith.constant 0 : i32
    %c0_i32_1 = arith.constant 0 : i32
    return %arg0, %c0_i32, %c0_i32_0 : i32, i32, i32
  }
  func.func @transform_1(%arg0: i32) -> (i32, i32) {
    %c0_i32 = arith.constant 0 : i32
    %c0_i32_0 = arith.constant 0 : i32
    %c0_i32_1 = arith.constant 0 : i32
    return %c0_i32, %c0_i32_0 : i32, i32
  }
  func.func @transform_2(%arg0: i32) -> (i32, i32) {
    %c0_i32 = arith.constant 0 : i32
    %c0_i32_0 = arith.constant 0 : i32
    %c0_i32_1 = arith.constant 0 : i32
    return %c0_i32, %c0_i32_0 : i32, i32
  }
  func.func @transform_3(%arg0: i32) -> (i32, i32) {
    %c0_i32 = arith.constant 0 : i32
    %c0_i32_0 = arith.constant 0 : i32
    %c0_i32_1 = arith.constant 0 : i32
    return %c0_i32, %c0_i32_0 : i32, i32
  }
  func.func @transform_4(%arg0: i32) -> (i32, i32) {
    %c0_i32 = arith.constant 0 : i32
    %c0_i32_0 = arith.constant 0 : i32
    %c0_i32_1 = arith.constant 0 : i32
    return %c0_i32, %c0_i32_0 : i32, i32
  }
  func.func @transform_5(%arg0: i32) -> (i32, i32, i32) {
    %c0_i32 = arith.constant 0 : i32
    %c0_i32_0 = arith.constant 0 : i32
    %c0_i32_1 = arith.constant 0 : i32
    return %arg0, %c0_i32, %c0_i32_0 : i32, i32, i32
  }
}

module attributes {stable_mosaic.version = 11 : i64} {
  func.func @kernel(%arg0: i32, %arg1: memref<1x144x256xf32, #tpu.memory_space<vmem>>, %arg2: memref<32x144xf32, #tpu.memory_space<vmem>>, %arg3: memref<32x1xf32, #tpu.memory_space<vmem>>, %arg4: memref<32x1xf32, #tpu.memory_space<vmem>>, %arg5: memref<32x1xf32, #tpu.memory_space<vmem>>, %arg6: memref<1x16x256xf32, #tpu.memory_space<vmem>>, %arg7: memref<32x16xf32, #tpu.memory_space<vmem>>, %arg8: memref<1x32x256xf32, #tpu.memory_space<vmem>>) attributes {dimension_semantics = [#tpu.dimension_semantics<parallel>], iteration_bounds = array<i64: 6>, scalar_prefetch = 0 : i64, scratch_operands = 0 : i64, tpu.core_type = #tpu.core_type<tc>, window_params = [{transform_indices = @transform_0, window_bounds = array<i64: 1, 144, 256>}, {pipeline_mode = #tpu.pipeline_mode<synchronous>, transform_indices = @transform_1, window_bounds = array<i64: 32, 144>}, {pipeline_mode = #tpu.pipeline_mode<synchronous>, transform_indices = @transform_2, window_bounds = array<i64: 32, 1>}, {pipeline_mode = #tpu.pipeline_mode<synchronous>, transform_indices = @transform_3, window_bounds = array<i64: 32, 1>}, {pipeline_mode = #tpu.pipeline_mode<synchronous>, transform_indices = @transform_4, window_bounds = array<i64: 32, 1>}, {transform_indices = @transform_5, window_bounds = array<i64: 1, 16, 256>}, {pipeline_mode = #tpu.pipeline_mode<synchronous>, transform_indices = @transform_6, window_bounds = array<i64: 32, 16>}, {transform_indices = @transform_7, window_bounds = array<i64: 1, 32, 256>}]} {
    %c0 = arith.constant 0 : index
    %c0_0 = arith.constant 0 : index
    %c0_1 = arith.constant 0 : index
    %0 = vector.load %arg1[%c0, %c0_0, %c0_1] : memref<1x144x256xf32, #tpu.memory_space<vmem>>, vector<1x144x256xf32>
    %1 = vector.shape_cast %0 : vector<1x144x256xf32> to vector<144x256xf32>
    %2 = arith.truncf %1 : vector<144x256xf32> to vector<144x256xbf16>
    %c0_2 = arith.constant 0 : index
    %c0_3 = arith.constant 0 : index
    %3 = vector.load %arg2[%c0_2, %c0_3] : memref<32x144xf32, #tpu.memory_space<vmem>>, vector<32x144xf32>
    %4 = arith.truncf %3 : vector<32x144xf32> to vector<32x144xbf16>
    %cst = arith.constant dense<0.000000e+00> : vector<32x256xf32>
    %5 = tpu.matmul %4, %2, %cst {dimension_numbers = #tpu.dot_dimension_numbers<[1], [0], [0], [1], [0, 0, 1, 1], [], []>} : vector<32x144xbf16>, vector<144x256xbf16>, vector<32x256xf32> -> vector<32x256xf32>
    %c0_4 = arith.constant 0 : index
    %c0_5 = arith.constant 0 : index
    %6 = vector.load %arg3[%c0_4, %c0_5] : memref<32x1xf32, #tpu.memory_space<vmem>>, vector<32x1xf32>
    %7 = vector.broadcast %6 : vector<32x1xf32> to vector<32x256xf32>
    %8 = arith.addf %5, %7 : vector<32x256xf32>
    %c0_6 = arith.constant 0 : index
    %c0_7 = arith.constant 0 : index
    %9 = vector.load %arg4[%c0_6, %c0_7] : memref<32x1xf32, #tpu.memory_space<vmem>>, vector<32x1xf32>
    %c0_8 = arith.constant 0 : index
    %c0_9 = arith.constant 0 : index
    %10 = vector.load %arg5[%c0_8, %c0_9] : memref<32x1xf32, #tpu.memory_space<vmem>>, vector<32x1xf32>
    %cst_10 = arith.constant dense<0.000000e+00> : vector<32xf32>
    %11 = vector.multi_reduction <add>, %8, %cst_10 [1] : vector<32x256xf32> to vector<32xf32>
    %12 = vector.shape_cast %11 : vector<32xf32> to vector<32x1xf32>
    %cst_11 = arith.constant 2.560000e+02 : f32
    %13 = vector.broadcast %cst_11 : f32 to vector<32x1xf32>
    %14 = arith.divf %12, %13 : vector<32x1xf32>
    %15 = vector.broadcast %14 : vector<32x1xf32> to vector<32x256xf32>
    %16 = arith.subf %8, %15 : vector<32x256xf32>
    %17 = arith.mulf %16, %16 : vector<32x256xf32>
    %cst_12 = arith.constant dense<0.000000e+00> : vector<32xf32>
    %18 = vector.multi_reduction <add>, %17, %cst_12 [1] : vector<32x256xf32> to vector<32xf32>
    %19 = vector.shape_cast %18 : vector<32xf32> to vector<32x1xf32>
    %cst_13 = arith.constant 2.560000e+02 : f32
    %20 = vector.broadcast %cst_13 : f32 to vector<32x1xf32>
    %21 = arith.divf %19, %20 : vector<32x1xf32>
    %cst_14 = arith.constant 9.99999974E-6 : f32
    %22 = vector.broadcast %cst_14 : f32 to vector<32x1xf32>
    %23 = arith.addf %21, %22 : vector<32x1xf32>
    %24 = math.rsqrt %23 : vector<32x1xf32>
    %25 = arith.mulf %9, %24 : vector<32x1xf32>
    %26 = arith.mulf %14, %25 : vector<32x1xf32>
    %27 = arith.subf %10, %26 : vector<32x1xf32>
    %28 = vector.broadcast %25 : vector<32x1xf32> to vector<32x256xf32>
    %29 = arith.mulf %8, %28 : vector<32x256xf32>
    %30 = vector.broadcast %27 : vector<32x1xf32> to vector<32x256xf32>
    %31 = arith.addf %29, %30 : vector<32x256xf32>
    %cst_15 = arith.constant 0.000000e+00 : f32
    %32 = vector.broadcast %cst_15 : f32 to vector<32x256xf32>
    %33 = arith.maximumf %31, %32 : vector<32x256xf32>
    %c0_16 = arith.constant 0 : index
    %c0_17 = arith.constant 0 : index
    %34 = vector.load %arg7[%c0_16, %c0_17] : memref<32x16xf32, #tpu.memory_space<vmem>>, vector<32x16xf32>
    %35 = arith.truncf %34 : vector<32x16xf32> to vector<32x16xbf16>
    %c0_18 = arith.constant 0 : index
    %c0_19 = arith.constant 0 : index
    %c0_20 = arith.constant 0 : index
    %36 = vector.load %arg6[%c0_18, %c0_19, %c0_20] : memref<1x16x256xf32, #tpu.memory_space<vmem>>, vector<1x16x256xf32>
    %37 = vector.shape_cast %36 : vector<1x16x256xf32> to vector<16x256xf32>
    %38 = arith.truncf %37 : vector<16x256xf32> to vector<16x256xbf16>
    %cst_21 = arith.constant dense<0.000000e+00> : vector<32x256xf32>
    %39 = tpu.matmul %35, %38, %cst_21 {dimension_numbers = #tpu.dot_dimension_numbers<[1], [0], [0], [1], [0, 0, 1, 1], [], []>} : vector<32x16xbf16>, vector<16x256xbf16>, vector<32x256xf32> -> vector<32x256xf32>
    %40 = arith.addf %33, %39 : vector<32x256xf32>
    %c0_22 = arith.constant 0 : index
    %c0_23 = arith.constant 0 : index
    %c0_24 = arith.constant 0 : index
    %41 = vector.load %arg8[%c0_22, %c0_23, %c0_24] : memref<1x32x256xf32, #tpu.memory_space<vmem>>, vector<1x32x256xf32>
    %42 = vector.shape_cast %41 : vector<1x32x256xf32> to vector<32x256xf32>
    %43 = vector.shape_cast %40 : vector<32x256xf32> to vector<1x32x256xf32>
    tpu.vector_store %arg8[%c0_22, %c0_23, %c0_24], %43 {strides = array<i32>} : memref<1x32x256xf32, #tpu.memory_space<vmem>>, vector<1x32x256xf32>,
    return
  }
  func.func @transform_0(%arg0: i32) -> (i32, i32, i32) {
    %c0_i32 = arith.constant 0 : i32
    %c0_i32_0 = arith.constant 0 : i32
    %c0_i32_1 = arith.constant 0 : i32
    return %arg0, %c0_i32, %c0_i32_0 : i32, i32, i32
  }
  func.func @transform_1(%arg0: i32) -> (i32, i32) {
    %c0_i32 = arith.constant 0 : i32
    %c0_i32_0 = arith.constant 0 : i32
    %c0_i32_1 = arith.constant 0 : i32
    return %c0_i32, %c0_i32_0 : i32, i32
  }
  func.func @transform_2(%arg0: i32) -> (i32, i32) {
    %c0_i32 = arith.constant 0 : i32
    %c0_i32_0 = arith.constant 0 : i32
    %c0_i32_1 = arith.constant 0 : i32
    return %c0_i32, %c0_i32_0 : i32, i32
  }
  func.func @transform_3(%arg0: i32) -> (i32, i32) {
    %c0_i32 = arith.constant 0 : i32
    %c0_i32_0 = arith.constant 0 : i32
    %c0_i32_1 = arith.constant 0 : i32
    return %c0_i32, %c0_i32_0 : i32, i32
  }
  func.func @transform_4(%arg0: i32) -> (i32, i32) {
    %c0_i32 = arith.constant 0 : i32
    %c0_i32_0 = arith.constant 0 : i32
    %c0_i32_1 = arith.constant 0 : i32
    return %c0_i32, %c0_i32_0 : i32, i32
  }
  func.func @transform_5(%arg0: i32) -> (i32, i32, i32) {
    %c0_i32 = arith.constant 0 : i32
    %c0_i32_0 = arith.constant 0 : i32
    %c0_i32_1 = arith.constant 0 : i32
    return %arg0, %c0_i32, %c0_i32_0 : i32, i32, i32
  }
  func.func @transform_6(%arg0: i32) -> (i32, i32) {
    %c0_i32 = arith.constant 0 : i32
    %c0_i32_0 = arith.constant 0 : i32
    %c0_i32_1 = arith.constant 0 : i32
    return %c0_i32, %c0_i32_0 : i32, i32
  }
  func.func @transform_7(%arg0: i32) -> (i32, i32, i32) {
    %c0_i32 = arith.constant 0 : i32
    %c0_i32_0 = arith.constant 0 : i32
    %c0_i32_1 = arith.constant 0 : i32
    return %arg0, %c0_i32, %c0_i32_0 : i32, i32, i32
  }
}

module attributes {stable_mosaic.version = 11 : i64} {
  func.func @kernel(%arg0: i32, %arg1: memref<1x288x64xf32, #tpu.memory_space<vmem>>, %arg2: memref<64x288xf32, #tpu.memory_space<vmem>>, %arg3: memref<64x1xf32, #tpu.memory_space<vmem>>, %arg4: memref<64x1xf32, #tpu.memory_space<vmem>>, %arg5: memref<64x1xf32, #tpu.memory_space<vmem>>, %arg6: memref<1x32x64xf32, #tpu.memory_space<vmem>>, %arg7: memref<64x32xf32, #tpu.memory_space<vmem>>, %arg8: memref<1x64x64xf32, #tpu.memory_space<vmem>>) attributes {dimension_semantics = [#tpu.dimension_semantics<parallel>], iteration_bounds = array<i64: 6>, scalar_prefetch = 0 : i64, scratch_operands = 0 : i64, tpu.core_type = #tpu.core_type<tc>, window_params = [{transform_indices = @transform_0, window_bounds = array<i64: 1, 288, 64>}, {pipeline_mode = #tpu.pipeline_mode<synchronous>, transform_indices = @transform_1, window_bounds = array<i64: 64, 288>}, {pipeline_mode = #tpu.pipeline_mode<synchronous>, transform_indices = @transform_2, window_bounds = array<i64: 64, 1>}, {pipeline_mode = #tpu.pipeline_mode<synchronous>, transform_indices = @transform_3, window_bounds = array<i64: 64, 1>}, {pipeline_mode = #tpu.pipeline_mode<synchronous>, transform_indices = @transform_4, window_bounds = array<i64: 64, 1>}, {transform_indices = @transform_5, window_bounds = array<i64: 1, 32, 64>}, {pipeline_mode = #tpu.pipeline_mode<synchronous>, transform_indices = @transform_6, window_bounds = array<i64: 64, 32>}, {transform_indices = @transform_7, window_bounds = array<i64: 1, 64, 64>}]} {
    %c0 = arith.constant 0 : index
    %c0_0 = arith.constant 0 : index
    %c0_1 = arith.constant 0 : index
    %0 = vector.load %arg1[%c0, %c0_0, %c0_1] : memref<1x288x64xf32, #tpu.memory_space<vmem>>, vector<1x288x64xf32>
    %1 = vector.shape_cast %0 : vector<1x288x64xf32> to vector<288x64xf32>
    %2 = arith.truncf %1 : vector<288x64xf32> to vector<288x64xbf16>
    %c0_2 = arith.constant 0 : index
    %c0_3 = arith.constant 0 : index
    %3 = vector.load %arg2[%c0_2, %c0_3] : memref<64x288xf32, #tpu.memory_space<vmem>>, vector<64x288xf32>
    %4 = arith.truncf %3 : vector<64x288xf32> to vector<64x288xbf16>
    %cst = arith.constant dense<0.000000e+00> : vector<64x64xf32>
    %5 = tpu.matmul %4, %2, %cst {dimension_numbers = #tpu.dot_dimension_numbers<[1], [0], [0], [1], [0, 0, 1, 1], [], []>} : vector<64x288xbf16>, vector<288x64xbf16>, vector<64x64xf32> -> vector<64x64xf32>
    %c0_4 = arith.constant 0 : index
    %c0_5 = arith.constant 0 : index
    %6 = vector.load %arg3[%c0_4, %c0_5] : memref<64x1xf32, #tpu.memory_space<vmem>>, vector<64x1xf32>
    %7 = vector.broadcast %6 : vector<64x1xf32> to vector<64x64xf32>
    %8 = arith.addf %5, %7 : vector<64x64xf32>
    %c0_6 = arith.constant 0 : index
    %c0_7 = arith.constant 0 : index
    %9 = vector.load %arg4[%c0_6, %c0_7] : memref<64x1xf32, #tpu.memory_space<vmem>>, vector<64x1xf32>
    %c0_8 = arith.constant 0 : index
    %c0_9 = arith.constant 0 : index
    %10 = vector.load %arg5[%c0_8, %c0_9] : memref<64x1xf32, #tpu.memory_space<vmem>>, vector<64x1xf32>
    %cst_10 = arith.constant dense<0.000000e+00> : vector<64xf32>
    %11 = vector.multi_reduction <add>, %8, %cst_10 [1] : vector<64x64xf32> to vector<64xf32>
    %12 = vector.shape_cast %11 : vector<64xf32> to vector<64x1xf32>
    %cst_11 = arith.constant 6.400000e+01 : f32
    %13 = vector.broadcast %cst_11 : f32 to vector<64x1xf32>
    %14 = arith.divf %12, %13 : vector<64x1xf32>
    %15 = vector.broadcast %14 : vector<64x1xf32> to vector<64x64xf32>
    %16 = arith.subf %8, %15 : vector<64x64xf32>
    %17 = arith.mulf %16, %16 : vector<64x64xf32>
    %cst_12 = arith.constant dense<0.000000e+00> : vector<64xf32>
    %18 = vector.multi_reduction <add>, %17, %cst_12 [1] : vector<64x64xf32> to vector<64xf32>
    %19 = vector.shape_cast %18 : vector<64xf32> to vector<64x1xf32>
    %cst_13 = arith.constant 6.400000e+01 : f32
    %20 = vector.broadcast %cst_13 : f32 to vector<64x1xf32>
    %21 = arith.divf %19, %20 : vector<64x1xf32>
    %cst_14 = arith.constant 9.99999974E-6 : f32
    %22 = vector.broadcast %cst_14 : f32 to vector<64x1xf32>
    %23 = arith.addf %21, %22 : vector<64x1xf32>
    %24 = math.rsqrt %23 : vector<64x1xf32>
    %25 = arith.mulf %9, %24 : vector<64x1xf32>
    %26 = arith.mulf %14, %25 : vector<64x1xf32>
    %27 = arith.subf %10, %26 : vector<64x1xf32>
    %28 = vector.broadcast %25 : vector<64x1xf32> to vector<64x64xf32>
    %29 = arith.mulf %8, %28 : vector<64x64xf32>
    %30 = vector.broadcast %27 : vector<64x1xf32> to vector<64x64xf32>
    %31 = arith.addf %29, %30 : vector<64x64xf32>
    %cst_15 = arith.constant 0.000000e+00 : f32
    %32 = vector.broadcast %cst_15 : f32 to vector<64x64xf32>
    %33 = arith.maximumf %31, %32 : vector<64x64xf32>
    %c0_16 = arith.constant 0 : index
    %c0_17 = arith.constant 0 : index
    %34 = vector.load %arg7[%c0_16, %c0_17] : memref<64x32xf32, #tpu.memory_space<vmem>>, vector<64x32xf32>
    %35 = arith.truncf %34 : vector<64x32xf32> to vector<64x32xbf16>
    %c0_18 = arith.constant 0 : index
    %c0_19 = arith.constant 0 : index
    %c0_20 = arith.constant 0 : index
    %36 = vector.load %arg6[%c0_18, %c0_19, %c0_20] : memref<1x32x64xf32, #tpu.memory_space<vmem>>, vector<1x32x64xf32>
    %37 = vector.shape_cast %36 : vector<1x32x64xf32> to vector<32x64xf32>
    %38 = arith.truncf %37 : vector<32x64xf32> to vector<32x64xbf16>
    %cst_21 = arith.constant dense<0.000000e+00> : vector<64x64xf32>
    %39 = tpu.matmul %35, %38, %cst_21 {dimension_numbers = #tpu.dot_dimension_numbers<[1], [0], [0], [1], [0, 0, 1, 1], [], []>} : vector<64x32xbf16>, vector<32x64xbf16>, vector<64x64xf32> -> vector<64x64xf32>
    %40 = arith.addf %33, %39 : vector<64x64xf32>
    %c0_22 = arith.constant 0 : index
    %c0_23 = arith.constant 0 : index
    %c0_24 = arith.constant 0 : index
    %41 = vector.load %arg8[%c0_22, %c0_23, %c0_24] : memref<1x64x64xf32, #tpu.memory_space<vmem>>, vector<1x64x64xf32>
    %42 = vector.shape_cast %41 : vector<1x64x64xf32> to vector<64x64xf32>
    %43 = vector.shape_cast %40 : vector<64x64xf32> to vector<1x64x64xf32>
    tpu.vector_store %arg8[%c0_22, %c0_23, %c0_24], %43 {strides = array<i32>} : memref<1x64x64xf32, #tpu.memory_space<vmem>>, vector<1x64x64xf32>,
    return
  }
  func.func @transform_0(%arg0: i32) -> (i32, i32, i32) {
    %c0_i32 = arith.constant 0 : i32
    %c0_i32_0 = arith.constant 0 : i32
    %c0_i32_1 = arith.constant 0 : i32
    return %arg0, %c0_i32, %c0_i32_0 : i32, i32, i32
  }
  func.func @transform_1(%arg0: i32) -> (i32, i32) {
    %c0_i32 = arith.constant 0 : i32
    %c0_i32_0 = arith.constant 0 : i32
    %c0_i32_1 = arith.constant 0 : i32
    return %c0_i32, %c0_i32_0 : i32, i32
  }
  func.func @transform_2(%arg0: i32) -> (i32, i32) {
    %c0_i32 = arith.constant 0 : i32
    %c0_i32_0 = arith.constant 0 : i32
    %c0_i32_1 = arith.constant 0 : i32
    return %c0_i32, %c0_i32_0 : i32, i32
  }
  func.func @transform_3(%arg0: i32) -> (i32, i32) {
    %c0_i32 = arith.constant 0 : i32
    %c0_i32_0 = arith.constant 0 : i32
    %c0_i32_1 = arith.constant 0 : i32
    return %c0_i32, %c0_i32_0 : i32, i32
  }
  func.func @transform_4(%arg0: i32) -> (i32, i32) {
    %c0_i32 = arith.constant 0 : i32
    %c0_i32_0 = arith.constant 0 : i32
    %c0_i32_1 = arith.constant 0 : i32
    return %c0_i32, %c0_i32_0 : i32, i32
  }
  func.func @transform_5(%arg0: i32) -> (i32, i32, i32) {
    %c0_i32 = arith.constant 0 : i32
    %c0_i32_0 = arith.constant 0 : i32
    %c0_i32_1 = arith.constant 0 : i32
    return %arg0, %c0_i32, %c0_i32_0 : i32, i32, i32
  }
  func.func @transform_6(%arg0: i32) -> (i32, i32) {
    %c0_i32 = arith.constant 0 : i32
    %c0_i32_0 = arith.constant 0 : i32
    %c0_i32_1 = arith.constant 0 : i32
    return %c0_i32, %c0_i32_0 : i32, i32
  }
  func.func @transform_7(%arg0: i32) -> (i32, i32, i32) {
    %c0_i32 = arith.constant 0 : i32
    %c0_i32_0 = arith.constant 0 : i32
    %c0_i32_1 = arith.constant 0 : i32
    return %arg0, %c0_i32, %c0_i32_0 : i32, i32, i32
  }
}

module attributes {stable_mosaic.version = 11 : i64} {
  func.func @kernel(%arg0: i32, %arg1: memref<1x16x576xf32, #tpu.memory_space<vmem>>, %arg2: memref<576x128xf32, #tpu.memory_space<vmem>>, %arg3: memref<1x128xf32, #tpu.memory_space<vmem>>, %arg4: memref<1x128xf32, #tpu.memory_space<vmem>>, %arg5: memref<1x128xf32, #tpu.memory_space<vmem>>, %arg6: memref<1x16x64xf32, #tpu.memory_space<vmem>>, %arg7: memref<64x128xf32, #tpu.memory_space<vmem>>, %arg8: memref<1x16x128xf32, #tpu.memory_space<vmem>>) attributes {dimension_semantics = [#tpu.dimension_semantics<parallel>], iteration_bounds = array<i64: 6>, scalar_prefetch = 0 : i64, scratch_operands = 0 : i64, tpu.core_type = #tpu.core_type<tc>, window_params = [{transform_indices = @transform_0, window_bounds = array<i64: 1, 16, 576>}, {pipeline_mode = #tpu.pipeline_mode<synchronous>, transform_indices = @transform_1, window_bounds = array<i64: 576, 128>}, {pipeline_mode = #tpu.pipeline_mode<synchronous>, transform_indices = @transform_2, window_bounds = array<i64: 1, 128>}, {pipeline_mode = #tpu.pipeline_mode<synchronous>, transform_indices = @transform_3, window_bounds = array<i64: 1, 128>}, {pipeline_mode = #tpu.pipeline_mode<synchronous>, transform_indices = @transform_4, window_bounds = array<i64: 1, 128>}, {transform_indices = @transform_5, window_bounds = array<i64: 1, 16, 64>}, {pipeline_mode = #tpu.pipeline_mode<synchronous>, transform_indices = @transform_6, window_bounds = array<i64: 64, 128>}, {transform_indices = @transform_7, window_bounds = array<i64: 1, 16, 128>}]} {
    %c0 = arith.constant 0 : index
    %c0_0 = arith.constant 0 : index
    %c0_1 = arith.constant 0 : index
    %0 = vector.load %arg1[%c0, %c0_0, %c0_1] : memref<1x16x576xf32, #tpu.memory_space<vmem>>, vector<1x16x576xf32>
    %1 = vector.shape_cast %0 : vector<1x16x576xf32> to vector<16x576xf32>
    %2 = arith.truncf %1 : vector<16x576xf32> to vector<16x576xbf16>
    %c0_2 = arith.constant 0 : index
    %c0_3 = arith.constant 0 : index
    %3 = vector.load %arg2[%c0_2, %c0_3] : memref<576x128xf32, #tpu.memory_space<vmem>>, vector<576x128xf32>
    %4 = arith.truncf %3 : vector<576x128xf32> to vector<576x128xbf16>
    %cst = arith.constant dense<0.000000e+00> : vector<16x128xf32>
    %5 = tpu.matmul %2, %4, %cst {dimension_numbers = #tpu.dot_dimension_numbers<[1], [0], [0], [1], [0, 0, 1, 1], [], []>} : vector<16x576xbf16>, vector<576x128xbf16>, vector<16x128xf32> -> vector<16x128xf32>
    %c0_4 = arith.constant 0 : index
    %c0_5 = arith.constant 0 : index
    %6 = vector.load %arg3[%c0_4, %c0_5] : memref<1x128xf32, #tpu.memory_space<vmem>>, vector<1x128xf32>
    %7 = vector.broadcast %6 : vector<1x128xf32> to vector<16x128xf32>
    %8 = arith.addf %5, %7 : vector<16x128xf32>
    %c0_6 = arith.constant 0 : index
    %c0_7 = arith.constant 0 : index
    %9 = vector.load %arg4[%c0_6, %c0_7] : memref<1x128xf32, #tpu.memory_space<vmem>>, vector<1x128xf32>
    %c0_8 = arith.constant 0 : index
    %c0_9 = arith.constant 0 : index
    %10 = vector.load %arg5[%c0_8, %c0_9] : memref<1x128xf32, #tpu.memory_space<vmem>>, vector<1x128xf32>
    %cst_10 = arith.constant dense<0.000000e+00> : vector<128xf32>
    %11 = vector.multi_reduction <add>, %8, %cst_10 [0] : vector<16x128xf32> to vector<128xf32>
    %12 = vector.shape_cast %11 : vector<128xf32> to vector<1x128xf32>
    %cst_11 = arith.constant 1.600000e+01 : f32
    %13 = vector.broadcast %cst_11 : f32 to vector<1x128xf32>
    %14 = arith.divf %12, %13 : vector<1x128xf32>
    %15 = vector.broadcast %14 : vector<1x128xf32> to vector<16x128xf32>
    %16 = arith.subf %8, %15 : vector<16x128xf32>
    %17 = arith.mulf %16, %16 : vector<16x128xf32>
    %cst_12 = arith.constant dense<0.000000e+00> : vector<128xf32>
    %18 = vector.multi_reduction <add>, %17, %cst_12 [0] : vector<16x128xf32> to vector<128xf32>
    %19 = vector.shape_cast %18 : vector<128xf32> to vector<1x128xf32>
    %cst_13 = arith.constant 1.600000e+01 : f32
    %20 = vector.broadcast %cst_13 : f32 to vector<1x128xf32>
    %21 = arith.divf %19, %20 : vector<1x128xf32>
    %cst_14 = arith.constant 9.99999974E-6 : f32
    %22 = vector.broadcast %cst_14 : f32 to vector<1x128xf32>
    %23 = arith.addf %21, %22 : vector<1x128xf32>
    %24 = math.rsqrt %23 : vector<1x128xf32>
    %25 = arith.mulf %9, %24 : vector<1x128xf32>
    %26 = arith.mulf %14, %25 : vector<1x128xf32>
    %27 = arith.subf %10, %26 : vector<1x128xf32>
    %28 = vector.broadcast %25 : vector<1x128xf32> to vector<16x128xf32>
    %29 = arith.mulf %8, %28 : vector<16x128xf32>
    %30 = vector.broadcast %27 : vector<1x128xf32> to vector<16x128xf32>
    %31 = arith.addf %29, %30 : vector<16x128xf32>
    %cst_15 = arith.constant 0.000000e+00 : f32
    %32 = vector.broadcast %cst_15 : f32 to vector<16x128xf32>
    %33 = arith.maximumf %31, %32 : vector<16x128xf32>
    %c0_16 = arith.constant 0 : index
    %c0_17 = arith.constant 0 : index
    %c0_18 = arith.constant 0 : index
    %34 = vector.load %arg6[%c0_16, %c0_17, %c0_18] : memref<1x16x64xf32, #tpu.memory_space<vmem>>, vector<1x16x64xf32>
    %35 = vector.shape_cast %34 : vector<1x16x64xf32> to vector<16x64xf32>
    %36 = arith.truncf %35 : vector<16x64xf32> to vector<16x64xbf16>
    %c0_19 = arith.constant 0 : index
    %c0_20 = arith.constant 0 : index
    %37 = vector.load %arg7[%c0_19, %c0_20] : memref<64x128xf32, #tpu.memory_space<vmem>>, vector<64x128xf32>
    %38 = arith.truncf %37 : vector<64x128xf32> to vector<64x128xbf16>
    %cst_21 = arith.constant dense<0.000000e+00> : vector<16x128xf32>
    %39 = tpu.matmul %36, %38, %cst_21 {dimension_numbers = #tpu.dot_dimension_numbers<[1], [0], [0], [1], [0, 0, 1, 1], [], []>} : vector<16x64xbf16>, vector<64x128xbf16>, vector<16x128xf32> -> vector<16x128xf32>
    %40 = arith.addf %33, %39 : vector<16x128xf32>
    %c0_22 = arith.constant 0 : index
    %c0_23 = arith.constant 0 : index
    %c0_24 = arith.constant 0 : index
    %41 = vector.load %arg8[%c0_22, %c0_23, %c0_24] : memref<1x16x128xf32, #tpu.memory_space<vmem>>, vector<1x16x128xf32>
    %42 = vector.shape_cast %41 : vector<1x16x128xf32> to vector<16x128xf32>
    %43 = vector.shape_cast %40 : vector<16x128xf32> to vector<1x16x128xf32>
    tpu.vector_store %arg8[%c0_22, %c0_23, %c0_24], %43 {strides = array<i32>} : memref<1x16x128xf32, #tpu.memory_space<vmem>>, vector<1x16x128xf32>,
    return
  }
  func.func @transform_0(%arg0: i32) -> (i32, i32, i32) {
    %c0_i32 = arith.constant 0 : i32
    %c0_i32_0 = arith.constant 0 : i32
    %c0_i32_1 = arith.constant 0 : i32
    return %arg0, %c0_i32, %c0_i32_0 : i32, i32, i32
  }
  func.func @transform_1(%arg0: i32) -> (i32, i32) {
    %c0_i32 = arith.constant 0 : i32
    %c0_i32_0 = arith.constant 0 : i32
    %c0_i32_1 = arith.constant 0 : i32
    return %c0_i32, %c0_i32_0 : i32, i32
  }
  func.func @transform_2(%arg0: i32) -> (i32, i32) {
    %c0_i32 = arith.constant 0 : i32
    %c0_i32_0 = arith.constant 0 : i32
    %c0_i32_1 = arith.constant 0 : i32
    return %c0_i32, %c0_i32_0 : i32, i32
  }
  func.func @transform_3(%arg0: i32) -> (i32, i32) {
    %c0_i32 = arith.constant 0 : i32
    %c0_i32_0 = arith.constant 0 : i32
    %c0_i32_1 = arith.constant 0 : i32
    return %c0_i32, %c0_i32_0 : i32, i32
  }
  func.func @transform_4(%arg0: i32) -> (i32, i32) {
    %c0_i32 = arith.constant 0 : i32
    %c0_i32_0 = arith.constant 0 : i32
    %c0_i32_1 = arith.constant 0 : i32
    return %c0_i32, %c0_i32_0 : i32, i32
  }
  func.func @transform_5(%arg0: i32) -> (i32, i32, i32) {
    %c0_i32 = arith.constant 0 : i32
    %c0_i32_0 = arith.constant 0 : i32
    %c0_i32_1 = arith.constant 0 : i32
    return %arg0, %c0_i32, %c0_i32_0 : i32, i32, i32
  }
  func.func @transform_6(%arg0: i32) -> (i32, i32) {
    %c0_i32 = arith.constant 0 : i32
    %c0_i32_0 = arith.constant 0 : i32
    %c0_i32_1 = arith.constant 0 : i32
    return %c0_i32, %c0_i32_0 : i32, i32
  }
  func.func @transform_7(%arg0: i32) -> (i32, i32, i32) {
    %c0_i32 = arith.constant 0 : i32
    %c0_i32_0 = arith.constant 0 : i32
    %c0_i32_1 = arith.constant 0 : i32
    return %arg0, %c0_i32, %c0_i32_0 : i32, i32, i32
  }
}

module attributes {stable_mosaic.version = 11 : i64} {
  func.func @kernel(%arg0: i32, %arg1: memref<1x4x1152xf32, #tpu.memory_space<vmem>>, %arg2: memref<1152x128xf32, #tpu.memory_space<vmem>>, %arg3: memref<1x128xf32, #tpu.memory_space<vmem>>, %arg4: memref<1x128xf32, #tpu.memory_space<vmem>>, %arg5: memref<1x128xf32, #tpu.memory_space<vmem>>, %arg6: memref<1x4x128xf32, #tpu.memory_space<vmem>>) attributes {dimension_semantics = [#tpu.dimension_semantics<parallel>], iteration_bounds = array<i64: 6>, scalar_prefetch = 0 : i64, scratch_operands = 0 : i64, tpu.core_type = #tpu.core_type<tc>, window_params = [{transform_indices = @transform_0, window_bounds = array<i64: 1, 4, 1152>}, {pipeline_mode = #tpu.pipeline_mode<synchronous>, transform_indices = @transform_1, window_bounds = array<i64: 1152, 128>}, {pipeline_mode = #tpu.pipeline_mode<synchronous>, transform_indices = @transform_2, window_bounds = array<i64: 1, 128>}, {pipeline_mode = #tpu.pipeline_mode<synchronous>, transform_indices = @transform_3, window_bounds = array<i64: 1, 128>}, {pipeline_mode = #tpu.pipeline_mode<synchronous>, transform_indices = @transform_4, window_bounds = array<i64: 1, 128>}, {transform_indices = @transform_5, window_bounds = array<i64: 1, 4, 128>}]} {
    %c0 = arith.constant 0 : index
    %c0_0 = arith.constant 0 : index
    %c0_1 = arith.constant 0 : index
    %0 = vector.load %arg1[%c0, %c0_0, %c0_1] : memref<1x4x1152xf32, #tpu.memory_space<vmem>>, vector<1x4x1152xf32>
    %1 = vector.shape_cast %0 : vector<1x4x1152xf32> to vector<4x1152xf32>
    %2 = arith.truncf %1 : vector<4x1152xf32> to vector<4x1152xbf16>
    %c0_2 = arith.constant 0 : index
    %c0_3 = arith.constant 0 : index
    %3 = vector.load %arg2[%c0_2, %c0_3] : memref<1152x128xf32, #tpu.memory_space<vmem>>, vector<1152x128xf32>
    %4 = arith.truncf %3 : vector<1152x128xf32> to vector<1152x128xbf16>
    %cst = arith.constant dense<0.000000e+00> : vector<4x128xf32>
    %5 = tpu.matmul %2, %4, %cst {dimension_numbers = #tpu.dot_dimension_numbers<[1], [0], [0], [1], [0, 0, 1, 1], [], []>} : vector<4x1152xbf16>, vector<1152x128xbf16>, vector<4x128xf32> -> vector<4x128xf32>
    %c0_4 = arith.constant 0 : index
    %c0_5 = arith.constant 0 : index
    %6 = vector.load %arg3[%c0_4, %c0_5] : memref<1x128xf32, #tpu.memory_space<vmem>>, vector<1x128xf32>
    %7 = vector.broadcast %6 : vector<1x128xf32> to vector<4x128xf32>
    %8 = arith.addf %5, %7 : vector<4x128xf32>
    %c0_6 = arith.constant 0 : index
    %c0_7 = arith.constant 0 : index
    %9 = vector.load %arg4[%c0_6, %c0_7] : memref<1x128xf32, #tpu.memory_space<vmem>>, vector<1x128xf32>
    %c0_8 = arith.constant 0 : index
    %c0_9 = arith.constant 0 : index
    %10 = vector.load %arg5[%c0_8, %c0_9] : memref<1x128xf32, #tpu.memory_space<vmem>>, vector<1x128xf32>
    %cst_10 = arith.constant dense<0.000000e+00> : vector<128xf32>
    %11 = vector.multi_reduction <add>, %8, %cst_10 [0] : vector<4x128xf32> to vector<128xf32>
    %12 = vector.shape_cast %11 : vector<128xf32> to vector<1x128xf32>
    %cst_11 = arith.constant 4.000000e+00 : f32
    %13 = vector.broadcast %cst_11 : f32 to vector<1x128xf32>
    %14 = arith.divf %12, %13 : vector<1x128xf32>
    %15 = vector.broadcast %14 : vector<1x128xf32> to vector<4x128xf32>
    %16 = arith.subf %8, %15 : vector<4x128xf32>
    %17 = arith.mulf %16, %16 : vector<4x128xf32>
    %cst_12 = arith.constant dense<0.000000e+00> : vector<128xf32>
    %18 = vector.multi_reduction <add>, %17, %cst_12 [0] : vector<4x128xf32> to vector<128xf32>
    %19 = vector.shape_cast %18 : vector<128xf32> to vector<1x128xf32>
    %cst_13 = arith.constant 4.000000e+00 : f32
    %20 = vector.broadcast %cst_13 : f32 to vector<1x128xf32>
    %21 = arith.divf %19, %20 : vector<1x128xf32>
    %cst_14 = arith.constant 9.99999974E-6 : f32
    %22 = vector.broadcast %cst_14 : f32 to vector<1x128xf32>
    %23 = arith.addf %21, %22 : vector<1x128xf32>
    %24 = math.rsqrt %23 : vector<1x128xf32>
    %25 = arith.mulf %9, %24 : vector<1x128xf32>
    %26 = arith.mulf %14, %25 : vector<1x128xf32>
    %27 = arith.subf %10, %26 : vector<1x128xf32>
    %28 = vector.broadcast %25 : vector<1x128xf32> to vector<4x128xf32>
    %29 = arith.mulf %8, %28 : vector<4x128xf32>
    %30 = vector.broadcast %27 : vector<1x128xf32> to vector<4x128xf32>
    %31 = arith.addf %29, %30 : vector<4x128xf32>
    %cst_15 = arith.constant 0.000000e+00 : f32
    %32 = vector.broadcast %cst_15 : f32 to vector<4x128xf32>
    %33 = arith.maximumf %31, %32 : vector<4x128xf32>
    %c0_16 = arith.constant 0 : index
    %c0_17 = arith.constant 0 : index
    %c0_18 = arith.constant 0 : index
    %34 = vector.load %arg6[%c0_16, %c0_17, %c0_18] : memref<1x4x128xf32, #tpu.memory_space<vmem>>, vector<1x4x128xf32>
    %35 = vector.shape_cast %34 : vector<1x4x128xf32> to vector<4x128xf32>
    %36 = vector.shape_cast %33 : vector<4x128xf32> to vector<1x4x128xf32>
    tpu.vector_store %arg6[%c0_16, %c0_17, %c0_18], %36 {strides = array<i32>} : memref<1x4x128xf32, #tpu.memory_space<vmem>>, vector<1x4x128xf32>,
    return
  }
  func.func @transform_0(%arg0: i32) -> (i32, i32, i32) {
    %c0_i32 = arith.constant 0 : i32
    %c0_i32_0 = arith.constant 0 : i32
    %c0_i32_1 = arith.constant 0 : i32
    return %arg0, %c0_i32, %c0_i32_0 : i32, i32, i32
  }
  func.func @transform_1(%arg0: i32) -> (i32, i32) {
    %c0_i32 = arith.constant 0 : i32
    %c0_i32_0 = arith.constant 0 : i32
    %c0_i32_1 = arith.constant 0 : i32
    return %c0_i32, %c0_i32_0 : i32, i32
  }
  func.func @transform_2(%arg0: i32) -> (i32, i32) {
    %c0_i32 = arith.constant 0 : i32
    %c0_i32_0 = arith.constant 0 : i32
    %c0_i32_1 = arith.constant 0 : i32
    return %c0_i32, %c0_i32_0 : i32, i32
  }
  func.func @transform_3(%arg0: i32) -> (i32, i32) {
    %c0_i32 = arith.constant 0 : i32
    %c0_i32_0 = arith.constant 0 : i32
    %c0_i32_1 = arith.constant 0 : i32
    return %c0_i32, %c0_i32_0 : i32, i32
  }
  func.func @transform_4(%arg0: i32) -> (i32, i32) {
    %c0_i32 = arith.constant 0 : i32
    %c0_i32_0 = arith.constant 0 : i32
    %c0_i32_1 = arith.constant 0 : i32
    return %c0_i32, %c0_i32_0 : i32, i32
  }
  func.func @transform_5(%arg0: i32) -> (i32, i32, i32) {
    %c0_i32 = arith.constant 0 : i32
    %c0_i32_0 = arith.constant 0 : i32
    %c0_i32_1 = arith.constant 0 : i32
    return %arg0, %c0_i32, %c0_i32_0 : i32, i32, i32
  }
}

module attributes {stable_mosaic.version = 11 : i64} {
  func.func @_tail_kernel(%arg0: i32, %arg1: memref<1x4x1152xf32, #tpu.memory_space<vmem>>, %arg2: memref<1152x128xf32, #tpu.memory_space<vmem>>, %arg3: memref<1x128xf32, #tpu.memory_space<vmem>>, %arg4: memref<1x128xf32, #tpu.memory_space<vmem>>, %arg5: memref<1x128xf32, #tpu.memory_space<vmem>>, %arg6: memref<1x4x128xf32, #tpu.memory_space<vmem>>, %arg7: memref<1x1x128xf32, #tpu.memory_space<vmem>>) attributes {dimension_semantics = [#tpu.dimension_semantics<parallel>], iteration_bounds = array<i64: 6>, scalar_prefetch = 0 : i64, scratch_operands = 0 : i64, tpu.core_type = #tpu.core_type<tc>, window_params = [{transform_indices = @transform_0, window_bounds = array<i64: 1, 4, 1152>}, {pipeline_mode = #tpu.pipeline_mode<synchronous>, transform_indices = @transform_1, window_bounds = array<i64: 1152, 128>}, {pipeline_mode = #tpu.pipeline_mode<synchronous>, transform_indices = @transform_2, window_bounds = array<i64: 1, 128>}, {pipeline_mode = #tpu.pipeline_mode<synchronous>, transform_indices = @transform_3, window_bounds = array<i64: 1, 128>}, {pipeline_mode = #tpu.pipeline_mode<synchronous>, transform_indices = @transform_4, window_bounds = array<i64: 1, 128>}, {transform_indices = @transform_5, window_bounds = array<i64: 1, 4, 128>}, {transform_indices = @transform_6, window_bounds = array<i64: 1, 1, 128>}]} {
    %c0 = arith.constant 0 : index
    %c0_0 = arith.constant 0 : index
    %c0_1 = arith.constant 0 : index
    %0 = vector.load %arg1[%c0, %c0_0, %c0_1] : memref<1x4x1152xf32, #tpu.memory_space<vmem>>, vector<1x4x1152xf32>
    %1 = vector.shape_cast %0 : vector<1x4x1152xf32> to vector<4x1152xf32>
    %2 = arith.truncf %1 : vector<4x1152xf32> to vector<4x1152xbf16>
    %c0_2 = arith.constant 0 : index
    %c0_3 = arith.constant 0 : index
    %3 = vector.load %arg2[%c0_2, %c0_3] : memref<1152x128xf32, #tpu.memory_space<vmem>>, vector<1152x128xf32>
    %4 = arith.truncf %3 : vector<1152x128xf32> to vector<1152x128xbf16>
    %cst = arith.constant dense<0.000000e+00> : vector<4x128xf32>
    %5 = tpu.matmul %2, %4, %cst {dimension_numbers = #tpu.dot_dimension_numbers<[1], [0], [0], [1], [0, 0, 1, 1], [], []>} : vector<4x1152xbf16>, vector<1152x128xbf16>, vector<4x128xf32> -> vector<4x128xf32>
    %c0_4 = arith.constant 0 : index
    %c0_5 = arith.constant 0 : index
    %6 = vector.load %arg3[%c0_4, %c0_5] : memref<1x128xf32, #tpu.memory_space<vmem>>, vector<1x128xf32>
    %7 = vector.broadcast %6 : vector<1x128xf32> to vector<4x128xf32>
    %8 = arith.addf %5, %7 : vector<4x128xf32>
    %c0_6 = arith.constant 0 : index
    %c0_7 = arith.constant 0 : index
    %9 = vector.load %arg4[%c0_6, %c0_7] : memref<1x128xf32, #tpu.memory_space<vmem>>, vector<1x128xf32>
    %c0_8 = arith.constant 0 : index
    %c0_9 = arith.constant 0 : index
    %10 = vector.load %arg5[%c0_8, %c0_9] : memref<1x128xf32, #tpu.memory_space<vmem>>, vector<1x128xf32>
    %cst_10 = arith.constant dense<0.000000e+00> : vector<128xf32>
    %11 = vector.multi_reduction <add>, %8, %cst_10 [0] : vector<4x128xf32> to vector<128xf32>
    %12 = vector.shape_cast %11 : vector<128xf32> to vector<1x128xf32>
    %cst_11 = arith.constant 4.000000e+00 : f32
    %13 = vector.broadcast %cst_11 : f32 to vector<1x128xf32>
    %14 = arith.divf %12, %13 : vector<1x128xf32>
    %15 = vector.broadcast %14 : vector<1x128xf32> to vector<4x128xf32>
    %16 = arith.subf %8, %15 : vector<4x128xf32>
    %17 = arith.mulf %16, %16 : vector<4x128xf32>
    %cst_12 = arith.constant dense<0.000000e+00> : vector<128xf32>
    %18 = vector.multi_reduction <add>, %17, %cst_12 [0] : vector<4x128xf32> to vector<128xf32>
    %19 = vector.shape_cast %18 : vector<128xf32> to vector<1x128xf32>
    %cst_13 = arith.constant 4.000000e+00 : f32
    %20 = vector.broadcast %cst_13 : f32 to vector<1x128xf32>
    %21 = arith.divf %19, %20 : vector<1x128xf32>
    %cst_14 = arith.constant 9.99999974E-6 : f32
    %22 = vector.broadcast %cst_14 : f32 to vector<1x128xf32>
    %23 = arith.addf %21, %22 : vector<1x128xf32>
    %24 = math.rsqrt %23 : vector<1x128xf32>
    %25 = arith.mulf %9, %24 : vector<1x128xf32>
    %26 = arith.mulf %14, %25 : vector<1x128xf32>
    %27 = arith.subf %10, %26 : vector<1x128xf32>
    %28 = vector.broadcast %25 : vector<1x128xf32> to vector<4x128xf32>
    %29 = arith.mulf %8, %28 : vector<4x128xf32>
    %30 = vector.broadcast %27 : vector<1x128xf32> to vector<4x128xf32>
    %31 = arith.addf %29, %30 : vector<4x128xf32>
    %cst_15 = arith.constant 0.000000e+00 : f32
    %32 = vector.broadcast %cst_15 : f32 to vector<4x128xf32>
    %33 = arith.maximumf %31, %32 : vector<4x128xf32>
    %c0_16 = arith.constant 0 : index
    %c0_17 = arith.constant 0 : index
    %c0_18 = arith.constant 0 : index
    %34 = vector.load %arg6[%c0_16, %c0_17, %c0_18] : memref<1x4x128xf32, #tpu.memory_space<vmem>>, vector<1x4x128xf32>
    %35 = vector.shape_cast %34 : vector<1x4x128xf32> to vector<4x128xf32>
    %36 = arith.addf %33, %35 : vector<4x128xf32>
    %cst_19 = arith.constant dense<0xFF800000> : vector<128xf32>
    %37 = vector.multi_reduction <maximumf>, %36, %cst_19 [0] : vector<4x128xf32> to vector<128xf32>
    %38 = vector.shape_cast %37 : vector<128xf32> to vector<1x128xf32>
    %c0_20 = arith.constant 0 : index
    %c0_21 = arith.constant 0 : index
    %c0_22 = arith.constant 0 : index
    %39 = vector.load %arg7[%c0_20, %c0_21, %c0_22] : memref<1x1x128xf32, #tpu.memory_space<vmem>>, vector<1x1x128xf32>
    %40 = vector.shape_cast %39 : vector<1x1x128xf32> to vector<1x128xf32>
    %41 = vector.shape_cast %38 : vector<1x128xf32> to vector<1x1x128xf32>
    tpu.vector_store %arg7[%c0_20, %c0_21, %c0_22], %41 {strides = array<i32>} : memref<1x1x128xf32, #tpu.memory_space<vmem>>, vector<1x1x128xf32>,
    return
  }
  func.func @transform_0(%arg0: i32) -> (i32, i32, i32) {
    %c0_i32 = arith.constant 0 : i32
    %c0_i32_0 = arith.constant 0 : i32
    %c0_i32_1 = arith.constant 0 : i32
    return %arg0, %c0_i32, %c0_i32_0 : i32, i32, i32
  }
  func.func @transform_1(%arg0: i32) -> (i32, i32) {
    %c0_i32 = arith.constant 0 : i32
    %c0_i32_0 = arith.constant 0 : i32
    %c0_i32_1 = arith.constant 0 : i32
    return %c0_i32, %c0_i32_0 : i32, i32
  }
  func.func @transform_2(%arg0: i32) -> (i32, i32) {
    %c0_i32 = arith.constant 0 : i32
    %c0_i32_0 = arith.constant 0 : i32
    %c0_i32_1 = arith.constant 0 : i32
    return %c0_i32, %c0_i32_0 : i32, i32
  }
  func.func @transform_3(%arg0: i32) -> (i32, i32) {
    %c0_i32 = arith.constant 0 : i32
    %c0_i32_0 = arith.constant 0 : i32
    %c0_i32_1 = arith.constant 0 : i32
    return %c0_i32, %c0_i32_0 : i32, i32
  }
  func.func @transform_4(%arg0: i32) -> (i32, i32) {
    %c0_i32 = arith.constant 0 : i32
    %c0_i32_0 = arith.constant 0 : i32
    %c0_i32_1 = arith.constant 0 : i32
    return %c0_i32, %c0_i32_0 : i32, i32
  }
  func.func @transform_5(%arg0: i32) -> (i32, i32, i32) {
    %c0_i32 = arith.constant 0 : i32
    %c0_i32_0 = arith.constant 0 : i32
    %c0_i32_1 = arith.constant 0 : i32
    return %arg0, %c0_i32, %c0_i32_0 : i32, i32, i32
  }
  func.func @transform_6(%arg0: i32) -> (i32, i32, i32) {
    %c0_i32 = arith.constant 0 : i32
    %c0_i32_0 = arith.constant 0 : i32
    %c0_i32_1 = arith.constant 0 : i32
    return %arg0, %c0_i32, %c0_i32_0 : i32, i32, i32
  }
}

module attributes {stable_mosaic.version = 11 : i64} {
  func.func @_head_kernel(%arg0: i32, %arg1: memref<3x2x128xf32, #tpu.memory_space<vmem>>, %arg2: memref<128x128xf32, #tpu.memory_space<vmem>>, %arg3: memref<1x128xf32, #tpu.memory_space<vmem>>, %arg4: memref<3x128x256xf32, #tpu.memory_space<vmem>>, %arg5: memref<1x256xf32, #tpu.memory_space<vmem>>, %arg6: memref<256x128xf32, #tpu.memory_space<vmem>>, %arg7: memref<1x128xf32, #tpu.memory_space<vmem>>, %arg8: memref<128x1xf32, #tpu.memory_space<vmem>>, %arg9: memref<1x1xf32, #tpu.memory_space<vmem>>, %arg10: memref<2x1xf32, #tpu.memory_space<vmem>>) attributes {dimension_semantics = [#tpu.dimension_semantics<arbitrary>], iteration_bounds = array<i64: 1>, scalar_prefetch = 0 : i64, scratch_operands = 0 : i64, tpu.core_type = #tpu.core_type<tc>, window_params = [{pipeline_mode = #tpu.pipeline_mode<synchronous>, transform_indices = @transform_0, window_bounds = array<i64: 3, 2, 128>}, {pipeline_mode = #tpu.pipeline_mode<synchronous>, transform_indices = @transform_1, window_bounds = array<i64: 128, 128>}, {pipeline_mode = #tpu.pipeline_mode<synchronous>, transform_indices = @transform_2, window_bounds = array<i64: 1, 128>}, {pipeline_mode = #tpu.pipeline_mode<synchronous>, transform_indices = @transform_3, window_bounds = array<i64: 3, 128, 256>}, {pipeline_mode = #tpu.pipeline_mode<synchronous>, transform_indices = @transform_4, window_bounds = array<i64: 1, 256>}, {pipeline_mode = #tpu.pipeline_mode<synchronous>, transform_indices = @transform_5, window_bounds = array<i64: 256, 128>}, {pipeline_mode = #tpu.pipeline_mode<synchronous>, transform_indices = @transform_6, window_bounds = array<i64: 1, 128>}, {pipeline_mode = #tpu.pipeline_mode<synchronous>, transform_indices = @transform_7, window_bounds = array<i64: 128, 1>}, {pipeline_mode = #tpu.pipeline_mode<synchronous>, transform_indices = @transform_8, window_bounds = array<i64: 1, 1>}, {pipeline_mode = #tpu.pipeline_mode<synchronous>, transform_indices = @transform_9, window_bounds = array<i64: 2, 1>}]} {
    %c0 = arith.constant 0 : index
    %c0_0 = arith.constant 0 : index
    %0 = vector.load %arg2[%c0, %c0_0] : memref<128x128xf32, #tpu.memory_space<vmem>>, vector<128x128xf32>
    %1 = arith.truncf %0 : vector<128x128xf32> to vector<128x128xbf16>
    %c0_1 = arith.constant 0 : index
    %c0_2 = arith.constant 0 : index
    %2 = vector.load %arg5[%c0_1, %c0_2] : memref<1x256xf32, #tpu.memory_space<vmem>>, vector<1x256xf32>
    %c0_3 = arith.constant 0 : index
    %c0_4 = arith.constant 0 : index
    %c0_5 = arith.constant 0 : index
    %3 = vector.load %arg1[%c0_3, %c0_4, %c0_5] : memref<3x2x128xf32, #tpu.memory_space<vmem>>, vector<1x2x128xf32>
    %4 = vector.shape_cast %3 : vector<1x2x128xf32> to vector<2x128xf32>
    %5 = arith.truncf %4 : vector<2x128xf32> to vector<2x128xbf16>
    %cst = arith.constant dense<0.000000e+00> : vector<2x128xf32>
    %6 = tpu.matmul %5, %1, %cst {dimension_numbers = #tpu.dot_dimension_numbers<[1], [0], [0], [1], [0, 0, 1, 1], [], []>} : vector<2x128xbf16>, vector<128x128xbf16>, vector<2x128xf32> -> vector<2x128xf32>
    %c0_6 = arith.constant 0 : index
    %c0_7 = arith.constant 0 : index
    %7 = vector.load %arg3[%c0_6, %c0_7] : memref<1x128xf32, #tpu.memory_space<vmem>>, vector<1x128xf32>
    %8 = vector.broadcast %7 : vector<1x128xf32> to vector<2x128xf32>
    %9 = arith.addf %6, %8 : vector<2x128xf32>
    %10 = arith.truncf %9 : vector<2x128xf32> to vector<2x128xbf16>
    %c0_8 = arith.constant 0 : index
    %c0_9 = arith.constant 0 : index
    %c0_10 = arith.constant 0 : index
    %11 = vector.load %arg4[%c0_8, %c0_9, %c0_10] : memref<3x128x256xf32, #tpu.memory_space<vmem>>, vector<1x128x256xf32>
    %12 = vector.shape_cast %11 : vector<1x128x256xf32> to vector<128x256xf32>
    %13 = arith.truncf %12 : vector<128x256xf32> to vector<128x256xbf16>
    %cst_11 = arith.constant dense<0.000000e+00> : vector<2x256xf32>
    %14 = tpu.matmul %10, %13, %cst_11 {dimension_numbers = #tpu.dot_dimension_numbers<[1], [0], [0], [1], [0, 0, 1, 1], [], []>} : vector<2x128xbf16>, vector<128x256xbf16>, vector<2x256xf32> -> vector<2x256xf32>
    %15 = vector.broadcast %2 : vector<1x256xf32> to vector<2x256xf32>
    %16 = arith.addf %15, %14 : vector<2x256xf32>
    %c1 = arith.constant 1 : index
    %c0_12 = arith.constant 0 : index
    %c0_13 = arith.constant 0 : index
    %17 = vector.load %arg1[%c1, %c0_12, %c0_13] : memref<3x2x128xf32, #tpu.memory_space<vmem>>, vector<1x2x128xf32>
    %18 = vector.shape_cast %17 : vector<1x2x128xf32> to vector<2x128xf32>
    %19 = arith.truncf %18 : vector<2x128xf32> to vector<2x128xbf16>
    %cst_14 = arith.constant dense<0.000000e+00> : vector<2x128xf32>
    %20 = tpu.matmul %19, %1, %cst_14 {dimension_numbers = #tpu.dot_dimension_numbers<[1], [0], [0], [1], [0, 0, 1, 1], [], []>} : vector<2x128xbf16>, vector<128x128xbf16>, vector<2x128xf32> -> vector<2x128xf32>
    %c0_15 = arith.constant 0 : index
    %c0_16 = arith.constant 0 : index
    %21 = vector.load %arg3[%c0_15, %c0_16] : memref<1x128xf32, #tpu.memory_space<vmem>>, vector<1x128xf32>
    %22 = vector.broadcast %21 : vector<1x128xf32> to vector<2x128xf32>
    %23 = arith.addf %20, %22 : vector<2x128xf32>
    %24 = arith.truncf %23 : vector<2x128xf32> to vector<2x128xbf16>
    %c1_17 = arith.constant 1 : index
    %c0_18 = arith.constant 0 : index
    %c0_19 = arith.constant 0 : index
    %25 = vector.load %arg4[%c1_17, %c0_18, %c0_19] : memref<3x128x256xf32, #tpu.memory_space<vmem>>, vector<1x128x256xf32>
    %26 = vector.shape_cast %25 : vector<1x128x256xf32> to vector<128x256xf32>
    %27 = arith.truncf %26 : vector<128x256xf32> to vector<128x256xbf16>
    %cst_20 = arith.constant dense<0.000000e+00> : vector<2x256xf32>
    %28 = tpu.matmul %24, %27, %cst_20 {dimension_numbers = #tpu.dot_dimension_numbers<[1], [0], [0], [1], [0, 0, 1, 1], [], []>} : vector<2x128xbf16>, vector<128x256xbf16>, vector<2x256xf32> -> vector<2x256xf32>
    %29 = arith.addf %16, %28 : vector<2x256xf32>
    %c2 = arith.constant 2 : index
    %c0_21 = arith.constant 0 : index
    %c0_22 = arith.constant 0 : index
    %30 = vector.load %arg1[%c2, %c0_21, %c0_22] : memref<3x2x128xf32, #tpu.memory_space<vmem>>, vector<1x2x128xf32>
    %31 = vector.shape_cast %30 : vector<1x2x128xf32> to vector<2x128xf32>
    %32 = arith.truncf %31 : vector<2x128xf32> to vector<2x128xbf16>
    %cst_23 = arith.constant dense<0.000000e+00> : vector<2x128xf32>
    %33 = tpu.matmul %32, %1, %cst_23 {dimension_numbers = #tpu.dot_dimension_numbers<[1], [0], [0], [1], [0, 0, 1, 1], [], []>} : vector<2x128xbf16>, vector<128x128xbf16>, vector<2x128xf32> -> vector<2x128xf32>
    %c0_24 = arith.constant 0 : index
    %c0_25 = arith.constant 0 : index
    %34 = vector.load %arg3[%c0_24, %c0_25] : memref<1x128xf32, #tpu.memory_space<vmem>>, vector<1x128xf32>
    %35 = vector.broadcast %34 : vector<1x128xf32> to vector<2x128xf32>
    %36 = arith.addf %33, %35 : vector<2x128xf32>
    %37 = arith.truncf %36 : vector<2x128xf32> to vector<2x128xbf16>
    %c2_26 = arith.constant 2 : index
    %c0_27 = arith.constant 0 : index
    %c0_28 = arith.constant 0 : index
    %38 = vector.load %arg4[%c2_26, %c0_27, %c0_28] : memref<3x128x256xf32, #tpu.memory_space<vmem>>, vector<1x128x256xf32>
    %39 = vector.shape_cast %38 : vector<1x128x256xf32> to vector<128x256xf32>
    %40 = arith.truncf %39 : vector<128x256xf32> to vector<128x256xbf16>
    %cst_29 = arith.constant dense<0.000000e+00> : vector<2x256xf32>
    %41 = tpu.matmul %37, %40, %cst_29 {dimension_numbers = #tpu.dot_dimension_numbers<[1], [0], [0], [1], [0, 0, 1, 1], [], []>} : vector<2x128xbf16>, vector<128x256xbf16>, vector<2x256xf32> -> vector<2x256xf32>
    %42 = arith.addf %29, %41 : vector<2x256xf32>
    %cst_30 = arith.constant 0.000000e+00 : f32
    %43 = vector.broadcast %cst_30 : f32 to vector<2x256xf32>
    %44 = arith.maximumf %42, %43 : vector<2x256xf32>
    %45 = arith.truncf %44 : vector<2x256xf32> to vector<2x256xbf16>
    %c0_31 = arith.constant 0 : index
    %c0_32 = arith.constant 0 : index
    %46 = vector.load %arg6[%c0_31, %c0_32] : memref<256x128xf32, #tpu.memory_space<vmem>>, vector<256x128xf32>
    %47 = arith.truncf %46 : vector<256x128xf32> to vector<256x128xbf16>
    %cst_33 = arith.constant dense<0.000000e+00> : vector<2x128xf32>
    %48 = tpu.matmul %45, %47, %cst_33 {dimension_numbers = #tpu.dot_dimension_numbers<[1], [0], [0], [1], [0, 0, 1, 1], [], []>} : vector<2x256xbf16>, vector<256x128xbf16>, vector<2x128xf32> -> vector<2x128xf32>
    %c0_34 = arith.constant 0 : index
    %c0_35 = arith.constant 0 : index
    %49 = vector.load %arg7[%c0_34, %c0_35] : memref<1x128xf32, #tpu.memory_space<vmem>>, vector<1x128xf32>
    %50 = vector.broadcast %49 : vector<1x128xf32> to vector<2x128xf32>
    %51 = arith.addf %48, %50 : vector<2x128xf32>
    %cst_36 = arith.constant 0.000000e+00 : f32
    %52 = vector.broadcast %cst_36 : f32 to vector<2x128xf32>
    %53 = arith.maximumf %51, %52 : vector<2x128xf32>
    %54 = arith.truncf %53 : vector<2x128xf32> to vector<2x128xbf16>
    %c0_37 = arith.constant 0 : index
    %c0_38 = arith.constant 0 : index
    %55 = vector.load %arg8[%c0_37, %c0_38] : memref<128x1xf32, #tpu.memory_space<vmem>>, vector<128x1xf32>
    %56 = arith.truncf %55 : vector<128x1xf32> to vector<128x1xbf16>
    %cst_39 = arith.constant dense<0.000000e+00> : vector<2x1xf32>
    %57 = tpu.matmul %54, %56, %cst_39 {dimension_numbers = #tpu.dot_dimension_numbers<[1], [0], [0], [1], [0, 0, 1, 1], [], []>} : vector<2x128xbf16>, vector<128x1xbf16>, vector<2x1xf32> -> vector<2x1xf32>
    %c0_40 = arith.constant 0 : index
    %c0_41 = arith.constant 0 : index
    %58 = vector.load %arg9[%c0_40, %c0_41] : memref<1x1xf32, #tpu.memory_space<vmem>>, vector<1x1xf32>
    %59 = vector.broadcast %58 : vector<1x1xf32> to vector<2x1xf32>
    %60 = arith.addf %57, %59 : vector<2x1xf32>
    %c0_42 = arith.constant 0 : index
    %c0_43 = arith.constant 0 : index
    %61 = vector.load %arg10[%c0_42, %c0_43] : memref<2x1xf32, #tpu.memory_space<vmem>>, vector<2x1xf32>
    tpu.vector_store %arg10[%c0_42, %c0_43], %60 {strides = array<i32>} : memref<2x1xf32, #tpu.memory_space<vmem>>, vector<2x1xf32>,
    return
  }
  func.func @transform_0(%arg0: i32) -> (i32, i32, i32) {
    %c0_i32 = arith.constant 0 : i32
    %c0_i32_0 = arith.constant 0 : i32
    %c0_i32_1 = arith.constant 0 : i32
    %c0_i32_2 = arith.constant 0 : i32
    return %c0_i32, %c0_i32_0, %c0_i32_1 : i32, i32, i32
  }
  func.func @transform_1(%arg0: i32) -> (i32, i32) {
    %c0_i32 = arith.constant 0 : i32
    %c0_i32_0 = arith.constant 0 : i32
    %c0_i32_1 = arith.constant 0 : i32
    return %c0_i32, %c0_i32_0 : i32, i32
  }
  func.func @transform_2(%arg0: i32) -> (i32, i32) {
    %c0_i32 = arith.constant 0 : i32
    %c0_i32_0 = arith.constant 0 : i32
    %c0_i32_1 = arith.constant 0 : i32
    return %c0_i32, %c0_i32_0 : i32, i32
  }
  func.func @transform_3(%arg0: i32) -> (i32, i32, i32) {
    %c0_i32 = arith.constant 0 : i32
    %c0_i32_0 = arith.constant 0 : i32
    %c0_i32_1 = arith.constant 0 : i32
    %c0_i32_2 = arith.constant 0 : i32
    return %c0_i32, %c0_i32_0, %c0_i32_1 : i32, i32, i32
  }
  func.func @transform_4(%arg0: i32) -> (i32, i32) {
    %c0_i32 = arith.constant 0 : i32
    %c0_i32_0 = arith.constant 0 : i32
    %c0_i32_1 = arith.constant 0 : i32
    return %c0_i32, %c0_i32_0 : i32, i32
  }
  func.func @transform_5(%arg0: i32) -> (i32, i32) {
    %c0_i32 = arith.constant 0 : i32
    %c0_i32_0 = arith.constant 0 : i32
    %c0_i32_1 = arith.constant 0 : i32
    return %c0_i32, %c0_i32_0 : i32, i32
  }
  func.func @transform_6(%arg0: i32) -> (i32, i32) {
    %c0_i32 = arith.constant 0 : i32
    %c0_i32_0 = arith.constant 0 : i32
    %c0_i32_1 = arith.constant 0 : i32
    return %c0_i32, %c0_i32_0 : i32, i32
  }
  func.func @transform_7(%arg0: i32) -> (i32, i32) {
    %c0_i32 = arith.constant 0 : i32
    %c0_i32_0 = arith.constant 0 : i32
    %c0_i32_1 = arith.constant 0 : i32
    return %c0_i32, %c0_i32_0 : i32, i32
  }
  func.func @transform_8(%arg0: i32) -> (i32, i32) {
    %c0_i32 = arith.constant 0 : i32
    %c0_i32_0 = arith.constant 0 : i32
    %c0_i32_1 = arith.constant 0 : i32
    return %c0_i32, %c0_i32_0 : i32, i32
  }
  func.func @transform_9(%arg0: i32) -> (i32, i32) {
    %c0_i32 = arith.constant 0 : i32
    %c0_i32_0 = arith.constant 0 : i32
    %c0_i32_1 = arith.constant 0 : i32
    return %c0_i32, %c0_i32_0 : i32, i32
  }
}

</mosaic_0001>

<bundles_post_ra>
// kernel: _lambda_.8
= control target key start
LH: loop header
LB: loop body
LE: loop exit
PB: predicated region body
PF: predicated region fallthrough
CT: control target
= control target key end

     0   :  { %s741_s18 = smov 0   ;;  %s935_s0 = inlined_call_operand.vmem [shape: f32[6,9,1024], index: 0, kind: input, shape index: {}]   ;;  %s936_s1 = inlined_call_operand.vmem [shape: f32[16,9], index: 1, kind: input, shape index: {}]   ;;  %s937_s2 = inlined_call_operand.vmem [shape: f32[16,1], index: 2, kind: input, shape index: {}]   ;;  %s938_s3 = inlined_call_operand.vmem [shape: f32[16,1], index: 3, kind: input, shape index: {}]   ;;  %s939_s4 = inlined_call_operand.vmem [shape: f32[16,1], index: 4, kind: input, shape index: {}]   ;;  %s940_s5 = inlined_call_operand.vmem [shape: f32[6,16,1024], index: 5, kind: output, shape index: {}]  }
   0x1 LB: > { %s659_s19 = sadd.s32 4294967295, %s706_s18   ;;  %p663_p0 = scmp.ge.s32.totalorder %s706_s18, 1  ;;  %s706_s18 = sphi %s741_s18, %s15_s18  }
   0x2   : > { %p187_p1 = scmp.lt.s32.totalorder %s706_s18, 7 }
   0x4   : > { %p188_p2 = pnand %p663_p0, %p187_p1 }
   0x5   : > { %p215_p3 = scmp.lt.s32.totalorder (!%p188_p2), %s659_s19, 5 }
   0x6   : > { %191 = sbr.rel (%p188_p2) target bundleno = 593 (0x251), region = 40 }
   0xb   : > { %vm269_vm0 = vcmask 1043456   ;;  %v253_v0 = vld [vmem:[%s937_s2] sm:$0xff]  ;;  %s942_s19 = smov (!%p215_p3, %s659_s19), 5  ;;  %v708_v1 = vmov 0   ;;  %vm270_vm1 = vcmask 1044480   ;;  %v709_v2 = vmov 65535  }
   0xc   : > { %691 = vset.pattern.permute.xlu0 %v708_v1  ;;  %693 = vset.pattern.permute.xlu2 %v708_v1  ;;  %v271_v3 = vsel %vm269_vm0, 4294967295, %v709_v2  ;;  %s678_s22 = sshll.u32 %s942_s19, 7  ;;  %v250_v4 = vld [vmem:[%s936_s1] sm:$0xff]  ;;  %v251_v5 = vld [vmem:[%s936_s1 + $0x8] sm:$0xff]  ;;  %vm265_vm2 = vcmask 72704  }
   0xd   : > { %257 = vperm.xlu0 %691, %v253_v0   ;;  %692 = vset.pattern.permute.xlu1 %v708_v1  ;;  %s760_s25 = scalar_lea.vmem %s935_s0, %s678_s22  ;;  %v272_v8 = vsel %vm270_vm1, %v271_v3, 0  ;;  %v254_v10 = vld [vmem:[%s937_s2 + $0x8] sm:$0xff]  ;;  %v252_v22 = vpack.c.bf16 %v251_v5, %v250_v4  ;;  %s906_s17 = scalar_lea.vmem %s940_s5, %s678_s22 }
   0xe   : > { %v226_v6 = vld [vmem:[%s760_s25] sm:$0xff]  ;;  %v227_v9 = vld [vmem:[%s760_s25 + $0x8] sm:$0xff]  ;;  %v228_v13 = vld [vmem:[%s760_s25 + $0x10] sm:$0xff] }
   0xf   : > { %v234_v7 = vld [vmem:[%s760_s25 + $0x40] sm:$0x1]  ;;  %v235_v12 = vld [vmem:[%s760_s25 + $0x48] sm:$0x1]  ;;  %v236_v14 = vld [vmem:[%s760_s25 + $0x50] sm:$0x1] }
  0x10   : > { %v242_v11 = vpack.c.bf16 %v234_v7, %v226_v6  ;;  %v243_v15 = vpack.c.bf16 %v235_v12, %v227_v9  ;;  %v244_v16 = vpack.c.bf16 %v236_v14, %v228_v13  ;;  %v229_v17 = vld [vmem:[%s760_s25 + $0x18] sm:$0xff]  ;;  %v232_v19 = vld [vmem:[%s760_s25 + $0x30] sm:$0xff]  ;;  %v230_v24 = vld [vmem:[%s760_s25 + $0x20] sm:$0xff] }
  0x11   : > { %v237_v18 = vld [vmem:[%s760_s25 + $0x58] sm:$0x1]  ;;  %v240_v23 = vld [vmem:[%s760_s25 + $0x70] sm:$0x1]  ;;  %v238_v25 = vld [vmem:[%s760_s25 + $0x60] sm:$0x1] }
  0x12   : > { %v274_v20 = vand.u32 %v272_v8, %v242_v11  ;;  %v245_v21 = vpack.c.bf16 %v237_v18, %v229_v17  ;;  %v277_v26 = vand.u32 %v272_v8, %v243_v15  ;;  %v280_v27 = vand.u32 %v272_v8, %v244_v16  ;;  %v233_v30 = vld [vmem:[%s760_s25 + $0x38] sm:$0xff]  ;;  %v231_v32 = vld [vmem:[%s760_s25 + $0x28] sm:$0xff] }
  0x13   : > { %v248_v28 = vpack.c.bf16 %v240_v23, %v232_v19  ;;  %v246_v29 = vpack.c.bf16 %v238_v25, %v230_v24  ;;  %v241_v31 = vld [vmem:[%s760_s25 + $0x78] sm:$0x1]  ;;  %v239_v35 = vld [vmem:[%s760_s25 + $0x68] sm:$0x1]  ;;  %v710_v25 = vmov 1024.0  }
  0x14   : > { %304 = vmatpush.bf16.msra.mxu0 %v274_v20  ;;  %v283_v33 = vand.u32 %v272_v8, %v245_v21  ;;  %v249_v34 = vpack.c.bf16 %v241_v31, %v233_v30  ;;  %318 = vmatpush.bf16.msra.mxu1 %v277_v26  ;;  %v247_v38 = vpack.c.bf16 %v239_v35, %v231_v32  ;;  %694 = vrcp.f32 %v710_v25 }
  0x15   : > { %262 = vperm.xlu0 %691, %v254_v10   ;;  %332 = vmatpush.bf16.msra.mxu2 %v280_v27  ;;  %v292_v36 = vand.u32 %v272_v8, %v248_v28  ;;  %v286_v37 = vand.u32 %v272_v8, %v246_v29 }
  0x16   : > { %346 = vmatpush.bf16.msra.mxu3 %v283_v33  ;;  %v295_v39 = vand.u32 %v272_v8, %v249_v34  ;;  %v289_v40 = vand.u32 %v272_v8, %v247_v38 }
  0x17   : > { %668 = vmatmul.msk.bf16.vlgmr.msra.gmra.mxu0 %vm265_vm2, %v252_v22  ;;  %669 = vmatmul.msk.bf16.vlgmr.msra.gmra.mxu1 %vm265_vm2, %v252_v22 }
  0x18   : > { %670 = vmatmul.msk.bf16.vlgmr.msra.gmra.mxu2 %vm265_vm2, %v252_v22  ;;  %360 = vmatpush.bf16.msrb.mxu0 %v286_v37 }
  0x19   : > { %388 = vmatpush.bf16.msrb.mxu2 %v292_v36  ;;  %671 = vmatmul.msk.bf16.vlgmr.msra.gmra.mxu3 %vm265_vm2, %v252_v22 }
  0x1a   : > { %402 = vmatpush.bf16.msrb.mxu3 %v295_v39  ;;  %374 = vmatpush.bf16.msrb.mxu1 %v289_v40  ;;  %v695_v26 = vpop.eup %694 }
  0x1b   : > { %v432_v27 = vmul.f32 1024.0, %v695_v26  ;;  %vm436_vm3 = vweird.f32 %v695_v26 }
  0x1d   : > { %v433_v28 = vsub.f32 1.0, %v432_v27 }
  0x1f   : > { %v434_v29 = vmul.f32 %v695_v26, %v433_v28 }
  0x21   : > { %v435_v30 = vadd.f32 %v695_v26, %v434_v29 }
  0x23   : > { %v437_v31 = vsel %vm436_vm3, %v695_v26, %v435_v30 }
  0x27   : > { %672 = vmatmul.msk.bf16.vlgmr.msrb.gmra.mxu0 %vm265_vm2, %v252_v22  ;;  %673 = vmatmul.msk.bf16.vlgmr.msrb.gmra.mxu1 %vm265_vm2, %v252_v22 }
  0x28   : > { %674 = vmatmul.msk.bf16.vlgmr.msrb.gmra.mxu2 %vm265_vm2, %v252_v22 }
  0x29   : > { %675 = vmatmul.msk.bf16.vlgmr.msrb.gmra.mxu3 %vm265_vm2, %v252_v22 }
  0x7f   : > { %v258_v43 = vpop.permute.xlu0 %257 }
  0x87   : > { %v263_v52 = vpop.permute.xlu0 %262 }
  0x94   : > { %v306_v41 = vpop.f32.mrf.mxu0  ;;  %v320_v42 = vpop.f32.mrf.mxu1 }
  0x95   : > { %v795_v45 = vadd.f32 %v306_v41, %v258_v43  ;;  %v797_v46 = vadd.f32 %v320_v42, %v258_v43 }
  0x97   : > { %v413_v51 = vadd.f32 %v797_v46, %v795_v45 }
  0x9b   : > { %v334_v44 = vpop.f32.mrf.mxu2 }
  0x9c   : > { %v348_v47 = vpop.f32.mrf.mxu3  ;;  %v308_v48 = vpop.f32.mrf.mxu0  ;;  %v799_v50 = vadd.f32 %v334_v44, %v258_v43 }
  0x9d   : > { %v322_v49 = vpop.f32.mrf.mxu1  ;;  %v804_v54 = vadd.f32 %v348_v47, %v258_v43  ;;  %v806_v56 = vadd.f32 %v308_v48, %v263_v52 }
  0x9e   : > { %v414_v53 = vadd.f32 %v413_v51, %v799_v50  ;;  %v808_v57 = vadd.f32 %v322_v49, %v263_v52 }
  0xa0   : > { %v415_v62 = vadd.f32 %v414_v53, %v804_v54  ;;  %v422_v0 = vadd.f32 %v808_v57, %v806_v56 }
  0xa3   : > { %v336_v55 = vpop.f32.mrf.mxu2 }
  0xa4   : > { %v350_v58 = vpop.f32.mrf.mxu3  ;;  %v362_v59 = vpop.f32.mrf.mxu0  ;;  %v813_v63 = vadd.f32 %v336_v55, %v263_v52 }
  0xa5   : > { %v810_v60 = vadd.f32 %v362_v59, %v258_v43  ;;  %v376_v61 = vpop.f32.mrf.mxu1  ;;  %v821_v5 = vadd.f32 %v350_v58, %v263_v52 }
  0xa6   : > { %v423_v2 = vadd.f32 %v422_v0, %v813_v63  ;;  %v819_v3 = vadd.f32 %v376_v61, %v258_v43 }
  0xa7   : > { %v416_v1 = vadd.f32 %v415_v62, %v810_v60 }
  0xa8   : > { %v424_v11 = vadd.f32 %v423_v2, %v821_v5 }
  0xa9   : > { %v417_v9 = vadd.f32 %v416_v1, %v819_v3 }
  0xab   : > { %v390_v4 = vpop.f32.mrf.mxu2 }
  0xac   : > { %v823_v6 = vadd.f32 %v390_v4, %v258_v43  ;;  %v404_v7 = vpop.f32.mrf.mxu3  ;;  %v364_v8 = vpop.f32.mrf.mxu0 }
  0xad   : > { %v826_v10 = vadd.f32 %v364_v8, %v263_v52  ;;  %v829_v12 = vadd.f32 %v404_v7, %v258_v43  ;;  %v378_v14 = vpop.f32.mrf.mxu1 }
  0xae   : > { %v418_v13 = vadd.f32 %v417_v9, %v823_v6  ;;  %v834_v17 = vadd.f32 %v378_v14, %v263_v52 }
  0xaf   : > { %v425_v15 = vadd.f32 %v424_v11, %v826_v10 }
  0xb0   : > { %v419_v16 = vadd.f32 %v418_v13, %v829_v12 }
  0xb1   : > { %v426_v19 = vadd.f32 %v425_v15, %v834_v17 }
  0xb2   : > { %420 = vadd.xlane.f32.xlu1 %v419_v16 }
  0xb3   : > { %v392_v18 = vpop.f32.mrf.mxu2 }
  0xb4   : > { %v837_v20 = vadd.f32 %v392_v18, %v263_v52  ;;  %v406_v21 = vpop.f32.mrf.mxu3 }
  0xb5   : > { %v839_v22 = vadd.f32 %v406_v21, %v263_v52 }
  0xb6   : > { %v427_v23 = vadd.f32 %v426_v19, %v837_v20 }
  0xb8   : > { %v428_v24 = vadd.f32 %v427_v23, %v839_v22 }
  0xba   : > { %429 = vadd.xlane.f32.xlu1 %v428_v24 }
 0x125   : > { %v421_v32 = vpop.xlane.xlu1 %420 }
 0x126   : > { %v843_v33 = vmul.f32 %v437_v31, %v421_v32 }
 0x128   : > { %v440_v34 = vsub.f32 %v795_v45, %v843_v33  ;;  %v441_v35 = vsub.f32 %v797_v46, %v843_v33  ;;  %v442_v36 = vsub.f32 %v799_v50, %v843_v33  ;;  %v443_v37 = vsub.f32 %v804_v54, %v843_v33 }
 0x129   : > { %v444_v40 = vsub.f32 %v810_v60, %v843_v33  ;;  %v445_v44 = vsub.f32 %v819_v3, %v843_v33  ;;  %v446_v51 = vsub.f32 %v823_v6, %v843_v33  ;;  %v447_v61 = vsub.f32 %v829_v12, %v843_v33 }
 0x12a   : > { %v456_v38 = vmul.f32 %v440_v34, %v440_v34  ;;  %v457_v39 = vmul.f32 %v441_v35, %v441_v35  ;;  %v458_v41 = vmul.f32 %v442_v36, %v442_v36  ;;  %v459_v48 = vmul.f32 %v443_v37, %v443_v37 }
 0x12b   : > { %v460_v52 = vmul.f32 %v444_v40, %v444_v40  ;;  %v461_v62 = vmul.f32 %v445_v44, %v445_v44  ;;  %v462_v7 = vmul.f32 %v446_v51, %v446_v51  ;;  %v463_v14 = vmul.f32 %v447_v61, %v447_v61 }
 0x12c   : > { %v472_v42 = vadd.f32 %v457_v39, %v456_v38 }
 0x12d   : > { %v430_v43 = vpop.xlane.xlu1 %429 }
 0x12e   : > { %v857_v47 = vmul.f32 %v437_v31, %v430_v43  ;;  %v473_v49 = vadd.f32 %v472_v42, %v458_v41 }
 0x130   : > { %v474_v53 = vadd.f32 %v473_v49, %v459_v48  ;;  %v448_v55 = vsub.f32 %v806_v56, %v857_v47  ;;  %v449_v58 = vsub.f32 %v808_v57, %v857_v47  ;;  %v450_v59 = vsub.f32 %v813_v63, %v857_v47 }
 0x131   : > { %v451_v1 = vsub.f32 %v821_v5, %v857_v47  ;;  %v452_v9 = vsub.f32 %v826_v10, %v857_v47  ;;  %v453_v16 = vsub.f32 %v834_v17, %v857_v47  ;;  %v454_v23 = vsub.f32 %v837_v20, %v857_v47 }
 0x132   : > { %v475_v0 = vadd.f32 %v474_v53, %v460_v52  ;;  %v464_v2 = vmul.f32 %v448_v55, %v448_v55  ;;  %v465_v4 = vmul.f32 %v449_v58, %v449_v58  ;;  %v466_v11 = vmul.f32 %v450_v59, %v450_v59  ;;  %v409_v53 = vld [vmem:[%s938_s3] sm:$0xff] }
 0x133   : > { %v467_v18 = vmul.f32 %v451_v1, %v451_v1  ;;  %v468_v24 = vmul.f32 %v452_v9, %v452_v9  ;;  %v455_v26 = vsub.f32 %v839_v22, %v857_v47  ;;  %v469_v27 = vmul.f32 %v453_v16, %v453_v16 }
 0x134   : > { %v476_v8 = vadd.f32 %v475_v0, %v461_v62  ;;  %v481_v13 = vadd.f32 %v465_v4, %v464_v2  ;;  %v470_v29 = vmul.f32 %v454_v23, %v454_v23  ;;  %v411_v62 = vld [vmem:[%s939_s4] sm:$0xff]  ;;  %v410_v4 = vld [vmem:[%s938_s3 + $0x8] sm:$0xff] }
 0x135   : > { %v471_v32 = vmul.f32 %v455_v26, %v455_v26 }
 0x136   : > { %v477_v15 = vadd.f32 %v476_v8, %v462_v7  ;;  %v482_v19 = vadd.f32 %v481_v13, %v466_v11  ;;  %v412_v11 = vld [vmem:[%s939_s4 + $0x8] sm:$0xff] }
 0x138   : > { %v478_v21 = vadd.f32 %v477_v15, %v463_v14  ;;  %v483_v25 = vadd.f32 %v482_v19, %v467_v18 }
 0x13a   : > { %479 = vadd.xlane.f32.xlu2 %v478_v21  ;;  %v484_v28 = vadd.f32 %v483_v25, %v468_v24 }
 0x13c   : > { %v485_v30 = vadd.f32 %v484_v28, %v469_v27 }
 0x13e   : > { %v486_v34 = vadd.f32 %v485_v30, %v470_v29 }
 0x140   : > { %v487_v35 = vadd.f32 %v486_v34, %v471_v32 }
 0x142   : > { %488 = vadd.xlane.f32.xlu2 %v487_v35 }
 0x1ad   : > { %v480_v36 = vpop.xlane.xlu2 %479 }
 0x1ae   : > { %v490_v37 = vmul.f32 %v480_v36, %v437_v31 }
 0x1b0   : > { %v492_v38 = vadd.f32 1e-05, %v490_v37 }
 0x1b2   : > { %696 = vrsqrt.f32 %v492_v38  ;;  %vm500_vm5 = vweird.f32 %v492_v38 }
 0x1b5   : > { %v489_v39 = vpop.xlane.xlu2 %488 }
 0x1b6   : > { %v491_v40 = vmul.f32 %v489_v39, %v437_v31 }
 0x1b8   : > { %v697_v41 = vpop.eup %696  ;;  %v493_v42 = vadd.f32 1e-05, %v491_v40 }
 0x1b9   : > { %v495_v43 = vmul.f32 %v697_v41, %v492_v38  ;;  %vm501_vm4 = vweird.f32 %v697_v41 }
 0x1ba   : > { %698 = vrsqrt.f32 %v493_v42  ;;  %vm502_vm6 = vmor %vm500_vm5, %vm501_vm4  ;;  %vm510_vm8 = vweird.f32 %v493_v42 }
 0x1bb   : > { %v496_v44 = vmul.f32 %v697_v41, %v495_v43 }
 0x1bd   : > { %v497_v48 = vmul.f32 0.5, %v496_v44 }
 0x1bf   : > { %v498_v49 = vsub.f32 1.5, %v497_v48 }
 0x1c0   : > { %v699_v51 = vpop.eup %698 }
 0x1c1   : > { %v505_v52 = vmul.f32 %v699_v51, %v493_v42  ;;  %v499_v55 = vmul.f32 %v697_v41, %v498_v49  ;;  %vm511_vm7 = vweird.f32 %v699_v51 }
 0x1c2   : > { %vm512_vm9 = vmor %vm510_vm8, %vm511_vm7 }
 0x1c3   : > { %v506_v58 = vmul.f32 %v699_v51, %v505_v52  ;;  %v503_v59 = vsel %vm502_vm6, %v697_v41, %v499_v55 }
 0x1c4   : > { %v514_v31 = vmul.f32 %v503_v59, %v409_v53 }
 0x1c5   : > { %v507_v61 = vmul.f32 0.5, %v506_v58 }
 0x1c6   : > { %522 = vperm.xlu0 %691, %v514_v31   ;;  %v516_v0 = vmul.f32 %v514_v31, %v843_v33 }
 0x1c7   : > { %v508_v1 = vsub.f32 1.5, %v507_v61 }
 0x1c8   : > { %v518_v2 = vsub.f32 %v411_v62, %v516_v0 }
 0x1c9   : > { %v509_v7 = vmul.f32 %v699_v51, %v508_v1 }
 0x1ca   : > { %548 = vperm.xlu2 %693, %v518_v2  }
 0x1cb   : > { %v513_v8 = vsel %vm512_vm9, %v699_v51, %v509_v7 }
 0x1cc   : > { %v515_v9 = vmul.f32 %v513_v8, %v410_v4 }
 0x1ce   : > { %527 = vperm.xlu1 %692, %v515_v9   ;;  %v517_v33 = vmul.f32 %v515_v9, %v857_v47 }
 0x1d0   : > { %v519_v13 = vsub.f32 %v412_v11, %v517_v33 }
 0x1d2   : > { %553 = vperm.xlu0 %691, %v519_v13  }
 0x224   : > { %v549_v21 = vpop.permute.xlu2 %548 }
 0x238   : > { %v523_v14 = vpop.permute.xlu0 %522 }
 0x239   : > { %v530_v15 = vmul.f32 %v523_v14, %v795_v45  ;;  %v531_v16 = vmul.f32 %v523_v14, %v797_v46  ;;  %v532_v18 = vmul.f32 %v523_v14, %v799_v50  ;;  %v533_v19 = vmul.f32 %v523_v14, %v804_v54 }
 0x23a   : > { %v534_v23 = vmul.f32 %v523_v14, %v810_v60  ;;  %v535_v24 = vmul.f32 %v523_v14, %v819_v3  ;;  %v536_v25 = vmul.f32 %v523_v14, %v823_v6  ;;  %v537_v47 = vmul.f32 %v523_v14, %v829_v12 }
 0x23b   : > { %v556_v26 = vadd.f32 %v549_v21, %v530_v15  ;;  %v557_v27 = vadd.f32 %v549_v21, %v531_v16  ;;  %v558_v28 = vadd.f32 %v549_v21, %v532_v18  ;;  %v559_v29 = vadd.f32 %v549_v21, %v533_v19 }
 0x23c   : > { %v560_v45 = vadd.f32 %v549_v21, %v534_v23  ;;  %v561_v46 = vadd.f32 %v549_v21, %v535_v24  ;;  %v562_v50 = vadd.f32 %v549_v21, %v536_v25  ;;  %v563_v6 = vadd.f32 %v549_v21, %v537_v47 }
 0x23d   : > { %v572_v54 = vmax.f32 %v556_v26, 0.0  ;;  %v573_v60 = vmax.f32 %v557_v27, 0.0  ;;  %v574_v3 = vmax.f32 %v558_v28, 0.0  ;;  %v575_v12 = vmax.f32 %v559_v29, 0.0 }
 0x23e   : > { %v576_v30 = vmax.f32 %v560_v45, 0.0  ;;  %v577_v32 = vmax.f32 %v561_v46, 0.0  ;;  %v578_v35 = vmax.f32 %v562_v50, 0.0  ;;  %v579_v36 = vmax.f32 %v563_v6, 0.0 }
 0x23f   : > { %588 = vst [vmem:[%s906_s17] sm:$0xff] %v572_v54 }
 0x240   : > { %589 = vst [vmem:[%s906_s17 + $0x8] sm:$0xff] %v573_v60  ;;  %v528_v34 = vpop.permute.xlu1 %527 }
 0x241   : > { %590 = vst [vmem:[%s906_s17 + $0x10] sm:$0xff] %v574_v3  ;;  %v538_v37 = vmul.f32 %v528_v34, %v806_v56  ;;  %v539_v38 = vmul.f32 %v528_v34, %v808_v57  ;;  %v540_v39 = vmul.f32 %v528_v34, %v813_v63  ;;  %v541_v40 = vmul.f32 %v528_v34, %v821_v5 }
 0x242   : > { %591 = vst [vmem:[%s906_s17 + $0x18] sm:$0xff] %v575_v12  ;;  %v542_v41 = vmul.f32 %v528_v34, %v826_v10  ;;  %v543_v42 = vmul.f32 %v528_v34, %v834_v17  ;;  %v544_v43 = vmul.f32 %v528_v34, %v837_v20  ;;  %v545_v57 = vmul.f32 %v528_v34, %v839_v22 }
 0x243   : > { %592 = vst [vmem:[%s906_s17 + $0x20] sm:$0xff] %v576_v30 }
 0x244   : > { %593 = vst [vmem:[%s906_s17 + $0x28] sm:$0xff] %v577_v32  ;;  %v554_v44 = vpop.permute.xlu0 %553 }
 0x245   : > { %594 = vst [vmem:[%s906_s17 + $0x30] sm:$0xff] %v578_v35  ;;  %v564_v48 = vadd.f32 %v554_v44, %v538_v37  ;;  %v565_v49 = vadd.f32 %v554_v44, %v539_v38  ;;  %v566_v56 = vadd.f32 %v554_v44, %v540_v39  ;;  %v567_v51 = vadd.f32 %v554_v44, %v541_v40 }
 0x246   : > { %595 = vst [vmem:[%s906_s17 + $0x38] sm:$0xff] %v579_v36  ;;  %v568_v63 = vadd.f32 %v554_v44, %v542_v41  ;;  %v569_v5 = vadd.f32 %v554_v44, %v543_v42  ;;  %v570_v10 = vadd.f32 %v554_v44, %v544_v43  ;;  %v571_v53 = vadd.f32 %v554_v44, %v545_v57 }
 0x247   : > { %v580_v17 = vmax.f32 %v564_v48, 0.0  ;;  %v581_v20 = vmax.f32 %v565_v49, 0.0  ;;  %v582_v52 = vmax.f32 %v566_v56, 0.0  ;;  %v583_v55 = vmax.f32 %v567_v51, 0.0 }
 0x248   : > { %v584_v58 = vmax.f32 %v568_v63, 0.0  ;;  %v585_v59 = vmax.f32 %v569_v5, 0.0  ;;  %v586_v31 = vmax.f32 %v570_v10, 0.0  ;;  %v587_v22 = vmax.f32 %v571_v53, 0.0 }
 0x249   : > { %596 = vst [vmem:[%s906_s17 + $0x40] sm:$0xff] %v580_v17 }
 0x24a   : > { %597 = vst [vmem:[%s906_s17 + $0x48] sm:$0xff] %v581_v20 }
 0x24b   : > { %598 = vst [vmem:[%s906_s17 + $0x50] sm:$0xff] %v582_v52 }
 0x24c   : > { %599 = vst [vmem:[%s906_s17 + $0x58] sm:$0xff] %v583_v55 }
 0x24d   : > { %600 = vst [vmem:[%s906_s17 + $0x60] sm:$0xff] %v584_v58 }
 0x24e   : > { %601 = vst [vmem:[%s906_s17 + $0x68] sm:$0xff] %v585_v59 }
 0x24f   : > { %602 = vst [vmem:[%s906_s17 + $0x70] sm:$0xff] %v586_v31 }
 0x250   : > { %603 = vst [vmem:[%s906_s17 + $0x78] sm:$0xff] %v587_v22 }
 0x251 PF: > { %s15_s18 = sadd.s32 1, %s706_s18  }
 0x252   : > { %p12_p4 = scmp.ge.s32.totalorder %s15_s18, 8  }
 0x254   :  { %14 = sbr.rel (!%p12_p4) target bundleno = 1 (0x1), region = 70 }

// kernel: _lambda_.9
= control target key start
LH: loop header
LB: loop body
LE: loop exit
PB: predicated region body
PF: predicated region fallthrough
CT: control target
= control target key end

     0   :  { %s891_s24 = smov 0   ;;  %s1114_s0 = inlined_call_operand.vmem [shape: f32[6,144,256], index: 0, kind: input, shape index: {}]   ;;  %s1115_s1 = inlined_call_operand.vmem [shape: f32[32,144], index: 1, kind: input, shape index: {}]   ;;  %s1116_s2 = inlined_call_operand.vmem [shape: f32[32,1], index: 2, kind: input, shape index: {}]   ;;  %s1117_s3 = inlined_call_operand.vmem [shape: f32[32,1], index: 3, kind: input, shape index: {}]   ;;  %s1118_s4 = inlined_call_operand.vmem [shape: f32[32,1], index: 4, kind: input, shape index: {}]   ;;  %s1119_s5 = inlined_call_operand.vmem [shape: f32[6,16,256], index: 5, kind: input, shape index: {}]   ;;  %s1120_s6 = inlined_call_operand.vmem [shape: f32[32,16], index: 6, kind: input, shape index: {}]   ;;  %s1121_s7 = inlined_call_operand.vmem [shape: f32[6,32,256], index: 7, kind: output, shape index: {}]  }
   0x1 LB: > { %s795_s25 = sadd.s32 4294967295, %s847_s24   ;;  %p799_p0 = scmp.ge.s32.totalorder %s847_s24, 1  ;;  %s847_s24 = sphi %s891_s24, %s17_s24  }
   0x2   : > { %p247_p1 = scmp.lt.s32.totalorder %s847_s24, 7 }
   0x4   : > { %p248_p2 = pnand %p799_p0, %p247_p1 }
   0x5   : > { %p284_p3 = scmp.lt.s32.totalorder (!%p248_p2), %s795_s25, 5 }
   0x6   : > { %251 = sbr.rel (%p248_p2) target bundleno = 603 (0x25b), region = 48 }
   0xb   : > { %s1123_s25 = smov (!%p284_p3, %s795_s25), 5  ;;  %v849_v14 = vmov 0   ;;  %v355_v19 = vld [vmem:[%s1115_s1 + $0x8] sm:$0xff]  ;;  %v357_v20 = vld [vmem:[%s1115_s1 + $0x18] sm:$0xff]  ;;  %vm390_vm0 = vcmask 130048   ;;  %v366_v36 = vld [vmem:[%s1116_s2] sm:$0xff] }
   0xc   : > { %s817_s26 = smul.u32 288, %s1123_s25  ;;  %828 = vset.pattern.permute.xlu0 %v849_v14  ;;  %829 = vset.pattern.permute.xlu1 %v849_v14  ;;  %v363_v28 = vpack.c.bf16 %v357_v20, %v355_v19  ;;  %v367_v46 = vld [vmem:[%s1116_s2 + $0x8] sm:$0xff]  ;;  %v368_v47 = vld [vmem:[%s1116_s2 + $0x10] sm:$0xff]  ;;  %v361_v55 = vld [vmem:[%s1115_s1 + $0x38] sm:$0xff]  ;;  %s815_s10 = sshll.u32 %s1123_s25, 5 }
   0xd   : > { %830 = vset.pattern.permute.xlu2 %v849_v14  ;;  %372 = vperm.xlu0 %828, %v366_v36   ;;  %v359_v54 = vld [vmem:[%s1115_s1 + $0x28] sm:$0xff]  ;;  %v369_v61 = vld [vmem:[%s1116_s2 + $0x18] sm:$0xff]  ;;  %s293_s13 = scalar_lea.vmem %s1119_s5, %s815_s10  ;;  %s816_s17 = sshll.u32 %s1123_s25, 6 }
   0xe   : > { %s905_s29 = scalar_lea.vmem %s1114_s0, %s817_s26  ;;  %382 = vperm.xlu1 %829, %v368_v47   ;;  %v365_v62 = vpack.c.bf16 %v361_v55, %v359_v54  ;;  %v850_v47 = vmov 256.0   ;;  %s1095_s20 = scalar_lea.vmem %s1121_s7, %s816_s17 }
   0xf   : > { %v328_v0 = vld [vmem:[%s905_s29 + $0xe0] sm:$0xff]  ;;  %v330_v1 = vld [vmem:[%s905_s29 + $0xf0] sm:$0xff]  ;;  %v329_v2 = vld [vmem:[%s905_s29 + $0xe8] sm:$0xff]  ;;  %831 = vrcp.f32 %v850_v47 }
  0x10   : > { %v350_v3 = vpack.c.bf16 %v330_v1, %v328_v0  ;;  %v331_v4 = vld [vmem:[%s905_s29 + $0xf8] sm:$0xff]  ;;  %v324_v5 = vld [vmem:[%s905_s29 + $0xc0] sm:$0xff]  ;;  %v326_v6 = vld [vmem:[%s905_s29 + $0xd0] sm:$0xff] }
  0x11   : > { %v351_v7 = vpack.c.bf16 %v331_v4, %v329_v2  ;;  %v325_v8 = vld [vmem:[%s905_s29 + $0xc8] sm:$0xff]  ;;  %v327_v9 = vld [vmem:[%s905_s29 + $0xd8] sm:$0xff]  ;;  %v348_v10 = vpack.c.bf16 %v326_v6, %v324_v5  ;;  %v320_v12 = vld [vmem:[%s905_s29 + $0xa0] sm:$0xff] }
  0x12   : > { %397 = vmatpush.bf16.msra.mxu0 %v350_v3  ;;  %v349_v11 = vpack.c.bf16 %v327_v9, %v325_v8  ;;  %v322_v13 = vld [vmem:[%s905_s29 + $0xb0] sm:$0xff]  ;;  %v321_v15 = vld [vmem:[%s905_s29 + $0xa8] sm:$0xff]  ;;  %v323_v16 = vld [vmem:[%s905_s29 + $0xb8] sm:$0xff] }
  0x13   : > { %435 = vmatpush.bf16.msra.mxu2 %v351_v7  ;;  %v346_v17 = vpack.c.bf16 %v322_v13, %v320_v12  ;;  %v316_v18 = vld [vmem:[%s905_s29 + $0x80] sm:$0xff]  ;;  %v347_v21 = vpack.c.bf16 %v323_v16, %v321_v15  ;;  %v318_v22 = vld [vmem:[%s905_s29 + $0x90] sm:$0xff]  ;;  %v333_v23 = vld [vmem:[%s905_s29 + $0x108] sm:$0xff] }
  0x14   : > { %v335_v24 = vld [vmem:[%s905_s29 + $0x118] sm:$0xff]  ;;  %v317_v25 = vld [vmem:[%s905_s29 + $0x88] sm:$0xff]  ;;  %v332_v29 = vld [vmem:[%s905_s29 + $0x100] sm:$0xff]  ;;  %v344_v30 = vpack.c.bf16 %v318_v22, %v316_v18 }
  0x15   : > { %v319_v26 = vld [vmem:[%s905_s29 + $0x98] sm:$0xff]  ;;  %v353_v27 = vpack.c.bf16 %v335_v24, %v333_v23  ;;  %v334_v31 = vld [vmem:[%s905_s29 + $0x110] sm:$0xff]  ;;  %v312_v33 = vld [vmem:[%s905_s29 + $0x60] sm:$0xff]  ;;  %377 = vperm.xlu0 %828, %v367_v46  }
  0x16   : > { %398 = vmatpush.bf16.msra.mxu0 %v348_v10  ;;  %v345_v32 = vpack.c.bf16 %v319_v26, %v317_v25  ;;  %v314_v34 = vld [vmem:[%s905_s29 + $0x70] sm:$0xff]  ;;  %v352_v35 = vpack.c.bf16 %v334_v31, %v332_v29  ;;  %v313_v37 = vld [vmem:[%s905_s29 + $0x68] sm:$0xff]  ;;  %v315_v38 = vld [vmem:[%s905_s29 + $0x78] sm:$0xff]  ;;  %387 = vperm.xlu1 %829, %v369_v61  }
  0x17   : > { %436 = vmatpush.bf16.msra.mxu2 %v349_v11  ;;  %461 = vmatpush.bf16.msra.mxu3 %v353_v27  ;;  %v342_v39 = vpack.c.bf16 %v314_v34, %v312_v33  ;;  %v343_v40 = vpack.c.bf16 %v315_v38, %v313_v37  ;;  %v308_v41 = vld [vmem:[%s905_s29 + $0x40] sm:$0xff]  ;;  %v310_v42 = vld [vmem:[%s905_s29 + $0x50] sm:$0xff]  ;;  %v309_v43 = vld [vmem:[%s905_s29 + $0x48] sm:$0xff] }
  0x18   : > { %423 = vmatpush.bf16.msra.mxu1 %v352_v35  ;;  %v311_v44 = vld [vmem:[%s905_s29 + $0x58] sm:$0xff]  ;;  %v340_v45 = vpack.c.bf16 %v310_v42, %v308_v41  ;;  %v304_v49 = vld [vmem:[%s905_s29 + $0x20] sm:$0xff]  ;;  %v306_v50 = vld [vmem:[%s905_s29 + $0x30] sm:$0xff] }
  0x19   : > { %v341_v48 = vpack.c.bf16 %v311_v44, %v309_v43  ;;  %v305_v51 = vld [vmem:[%s905_s29 + $0x28] sm:$0xff]  ;;  %v307_v52 = vld [vmem:[%s905_s29 + $0x38] sm:$0xff]  ;;  %v338_v53 = vpack.c.bf16 %v306_v50, %v304_v49  ;;  %v300_v57 = vld [vmem:[%s905_s29] sm:$0xff] }
  0x1a   : > { %399 = vmatpush.bf16.msra.mxu0 %v346_v17  ;;  %807 = vmatmul.msk.bf16.vlgmr.msra.gmra.mxu3 %vm390_vm0, %v363_v28  ;;  %v339_v56 = vpack.c.bf16 %v307_v52, %v305_v51  ;;  %v302_v58 = vld [vmem:[%s905_s29 + $0x10] sm:$0xff]  ;;  %v301_v59 = vld [vmem:[%s905_s29 + $0x8] sm:$0xff]  ;;  %v303_v60 = vld [vmem:[%s905_s29 + $0x18] sm:$0xff] }
  0x1b   : > { %437 = vmatpush.bf16.msra.mxu2 %v347_v21  ;;  %805 = vmatmul.msk.bf16.vlgmr.msra.gmra.mxu1 %vm390_vm0, %v363_v28  ;;  %v336_v63 = vpack.c.bf16 %v302_v58, %v300_v57  ;;  %v354_v0 = vld [vmem:[%s1115_s1] sm:$0xff]  ;;  %v356_v1 = vld [vmem:[%s1115_s1 + $0x10] sm:$0xff]  ;;  %v337_v2 = vpack.c.bf16 %v303_v60, %v301_v59  ;;  %v665_v57 = vld [vmem:[%s293_s13 + $0x18] sm:$0xff] }
  0x1c   : > { %v362_v3 = vpack.c.bf16 %v356_v1, %v354_v0  ;;  %v358_v4 = vld [vmem:[%s1115_s1 + $0x20] sm:$0xff]  ;;  %v360_v5 = vld [vmem:[%s1115_s1 + $0x30] sm:$0xff] }
  0x1d   : > { %v364_v6 = vpack.c.bf16 %v360_v5, %v358_v4  ;;  %v662_v58 = vld [vmem:[%s293_s13] sm:$0xff]  ;;  %v664_v60 = vld [vmem:[%s293_s13 + $0x10] sm:$0xff] }
  0x1e   : > { %400 = vmatpush.bf16.msra.mxu0 %v344_v30 }
  0x1f   : > { %438 = vmatpush.bf16.msra.mxu2 %v345_v32 }
  0x22   : > { %401 = vmatpush.bf16.msra.mxu0 %v342_v39 }
  0x23   : > { %439 = vmatpush.bf16.msra.mxu2 %v343_v40 }
  0x26   : > { %402 = vmatpush.bf16.msra.mxu0 %v340_v45 }
  0x27   : > { %440 = vmatpush.bf16.msra.mxu2 %v341_v48  ;;  %v832_v48 = vpop.eup %831 }
  0x28   : > { %v494_v49 = vmul.f32 256.0, %v832_v48  ;;  %vm498_vm1 = vweird.f32 %v832_v48 }
  0x2a   : > { %403 = vmatpush.bf16.msra.mxu0 %v338_v53  ;;  %808 = vmatmul.msk.bf16.gmra.mxu3 %vm390_vm0, %v365_v62  ;;  %v495_v50 = vsub.f32 1.0, %v494_v49 }
  0x2b   : > { %441 = vmatpush.bf16.msra.mxu2 %v339_v56  ;;  %806 = vmatmul.msk.bf16.gmra.mxu1 %vm390_vm0, %v365_v62  ;;  %v663_v56 = vld [vmem:[%s293_s13 + $0x8] sm:$0xff] }
  0x2c   : > { %v496_v51 = vmul.f32 %v832_v48, %v495_v50  ;;  %v667_v59 = vpack.c.bf16 %v665_v57, %v663_v56  ;;  %v473_v56 = vld [vmem:[%s1117_s3] sm:$0xff] }
  0x2e   : > { %404 = vmatpush.bf16.msra.mxu0 %v336_v63  ;;  %v497_v52 = vadd.f32 %v832_v48, %v496_v51  ;;  %v666_v63 = vpack.c.bf16 %v664_v60, %v662_v58  ;;  %700 = vmatpush.bf16.msrb.mxu3 %v667_v59 }
  0x2f   : > { %442 = vmatpush.bf16.msra.mxu2 %v337_v2 }
  0x30   : > { %v1008_v53 = vsel %vm498_vm1, %v832_v48, %v497_v52  ;;  %681 = vmatpush.bf16.msrb.mxu1 %v666_v63  ;;  %v477_v63 = vld [vmem:[%s1118_s4] sm:$0xff] }
  0x31   : > { %405 = vmatmul.bf16.vlgmr.msra.gmra.mxu0 %v362_v3 }
  0x32   : > { %443 = vmatmul.bf16.vlgmr.msra.gmra.mxu2 %v362_v3 }
  0x41   : > { %410 = vmatmul.bf16.gmra.mxu0 %v364_v6 }
  0x42   : > { %448 = vmatmul.bf16.gmra.mxu2 %v364_v6 }
  0x7f   : > { %v373_v9 = vpop.permute.xlu0 %372 }
  0x80   : > { %v383_v27 = vpop.permute.xlu1 %382 }
  0x87   : > { %v378_v19 = vpop.permute.xlu0 %377 }
  0x88   : > { %v388_v38 = vpop.permute.xlu1 %387 }
  0x98   : > { %v425_v8 = vpop.f32.mrf.mxu1 }
  0x9d   : > { %v463_v10 = vpop.f32.mrf.mxu3 }
  0xa0   : > { %v427_v17 = vpop.f32.mrf.mxu1 }
  0xa5   : > { %v465_v20 = vpop.f32.mrf.mxu3 }
  0xa8   : > { %v430_v30 = vpop.f32.mrf.mxu1 }
  0xad   : > { %v468_v31 = vpop.f32.mrf.mxu3 }
  0xae   : > { %v406_v7 = vpop.f32.mrf.mxu0 }
  0xaf   : > { %v407_v11 = vadd.f32 %v406_v7, %v373_v9 }
  0xb0   : > { %v432_v42 = vpop.f32.mrf.mxu1 }
  0xb1   : > { %v983_v13 = vadd.f32 %v425_v8, %v407_v11 }
  0xb5   : > { %v444_v12 = vpop.f32.mrf.mxu2  ;;  %v470_v43 = vpop.f32.mrf.mxu3 }
  0xb6   : > { %v445_v14 = vadd.f32 %v444_v12, %v373_v9  ;;  %v408_v15 = vpop.f32.mrf.mxu0 }
  0xb7   : > { %v409_v21 = vadd.f32 %v408_v15, %v378_v19 }
  0xb8   : > { %v985_v16 = vadd.f32 %v463_v10, %v445_v14 }
  0xb9   : > { %v989_v25 = vadd.f32 %v427_v17, %v409_v21 }
  0xba   : > { %v481_v18 = vadd.f32 %v985_v16, %v983_v13 }
  0xbc   : > { %482 = vadd.xlane.f32.xlu2 %v481_v18 }
  0xbd   : > { %v446_v22 = vpop.f32.mrf.mxu2 }
  0xbe   : > { %v447_v23 = vadd.f32 %v446_v22, %v378_v19  ;;  %v411_v24 = vpop.f32.mrf.mxu0 }
  0xbf   : > { %v412_v28 = vadd.f32 %v411_v24, %v383_v27 }
  0xc0   : > { %v991_v26 = vadd.f32 %v465_v20, %v447_v23 }
  0xc1   : > { %v995_v33 = vadd.f32 %v430_v30, %v412_v28  ;;  %v656_v28 = vld [vmem:[%s1120_s6] sm:$0xff] }
  0xc2   : > { %v484_v29 = vadd.f32 %v991_v26, %v989_v25 }
  0xc4   : > { %485 = vadd.xlane.f32.xlu2 %v484_v29  ;;  %v657_v29 = vld [vmem:[%s1120_s6 + $0x8] sm:$0xff] }
  0xc5   : > { %v449_v32 = vpop.f32.mrf.mxu2  ;;  %v660_v30 = vpack.c.bf16 %v657_v29, %v656_v28  ;;  %v479_v29 = vld [vmem:[%s1118_s4 + $0x10] sm:$0xff] }
  0xc6   : > { %v450_v34 = vadd.f32 %v449_v32, %v383_v27  ;;  %v413_v36 = vpop.f32.mrf.mxu0  ;;  %v659_v32 = vld [vmem:[%s1120_s6 + $0x18] sm:$0xff] }
  0xc7   : > { %v414_v39 = vadd.f32 %v413_v36, %v388_v38  ;;  %811 = vmatmul.msk.bf16.vlgmr.msrb.gmra.mxu3 %vm390_vm0, %v660_v30  ;;  %809 = vmatmul.msk.bf16.vlgmr.msrb.gmra.mxu1 %vm390_vm0, %v660_v30  ;;  %v476_v30 = vld [vmem:[%s1117_s3 + $0x18] sm:$0xff] }
  0xc8   : > { %v997_v35 = vadd.f32 %v468_v31, %v450_v34  ;;  %v658_v31 = vld [vmem:[%s1120_s6 + $0x10] sm:$0xff] }
  0xc9   : > { %v1001_v44 = vadd.f32 %v432_v42, %v414_v39  ;;  %v661_v34 = vpack.c.bf16 %v659_v32, %v658_v31 }
  0xca   : > { %v487_v37 = vadd.f32 %v997_v35, %v995_v33 }
  0xcc   : > { %488 = vadd.xlane.f32.xlu0 %v487_v37 }
  0xcd   : > { %v451_v40 = vpop.f32.mrf.mxu2 }
  0xce   : > { %v452_v41 = vadd.f32 %v451_v40, %v388_v38 }
  0xd0   : > { %v1003_v45 = vadd.f32 %v470_v43, %v452_v41 }
  0xd2   : > { %v490_v46 = vadd.f32 %v1003_v45, %v1001_v44 }
  0xd4   : > { %491 = vadd.xlane.f32.xlu1 %v490_v46 }
  0xd7   : > { %812 = vmatmul.msk.bf16.gmra.mxu3 %vm390_vm0, %v661_v34  ;;  %810 = vmatmul.msk.bf16.gmra.mxu1 %vm390_vm0, %v661_v34 }
 0x12f   : > { %v483_v54 = vpop.xlane.xlu2 %482 }
 0x130   : > { %v1014_v55 = vmul.f32 %v1008_v53, %v483_v54 }
 0x132   : > { %v504_v61 = vsub.f32 %v983_v13, %v1014_v55  ;;  %v505_v62 = vsub.f32 %v985_v16, %v1014_v55 }
 0x134   : > { %v512_v0 = vmul.f32 %v504_v61, %v504_v61  ;;  %v513_v1 = vmul.f32 %v505_v62, %v505_v62 }
 0x136   : > { %v520_v2 = vadd.f32 %v513_v1, %v512_v0 }
 0x137   : > { %v486_v3 = vpop.xlane.xlu2 %485 }
 0x138   : > { %v1021_v4 = vmul.f32 %v1008_v53, %v486_v3  ;;  %521 = vadd.xlane.f32.xlu2 %v520_v2 }
 0x13a   : > { %v506_v5 = vsub.f32 %v989_v25, %v1021_v4  ;;  %v507_v6 = vsub.f32 %v991_v26, %v1021_v4 }
 0x13c   : > { %v514_v7 = vmul.f32 %v506_v5, %v506_v5  ;;  %v515_v8 = vmul.f32 %v507_v6, %v507_v6 }
 0x13e   : > { %v523_v9 = vadd.f32 %v515_v8, %v514_v7 }
 0x13f   : > { %v489_v10 = vpop.xlane.xlu0 %488 }
 0x140   : > { %v1028_v11 = vmul.f32 %v1008_v53, %v489_v10  ;;  %524 = vadd.xlane.f32.xlu2 %v523_v9 }
 0x142   : > { %v508_v12 = vsub.f32 %v995_v33, %v1028_v11  ;;  %v509_v14 = vsub.f32 %v997_v35, %v1028_v11 }
 0x144   : > { %v516_v15 = vmul.f32 %v508_v12, %v508_v12  ;;  %v517_v17 = vmul.f32 %v509_v14, %v509_v14 }
 0x146   : > { %v526_v18 = vadd.f32 %v517_v17, %v516_v15 }
 0x147   : > { %v492_v19 = vpop.xlane.xlu1 %491 }
 0x148   : > { %v1035_v20 = vmul.f32 %v1008_v53, %v492_v19  ;;  %527 = vadd.xlane.f32.xlu2 %v526_v18  ;;  %v475_v18 = vld [vmem:[%s1117_s3 + $0x10] sm:$0xff] }
 0x14a   : > { %v510_v21 = vsub.f32 %v1001_v44, %v1035_v20  ;;  %v511_v22 = vsub.f32 %v1003_v45, %v1035_v20 }
 0x14c   : > { %v518_v23 = vmul.f32 %v510_v21, %v510_v21  ;;  %v519_v24 = vmul.f32 %v511_v22, %v511_v22 }
 0x14e   : > { %v529_v27 = vadd.f32 %v519_v24, %v518_v23 }
 0x150   : > { %530 = vadd.xlane.f32.xlu2 %v529_v27 }
 0x1ab   : > { %v522_v36 = vpop.xlane.xlu2 %521 }
 0x1ac   : > { %v532_v37 = vmul.f32 %v522_v36, %v1008_v53 }
 0x1ae   : > { %v536_v38 = vadd.f32 1e-05, %v532_v37  ;;  %v480_v37 = vld [vmem:[%s1118_s4 + $0x18] sm:$0xff] }
 0x1b0   : > { %833 = vrsqrt.f32 %v536_v38  ;;  %vm546_vm3 = vweird.f32 %v536_v38 }
 0x1b3   : > { %v525_v39 = vpop.xlane.xlu2 %524 }
 0x1b4   : > { %v533_v40 = vmul.f32 %v525_v39, %v1008_v53 }
 0x1b6   : > { %v834_v41 = vpop.eup %833  ;;  %v537_v42 = vadd.f32 1e-05, %v533_v40  ;;  %v478_v40 = vld [vmem:[%s1118_s4 + $0x8] sm:$0xff] }
 0x1b7   : > { %v541_v43 = vmul.f32 %v834_v41, %v536_v38  ;;  %vm547_vm2 = vweird.f32 %v834_v41 }
 0x1b8   : > { %835 = vrsqrt.f32 %v537_v42  ;;  %vm548_vm4 = vmor %vm546_vm3, %vm547_vm2  ;;  %vm556_vm6 = vweird.f32 %v537_v42 }
 0x1b9   : > { %v542_v46 = vmul.f32 %v834_v41, %v541_v43  ;;  %v683_v43 = vpop.f32.mrf.mxu1 }
 0x1bb   : > { %v543_v47 = vmul.f32 0.5, %v542_v46  ;;  %v528_v48 = vpop.xlane.xlu2 %527  ;;  %v702_v46 = vpop.f32.mrf.mxu3 }
 0x1bc   : > { %v534_v49 = vmul.f32 %v528_v48, %v1008_v53 }
 0x1bd   : > { %v544_v50 = vsub.f32 1.5, %v543_v47 }
 0x1be   : > { %v836_v51 = vpop.eup %835  ;;  %v538_v52 = vadd.f32 1e-05, %v534_v49 }
 0x1bf   : > { %v551_v54 = vmul.f32 %v836_v51, %v537_v42  ;;  %v545_v57 = vmul.f32 %v834_v41, %v544_v50  ;;  %vm557_vm5 = vweird.f32 %v836_v51 }
 0x1c0   : > { %837 = vrsqrt.f32 %v538_v52  ;;  %vm558_vm7 = vmor %vm556_vm6, %vm557_vm5  ;;  %vm566_vm9 = vweird.f32 %v538_v52 }
 0x1c1   : > { %v552_v58 = vmul.f32 %v836_v51, %v551_v54  ;;  %v549_v59 = vsel %vm548_vm4, %v834_v41, %v545_v57 }
 0x1c2   : > { %v580_v60 = vmul.f32 %v549_v59, %v473_v56 }
 0x1c3   : > { %v553_v61 = vmul.f32 0.5, %v552_v58  ;;  %v531_v62 = vpop.xlane.xlu2 %530 }
 0x1c4   : > { %v535_v0 = vmul.f32 %v531_v62, %v1008_v53  ;;  %594 = vperm.xlu2 %830, %v580_v60   ;;  %v584_v1 = vmul.f32 %v580_v60, %v1014_v55  ;;  %v474_v53 = vld [vmem:[%s1117_s3 + $0x8] sm:$0xff] }
 0x1c5   : > { %v554_v2 = vsub.f32 1.5, %v553_v61 }
 0x1c6   : > { %v838_v3 = vpop.eup %837  ;;  %v539_v5 = vadd.f32 1e-05, %v535_v0  ;;  %v588_v6 = vsub.f32 %v477_v63, %v584_v1 }
 0x1c7   : > { %v561_v7 = vmul.f32 %v838_v3, %v538_v52  ;;  %v555_v8 = vmul.f32 %v836_v51, %v554_v2  ;;  %vm567_vm8 = vweird.f32 %v838_v3 }
 0x1c8   : > { %839 = vrsqrt.f32 %v539_v5  ;;  %622 = vperm.xlu0 %828, %v588_v6   ;;  %vm568_vm10 = vmor %vm566_vm9, %vm567_vm8  ;;  %vm576_vm12 = vweird.f32 %v539_v5 }
 0x1c9   : > { %v562_v9 = vmul.f32 %v838_v3, %v561_v7  ;;  %v559_v12 = vsel %vm558_vm7, %v836_v51, %v555_v8 }
 0x1ca   : > { %v581_v15 = vmul.f32 %v559_v12, %v474_v53 }
 0x1cb   : > { %v563_v10 = vmul.f32 0.5, %v562_v9 }
 0x1cc   : > { %v585_v39 = vmul.f32 %v581_v15, %v1021_v4 }
 0x1cd   : > { %v564_v14 = vsub.f32 1.5, %v563_v10 }
 0x1ce   : > { %v840_v55 = vpop.eup %839  ;;  %v589_v41 = vsub.f32 %v478_v40, %v585_v39 }
 0x1cf   : > { %v571_v17 = vmul.f32 %v840_v55, %v539_v5  ;;  %v565_v19 = vmul.f32 %v838_v3, %v564_v14  ;;  %vm577_vm11 = vweird.f32 %v840_v55 }
 0x1d0   : > { %599 = vperm.xlu0 %828, %v581_v15   ;;  %vm578_vm13 = vmor %vm576_vm12, %vm577_vm11 }
 0x1d1   : > { %v572_v21 = vmul.f32 %v840_v55, %v571_v17  ;;  %v569_v22 = vsel %vm568_vm10, %v838_v3, %v565_v19 }
 0x1d2   : > { %v582_v23 = vmul.f32 %v569_v22, %v475_v18 }
 0x1d3   : > { %v573_v24 = vmul.f32 0.5, %v572_v21 }
 0x1d4   : > { %604 = vperm.xlu1 %829, %v582_v23   ;;  %v586_v28 = vmul.f32 %v582_v23, %v1028_v11 }
 0x1d5   : > { %v574_v27 = vsub.f32 1.5, %v573_v24 }
 0x1d6   : > { %v590_v34 = vsub.f32 %v479_v29, %v586_v28 }
 0x1d7   : > { %v575_v31 = vmul.f32 %v840_v55, %v574_v27 }
 0x1d9   : > { %v579_v32 = vsel %vm578_vm13, %v840_v55, %v575_v31 }
 0x1da   : > { %v583_v36 = vmul.f32 %v579_v32, %v476_v30 }
 0x1dc   : > { %632 = vperm.xlu1 %829, %v590_v34   ;;  %609 = vperm.xlu2 %830, %v583_v36   ;;  %v587_v11 = vmul.f32 %v583_v36, %v1035_v20 }
 0x1de   : > { %v591_v38 = vsub.f32 %v480_v37, %v587_v11 }
 0x1e0   : > { %637 = vperm.xlu0 %828, %v591_v38  }
 0x1e4   : > { %627 = vperm.xlu2 %830, %v589_v41  }
 0x21e   : > { %v595_v42 = vpop.permute.xlu2 %594 }
 0x21f   : > { %v612_v47 = vmul.f32 %v595_v42, %v983_v13  ;;  %v613_v48 = vmul.f32 %v595_v42, %v985_v16  ;;  %v685_v13 = vpop.f32.mrf.mxu1  ;;  %v704_v16 = vpop.f32.mrf.mxu3 }
 0x227   : > { %v688_v5 = vpop.f32.mrf.mxu1  ;;  %v707_v6 = vpop.f32.mrf.mxu3 }
 0x22f   : > { %v690_v21 = vpop.f32.mrf.mxu1  ;;  %v709_v22 = vpop.f32.mrf.mxu3 }
 0x236   : > { %v610_v49 = vpop.permute.xlu2 %609 }
 0x237   : > { %v618_v10 = vmul.f32 %v610_v49, %v1001_v44  ;;  %v619_v53 = vmul.f32 %v610_v49, %v1003_v45 }
 0x23a   : > { %v623_v50 = vpop.permute.xlu0 %622 }
 0x23b   : > { %v640_v20 = vadd.f32 %v623_v50, %v612_v47  ;;  %v641_v51 = vadd.f32 %v623_v50, %v613_v48 }
 0x23d   : > { %v648_v4 = vmax.f32 %v640_v20, 0.0  ;;  %v649_v52 = vmax.f32 %v641_v51, 0.0 }
 0x23e   : > { %v628_v60 = vpop.permute.xlu2 %627 }
 0x23f   : > { %v712_v54 = vadd.f32 %v683_v43, %v648_v4  ;;  %v713_v56 = vadd.f32 %v702_v46, %v649_v52 }
 0x241   : > { %720 = vst [vmem:[%s1095_s20] sm:$0xff] %v712_v54 }
 0x242   : > { %721 = vst [vmem:[%s1095_s20 + $0x8] sm:$0xff] %v713_v56  ;;  %v600_v57 = vpop.permute.xlu0 %599 }
 0x243   : > { %v614_v58 = vmul.f32 %v600_v57, %v989_v25  ;;  %v615_v59 = vmul.f32 %v600_v57, %v991_v26 }
 0x245   : > { %v642_v61 = vadd.f32 %v628_v60, %v614_v58  ;;  %v643_v62 = vadd.f32 %v628_v60, %v615_v59 }
 0x246   : > { %v605_v63 = vpop.permute.xlu1 %604 }
 0x247   : > { %v650_v0 = vmax.f32 %v642_v61, 0.0  ;;  %v651_v1 = vmax.f32 %v643_v62, 0.0  ;;  %v616_v7 = vmul.f32 %v605_v63, %v995_v33  ;;  %v617_v8 = vmul.f32 %v605_v63, %v997_v35 }
 0x249   : > { %v714_v2 = vadd.f32 %v685_v13, %v650_v0  ;;  %v715_v3 = vadd.f32 %v704_v16, %v651_v1 }
 0x24b   : > { %722 = vst [vmem:[%s1095_s20 + $0x10] sm:$0xff] %v714_v2 }
 0x24c   : > { %723 = vst [vmem:[%s1095_s20 + $0x18] sm:$0xff] %v715_v3 }
 0x24e   : > { %v633_v25 = vpop.permute.xlu1 %632 }
 0x24f   : > { %v644_v9 = vadd.f32 %v633_v25, %v616_v7  ;;  %v645_v26 = vadd.f32 %v633_v25, %v617_v8 }
 0x251   : > { %v652_v12 = vmax.f32 %v644_v9, 0.0  ;;  %v653_v14 = vmax.f32 %v645_v26, 0.0 }
 0x252   : > { %v638_v55 = vpop.permute.xlu0 %637 }
 0x253   : > { %v716_v15 = vadd.f32 %v688_v5, %v652_v12  ;;  %v717_v17 = vadd.f32 %v707_v6, %v653_v14  ;;  %v646_v18 = vadd.f32 %v638_v55, %v618_v10  ;;  %v647_v19 = vadd.f32 %v638_v55, %v619_v53 }
 0x255   : > { %724 = vst [vmem:[%s1095_s20 + $0x20] sm:$0xff] %v716_v15  ;;  %v654_v33 = vmax.f32 %v646_v18, 0.0  ;;  %v655_v35 = vmax.f32 %v647_v19, 0.0 }
 0x256   : > { %725 = vst [vmem:[%s1095_s20 + $0x28] sm:$0xff] %v717_v17 }
 0x257   : > { %v718_v23 = vadd.f32 %v690_v21, %v654_v33  ;;  %v719_v24 = vadd.f32 %v709_v22, %v655_v35 }
 0x259   : > { %726 = vst [vmem:[%s1095_s20 + $0x30] sm:$0xff] %v718_v23 }
 0x25a   : > { %727 = vst [vmem:[%s1095_s20 + $0x38] sm:$0xff] %v719_v24 }
 0x25b PF: > { %s17_s24 = sadd.s32 1, %s847_s24  }
 0x25c   : > { %p14_p4 = scmp.ge.s32.totalorder %s17_s24, 8  }
 0x25e   :  { %16 = sbr.rel (!%p14_p4) target bundleno = 1 (0x1), region = 81 }

// kernel: _lambda_.10
= control target key start
LH: loop header
LB: loop body
LE: loop exit
PB: predicated region body
PF: predicated region fallthrough
CT: control target
= control target key end

     0   :  { %s1104_s24 = smov 0   ;;  %s1467_s0 = inlined_call_operand.vmem [shape: f32[6,288,64], index: 0, kind: input, shape index: {}]   ;;  %s1468_s1 = inlined_call_operand.vmem [shape: f32[64,288], index: 1, kind: input, shape index: {}]   ;;  %s1469_s2 = inlined_call_operand.vmem [shape: f32[64,1], index: 2, kind: input, shape index: {}]   ;;  %s1470_s3 = inlined_call_operand.vmem [shape: f32[64,1], index: 3, kind: input, shape index: {}]   ;;  %s1471_s4 = inlined_call_operand.vmem [shape: f32[64,1], index: 4, kind: input, shape index: {}]   ;;  %s1472_s5 = inlined_call_operand.vmem [shape: f32[6,32,64], index: 5, kind: input, shape index: {}]   ;;  %s1473_s6 = inlined_call_operand.vmem [shape: f32[64,32], index: 6, kind: input, shape index: {}]   ;;  %s1474_s7 = inlined_call_operand.vmem [shape: f32[6,64,64], index: 7, kind: output, shape index: {}]  }
   0x1 LB: > { %s1000_s25 = sadd.s32 4294967295, %s1060_s24   ;;  %p1004_p0 = scmp.ge.s32.totalorder %s1060_s24, 1  ;;  %s1060_s24 = sphi %s1104_s24, %s17_s24  }
   0x2   : > { %p247_p1 = scmp.lt.s32.totalorder %s1060_s24, 7 }
   0x4   : > { %p248_p2 = pnand %p1004_p0, %p247_p1 }
   0x5   : > { %p284_p3 = scmp.lt.s32.totalorder (!%p248_p2), %s1000_s25, 5 }
   0x6   : > { %251 = sbr.rel (%p248_p2) target bundleno = 627 (0x273), region = 48 }
   0xb   : > { %s1476_s25 = smov (!%p284_p3, %s1000_s25), 5  ;;  %v1062_v15 = vmov 0   ;;  %v356_v23 = vld [vmem:[%s1468_s1 + $0x10] sm:$0xff]  ;;  %v359_v28 = vld [vmem:[%s1468_s1 + $0x28] sm:$0xff]  ;;  %vm438_vm0 = vcmask 261120   ;;  %v390_v38 = vld [vmem:[%s1469_s2] sm:$0xff] }
   0xc   : > { %s1022_s26 = smul.u32 288, %s1476_s25  ;;  %1033 = vset.pattern.permute.xlu0 %v1062_v15  ;;  %1034 = vset.pattern.permute.xlu1 %v1062_v15  ;;  %v380_v32 = vpack.c.bf16 %v359_v28, %v356_v23  ;;  %v392_v46 = vld [vmem:[%s1469_s2 + $0x10] sm:$0xff]  ;;  %v391_v52 = vld [vmem:[%s1469_s2 + $0x8] sm:$0xff]  ;;  %v362_v57 = vld [vmem:[%s1468_s1 + $0x40] sm:$0xff]  ;;  %vm554_vm1 = vcmask 523264   ;;  %s1021_s18 = sshll.u32 %s1476_s25, 6 }
   0xd   : > { %1035 = vset.pattern.permute.xlu2 %v1062_v15  ;;  %400 = vperm.xlu0 %1033, %v390_v38   ;;  %v365_v58 = vld [vmem:[%s1468_s1 + $0x58] sm:$0xff]  ;;  %v354_v63 = vld [vmem:[%s1468_s1] sm:$0xff]  ;;  %v364_v15 = vld [vmem:[%s1468_s1 + $0x50] sm:$0xff]  ;;  %s1439_s21 = scalar_lea.vmem %s1474_s7, %s1021_s18 }
   0xe   : > { %s1118_s29 = scalar_lea.vmem %s1467_s0, %s1022_s26  ;;  %410 = vperm.xlu1 %1034, %v392_v46   ;;  %v393_v61 = vld [vmem:[%s1469_s2 + $0x18] sm:$0xff] }
   0xf   : > { %v314_v0 = vld [vmem:[%s1118_s29 + $0x70] sm:$0xff]  ;;  %v315_v1 = vld [vmem:[%s1118_s29 + $0x78] sm:$0xff]  ;;  %v312_v5 = vld [vmem:[%s1118_s29 + $0x60] sm:$0xff] }
  0x10   : > { %v330_v2 = vld [vmem:[%s1118_s29 + $0xf0] sm:$0xff]  ;;  %v343_v3 = vpack.c.bf16 %v315_v1, %v314_v0  ;;  %v331_v4 = vld [vmem:[%s1118_s29 + $0xf8] sm:$0xff]  ;;  %v313_v6 = vld [vmem:[%s1118_s29 + $0x68] sm:$0xff]  ;;  %v383_v1 = vpack.c.bf16 %v365_v58, %v362_v57 }
  0x11   : > { %v351_v7 = vpack.c.bf16 %v331_v4, %v330_v2  ;;  %v328_v8 = vld [vmem:[%s1118_s29 + $0xe0] sm:$0xff]  ;;  %v329_v9 = vld [vmem:[%s1118_s29 + $0xe8] sm:$0xff]  ;;  %v342_v10 = vpack.c.bf16 %v313_v6, %v312_v5  ;;  %v310_v12 = vld [vmem:[%s1118_s29 + $0x50] sm:$0xff] }
  0x12   : > { %451 = vmatpush.bf16.msra.mxu0 %v343_v3  ;;  %v350_v11 = vpack.c.bf16 %v329_v9, %v328_v8  ;;  %v311_v13 = vld [vmem:[%s1118_s29 + $0x58] sm:$0xff]  ;;  %v326_v14 = vld [vmem:[%s1118_s29 + $0xd0] sm:$0xff]  ;;  %v332_v21 = vld [vmem:[%s1118_s29 + $0x100] sm:$0xff] }
  0x13   : > { %480 = vmatpush.bf16.msra.mxu1 %v351_v7  ;;  %v327_v16 = vld [vmem:[%s1118_s29 + $0xd8] sm:$0xff]  ;;  %v334_v17 = vld [vmem:[%s1118_s29 + $0x110] sm:$0xff]  ;;  %v341_v20 = vpack.c.bf16 %v311_v13, %v310_v12  ;;  %v333_v22 = vld [vmem:[%s1118_s29 + $0x108] sm:$0xff] }
  0x14   : > { %v335_v18 = vld [vmem:[%s1118_s29 + $0x118] sm:$0xff]  ;;  %v349_v24 = vpack.c.bf16 %v327_v16, %v326_v14  ;;  %v308_v25 = vld [vmem:[%s1118_s29 + $0x40] sm:$0xff]  ;;  %v309_v26 = vld [vmem:[%s1118_s29 + $0x48] sm:$0xff]  ;;  %v352_v27 = vpack.c.bf16 %v333_v22, %v332_v21 }
  0x15   : > { %v353_v19 = vpack.c.bf16 %v335_v18, %v334_v17  ;;  %v324_v29 = vld [vmem:[%s1118_s29 + $0xc0] sm:$0xff]  ;;  %v325_v30 = vld [vmem:[%s1118_s29 + $0xc8] sm:$0xff]  ;;  %v340_v31 = vpack.c.bf16 %v309_v26, %v308_v25  ;;  %v306_v34 = vld [vmem:[%s1118_s29 + $0x30] sm:$0xff]  ;;  %405 = vperm.xlu0 %1033, %v391_v52  }
  0x16   : > { %452 = vmatpush.bf16.msra.mxu0 %v342_v10  ;;  %v348_v33 = vpack.c.bf16 %v325_v30, %v324_v29  ;;  %v307_v35 = vld [vmem:[%s1118_s29 + $0x38] sm:$0xff]  ;;  %v322_v36 = vld [vmem:[%s1118_s29 + $0xb0] sm:$0xff]  ;;  %v304_v41 = vld [vmem:[%s1118_s29 + $0x20] sm:$0xff]  ;;  %415 = vperm.xlu1 %1034, %v393_v61  }
  0x17   : > { %481 = vmatpush.bf16.msra.mxu1 %v350_v11  ;;  %515 = vmatpush.bf16.msra.mxu2 %v353_v19  ;;  %v323_v37 = vld [vmem:[%s1118_s29 + $0xb8] sm:$0xff]  ;;  %v339_v39 = vpack.c.bf16 %v307_v35, %v306_v34  ;;  %v305_v42 = vld [vmem:[%s1118_s29 + $0x28] sm:$0xff]  ;;  %v320_v43 = vld [vmem:[%s1118_s29 + $0xa0] sm:$0xff] }
  0x18   : > { %v347_v40 = vpack.c.bf16 %v323_v37, %v322_v36  ;;  %v321_v44 = vld [vmem:[%s1118_s29 + $0xa8] sm:$0xff]  ;;  %v338_v45 = vpack.c.bf16 %v305_v42, %v304_v41  ;;  %v302_v48 = vld [vmem:[%s1118_s29 + $0x10] sm:$0xff]  ;;  %v303_v49 = vld [vmem:[%s1118_s29 + $0x18] sm:$0xff] }
  0x19   : > { %v346_v47 = vpack.c.bf16 %v321_v44, %v320_v43  ;;  %v318_v50 = vld [vmem:[%s1118_s29 + $0x90] sm:$0xff]  ;;  %v319_v51 = vld [vmem:[%s1118_s29 + $0x98] sm:$0xff]  ;;  %v337_v53 = vpack.c.bf16 %v303_v49, %v302_v48  ;;  %v300_v54 = vld [vmem:[%s1118_s29] sm:$0xff] }
  0x1a   : > { %453 = vmatpush.bf16.msra.mxu0 %v341_v20  ;;  %v345_v55 = vpack.c.bf16 %v319_v51, %v318_v50  ;;  %v301_v56 = vld [vmem:[%s1118_s29 + $0x8] sm:$0xff]  ;;  %v316_v59 = vld [vmem:[%s1118_s29 + $0x80] sm:$0xff]  ;;  %v357_v0 = vld [vmem:[%s1468_s1 + $0x18] sm:$0xff] }
  0x1b   : > { %482 = vmatpush.bf16.msra.mxu1 %v349_v24  ;;  %516 = vmatpush.bf16.msra.mxu2 %v352_v27  ;;  %v317_v60 = vld [vmem:[%s1118_s29 + $0x88] sm:$0xff]  ;;  %v336_v62 = vpack.c.bf16 %v301_v56, %v300_v54  ;;  %v358_v4 = vld [vmem:[%s1468_s1 + $0x20] sm:$0xff]  ;;  %v396_v5 = vld [vmem:[%s1469_s2 + $0x30] sm:$0xff]  ;;  %v378_v6 = vpack.c.bf16 %v357_v0, %v354_v63  ;;  %s1020_s29 = sshll.u32 %s1476_s25, 5 }
  0x1c   : > { %v344_v2 = vpack.c.bf16 %v317_v60, %v316_v59  ;;  %v355_v3 = vld [vmem:[%s1468_s1 + $0x8] sm:$0xff]  ;;  %v397_v8 = vld [vmem:[%s1469_s2 + $0x38] sm:$0xff]  ;;  %v368_v9 = vld [vmem:[%s1468_s1 + $0x70] sm:$0xff]  ;;  %s293_s11 = scalar_lea.vmem %s1472_s5, %s1020_s29 }
  0x1d   : > { %v379_v7 = vpack.c.bf16 %v358_v4, %v355_v3  ;;  %430 = vperm.xlu0 %1033, %v396_v5   ;;  %v371_v10 = vld [vmem:[%s1468_s1 + $0x88] sm:$0xff]  ;;  %v360_v11 = vld [vmem:[%s1468_s1 + $0x30] sm:$0xff]  ;;  %v361_v14 = vld [vmem:[%s1468_s1 + $0x38] sm:$0xff] }
  0x1e   : > { %454 = vmatpush.bf16.msra.mxu0 %v340_v31  ;;  %1010 = vmatmul.msk.bf16.vlgmr.msra.gmra.mxu2 %vm438_vm0, %v380_v32  ;;  %v363_v12 = vld [vmem:[%s1468_s1 + $0x48] sm:$0xff]  ;;  %v386_v13 = vpack.c.bf16 %v371_v10, %v368_v9  ;;  %v382_v17 = vpack.c.bf16 %v364_v15, %v361_v14  ;;  %v394_v18 = vld [vmem:[%s1469_s2 + $0x20] sm:$0xff]  ;;  %v377_v20 = vld [vmem:[%s1468_s1 + $0xb8] sm:$0xff] }
  0x1f   : > { %483 = vmatpush.bf16.msra.mxu1 %v348_v33  ;;  %435 = vperm.xlu1 %1034, %v397_v8   ;;  %v381_v16 = vpack.c.bf16 %v363_v12, %v360_v11  ;;  %v374_v19 = vld [vmem:[%s1468_s1 + $0xa0] sm:$0xff]  ;;  %v395_v21 = vld [vmem:[%s1469_s2 + $0x28] sm:$0xff]  ;;  %v369_v23 = vld [vmem:[%s1468_s1 + $0x78] sm:$0xff] }
  0x20   : > { %420 = vperm.xlu2 %1035, %v394_v18   ;;  %v366_v22 = vld [vmem:[%s1468_s1 + $0x60] sm:$0xff]  ;;  %v389_v24 = vpack.c.bf16 %v377_v20, %v374_v19  ;;  %v367_v25 = vld [vmem:[%s1468_s1 + $0x68] sm:$0xff]  ;;  %v372_v29 = vld [vmem:[%s1468_s1 + $0x90] sm:$0xff] }
  0x21   : > { %v370_v26 = vld [vmem:[%s1468_s1 + $0x80] sm:$0xff]  ;;  %v384_v27 = vpack.c.bf16 %v369_v23, %v366_v22  ;;  %v375_v30 = vld [vmem:[%s1468_s1 + $0xa8] sm:$0xff]  ;;  %v373_v31 = vld [vmem:[%s1468_s1 + $0x98] sm:$0xff] }
  0x22   : > { %455 = vmatpush.bf16.msra.mxu0 %v339_v39  ;;  %v385_v28 = vpack.c.bf16 %v370_v26, %v367_v25  ;;  %v376_v32 = vld [vmem:[%s1468_s1 + $0xb0] sm:$0xff]  ;;  %v387_v33 = vpack.c.bf16 %v375_v30, %v372_v29 }
  0x23   : > { %484 = vmatpush.bf16.msra.mxu1 %v347_v40  ;;  %v388_v34 = vpack.c.bf16 %v376_v32, %v373_v31 }
  0x26   : > { %456 = vmatpush.bf16.msra.mxu0 %v338_v45 }
  0x27   : > { %485 = vmatpush.bf16.msra.mxu1 %v346_v47 }
  0x28   : > { %425 = vperm.xlu2 %1035, %v395_v21  }
  0x2a   : > { %457 = vmatpush.bf16.msra.mxu0 %v337_v53 }
  0x2b   : > { %486 = vmatpush.bf16.msra.mxu1 %v345_v55 }
  0x2e   : > { %458 = vmatpush.bf16.msra.mxu0 %v336_v62  ;;  %1011 = vmatmul.msk.bf16.gmra.mxu2 %vm438_vm0, %v383_v1 }
  0x2f   : > { %487 = vmatpush.bf16.msra.mxu1 %v344_v2 }
  0x31   : > { %459 = vmatmul.bf16.vlgmr.msra.gmra.mxu0 %v378_v6 }
  0x32   : > { %488 = vmatmul.bf16.vlgmr.msra.gmra.mxu1 %v379_v7 }
  0x3e   : > { %1012 = vmatmul.msk.bf16.gmra.mxu2 %vm438_vm0, %v386_v13 }
  0x41   : > { %464 = vmatmul.bf16.gmra.mxu0 %v381_v16 }
  0x42   : > { %493 = vmatmul.bf16.gmra.mxu1 %v382_v17 }
  0x4e   : > { %1013 = vmatmul.msk.bf16.gmra.mxu2 %vm438_vm0, %v389_v24 }
  0x51   : > { %469 = vmatmul.bf16.gmra.mxu0 %v384_v27 }
  0x52   : > { %498 = vmatmul.bf16.gmra.mxu1 %v385_v28 }
  0x61   : > { %474 = vmatmul.bf16.gmra.mxu0 %v387_v33 }
  0x62   : > { %503 = vmatmul.bf16.gmra.mxu1 %v388_v34 }
  0x7a   : > { %v421_v1 = vpop.permute.xlu2 %420 }
  0x7f   : > { %v401_v36 = vpop.permute.xlu0 %400 }
  0x80   : > { %v411_v51 = vpop.permute.xlu1 %410 }
  0x82   : > { %v426_v10 = vpop.permute.xlu2 %425 }
  0x87   : > { %v406_v44 = vpop.permute.xlu0 %405 }
  0x88   : > { %v416_v60 = vpop.permute.xlu1 %415 }
  0x8f   : > { %v431_v19 = vpop.permute.xlu0 %430 }
  0x91   : > { %v436_v27 = vpop.permute.xlu1 %435 }
  0xa1   : > { %v518_v35 = vpop.f32.mrf.mxu2 }
  0xa9   : > { %v520_v38 = vpop.f32.mrf.mxu2 }
  0xae   : > { %v460_v37 = vpop.f32.mrf.mxu0 }
  0xaf   : > { %v461_v39 = vadd.f32 %v460_v37, %v401_v36  ;;  %v489_v40 = vpop.f32.mrf.mxu1 }
  0xb1   : > { %v490_v41 = vadd.f32 %v489_v40, %v461_v39  ;;  %v523_v48 = vpop.f32.mrf.mxu2 }
  0xb3   : > { %v1256_v42 = vadd.f32 %v518_v35, %v490_v41  ;;  %v1063_v35 = vmov 64.0  }
  0xb4   : > { %1036 = vrcp.f32 %v1063_v35  ;;  %v860_v35 = vld [vmem:[%s1473_s6 + $0x10] sm:$0xff] }
  0xb5   : > { %v555_v43 = vsel %vm554_vm1, %v1256_v42, 0.0 }
  0xb6   : > { %v462_v45 = vpop.f32.mrf.mxu0  ;;  %556 = vadd.xlane.f32.xlu2 %v555_v43 }
  0xb7   : > { %v463_v46 = vadd.f32 %v462_v45, %v406_v44  ;;  %v491_v47 = vpop.f32.mrf.mxu1 }
  0xb9   : > { %v492_v49 = vadd.f32 %v491_v47, %v463_v46  ;;  %v525_v57 = vpop.f32.mrf.mxu2 }
  0xba   : > { %v1037_v36 = vpop.eup %1036 }
  0xbb   : > { %v1260_v50 = vadd.f32 %v520_v38, %v492_v49  ;;  %v580_v37 = vmul.f32 64.0, %v1037_v36  ;;  %vm584_vm2 = vweird.f32 %v1037_v36 }
  0xbd   : > { %v558_v52 = vsel %vm554_vm1, %v1260_v50, 0.0  ;;  %v581_v38 = vsub.f32 1.0, %v580_v37 }
  0xbe   : > { %v465_v53 = vpop.f32.mrf.mxu0  ;;  %559 = vadd.xlane.f32.xlu0 %v558_v52 }
  0xbf   : > { %v466_v54 = vadd.f32 %v465_v53, %v411_v51  ;;  %v494_v55 = vpop.f32.mrf.mxu1  ;;  %v582_v39 = vmul.f32 %v1037_v36, %v581_v38 }
  0xc1   : > { %v495_v56 = vadd.f32 %v494_v55, %v466_v54  ;;  %v528_v3 = vpop.f32.mrf.mxu2  ;;  %v583_v40 = vadd.f32 %v1037_v36, %v582_v39 }
  0xc3   : > { %v1264_v58 = vadd.f32 %v523_v48, %v495_v56  ;;  %v1288_v41 = vsel %vm584_vm2, %v1037_v36, %v583_v40  ;;  %v861_v36 = vld [vmem:[%s1473_s6 + $0x18] sm:$0xff] }
  0xc4   : > { %v867_v37 = vpack.c.bf16 %v861_v36, %v860_v35 }
  0xc5   : > { %v561_v59 = vsel %vm554_vm1, %v1264_v58, 0.0 }
  0xc6   : > { %v467_v61 = vpop.f32.mrf.mxu0  ;;  %562 = vadd.xlane.f32.xlu1 %v561_v59 }
  0xc7   : > { %v468_v62 = vadd.f32 %v467_v61, %v416_v60  ;;  %v496_v63 = vpop.f32.mrf.mxu1 }
  0xc9   : > { %v497_v0 = vadd.f32 %v496_v63, %v468_v62  ;;  %v530_v12 = vpop.f32.mrf.mxu2 }
  0xcb   : > { %v1268_v2 = vadd.f32 %v525_v57, %v497_v0 }
  0xcd   : > { %v564_v4 = vsel %vm554_vm1, %v1268_v2, 0.0 }
  0xce   : > { %v470_v5 = vpop.f32.mrf.mxu0  ;;  %565 = vadd.xlane.f32.xlu2 %v564_v4 }
  0xcf   : > { %v471_v6 = vadd.f32 %v470_v5, %v421_v1  ;;  %v499_v7 = vpop.f32.mrf.mxu1 }
  0xd1   : > { %v500_v8 = vadd.f32 %v499_v7, %v471_v6  ;;  %v533_v23 = vpop.f32.mrf.mxu2 }
  0xd3   : > { %v1272_v9 = vadd.f32 %v528_v3, %v500_v8 }
  0xd5   : > { %v567_v11 = vsel %vm554_vm1, %v1272_v9, 0.0 }
  0xd6   : > { %v472_v13 = vpop.f32.mrf.mxu0  ;;  %568 = vadd.xlane.f32.xlu2 %v567_v11 }
  0xd7   : > { %v473_v14 = vadd.f32 %v472_v13, %v426_v10  ;;  %v501_v15 = vpop.f32.mrf.mxu1 }
  0xd9   : > { %v502_v16 = vadd.f32 %v501_v15, %v473_v14  ;;  %v535_v32 = vpop.f32.mrf.mxu2 }
  0xdb   : > { %v1276_v17 = vadd.f32 %v530_v12, %v502_v16 }
  0xdd   : > { %v570_v18 = vsel %vm554_vm1, %v1276_v17, 0.0 }
  0xde   : > { %v475_v20 = vpop.f32.mrf.mxu0  ;;  %571 = vadd.xlane.f32.xlu0 %v570_v18 }
  0xdf   : > { %v476_v21 = vadd.f32 %v475_v20, %v431_v19  ;;  %v504_v22 = vpop.f32.mrf.mxu1 }
  0xe1   : > { %v505_v24 = vadd.f32 %v504_v22, %v476_v21 }
  0xe3   : > { %v1280_v25 = vadd.f32 %v533_v23, %v505_v24  ;;  %v872_v24 = vld [vmem:[%s293_s11 + $0x10] sm:$0xff] }
  0xe5   : > { %v573_v26 = vsel %vm554_vm1, %v1280_v25, 0.0 }
  0xe6   : > { %v477_v28 = vpop.f32.mrf.mxu0  ;;  %574 = vadd.xlane.f32.xlu1 %v573_v26  ;;  %v873_v26 = vld [vmem:[%s293_s11 + $0x18] sm:$0xff] }
  0xe7   : > { %v478_v29 = vadd.f32 %v477_v28, %v436_v27  ;;  %v506_v30 = vpop.f32.mrf.mxu1  ;;  %v875_v27 = vpack.c.bf16 %v873_v26, %v872_v24  ;;  %v870_v28 = vld [vmem:[%s293_s11] sm:$0xff] }
  0xe9   : > { %v507_v31 = vadd.f32 %v506_v30, %v478_v29  ;;  %894 = vmatpush.bf16.msra.mxu3 %v875_v27  ;;  %v871_v29 = vld [vmem:[%s293_s11 + $0x8] sm:$0xff] }
  0xea   : > { %v874_v30 = vpack.c.bf16 %v871_v29, %v870_v28  ;;  %v539_v27 = vld [vmem:[%s1470_s3 + $0x8] sm:$0xff] }
  0xeb   : > { %v1284_v33 = vadd.f32 %v535_v32, %v507_v31  ;;  %v858_v31 = vld [vmem:[%s1473_s6] sm:$0xff]  ;;  %v859_v32 = vld [vmem:[%s1473_s6 + $0x8] sm:$0xff] }
  0xed   : > { %v576_v34 = vsel %vm554_vm1, %v1284_v33, 0.0  ;;  %895 = vmatpush.bf16.msra.mxu3 %v874_v30 }
  0xee   : > { %577 = vadd.xlane.f32.xlu2 %v576_v34  ;;  %v866_v34 = vpack.c.bf16 %v859_v32, %v858_v31 }
  0xf0   : > { %1014 = vmatmul.msk.bf16.vlgmr.msra.gmra.mxu3 %vm438_vm0, %v866_v34 }
 0x100   : > { %1015 = vmatmul.msk.bf16.gmra.mxu3 %vm438_vm0, %v867_v37 }
 0x129   : > { %v557_v43 = vpop.xlane.xlu2 %556 }
 0x12a   : > { %v1291_v44 = vmul.f32 %v1288_v41, %v557_v43  ;;  %v862_v43 = vld [vmem:[%s1473_s6 + $0x20] sm:$0xff] }
 0x12c   : > { %v594_v45 = vsub.f32 %v1256_v42, %v1291_v44 }
 0x12e   : > { %v602_v46 = vmul.f32 %v594_v45, %v594_v45  ;;  %v863_v45 = vld [vmem:[%s1473_s6 + $0x28] sm:$0xff] }
 0x130   : > { %v610_v47 = vsel %vm554_vm1, %v602_v46, 0.0  ;;  %v868_v46 = vpack.c.bf16 %v863_v45, %v862_v43  ;;  %v540_v43 = vld [vmem:[%s1470_s3 + $0x10] sm:$0xff] }
 0x131   : > { %v560_v48 = vpop.xlane.xlu0 %559  ;;  %611 = vadd.xlane.f32.xlu0 %v610_v47 }
 0x132   : > { %v1297_v49 = vmul.f32 %v1288_v41, %v560_v48  ;;  %1016 = vmatmul.msk.bf16.gmra.mxu3 %vm438_vm0, %v868_v46 }
 0x134   : > { %v595_v51 = vsub.f32 %v1260_v50, %v1297_v49 }
 0x136   : > { %v603_v52 = vmul.f32 %v595_v51, %v595_v51 }
 0x138   : > { %v613_v53 = vsel %vm554_vm1, %v603_v52, 0.0 }
 0x139   : > { %v563_v54 = vpop.xlane.xlu1 %562  ;;  %614 = vadd.xlane.f32.xlu1 %v613_v53 }
 0x13a   : > { %v1303_v55 = vmul.f32 %v1288_v41, %v563_v54 }
 0x13c   : > { %v596_v56 = vsub.f32 %v1264_v58, %v1303_v55 }
 0x13e   : > { %v604_v57 = vmul.f32 %v596_v56, %v596_v56 }
 0x140   : > { %v616_v59 = vsel %vm554_vm1, %v604_v57, 0.0 }
 0x141   : > { %617 = vadd.xlane.f32.xlu2 %v616_v59  ;;  %v566_v60 = vpop.xlane.xlu2 %565 }
 0x142   : > { %v1309_v61 = vmul.f32 %v1288_v41, %v566_v60 }
 0x144   : > { %v597_v62 = vsub.f32 %v1268_v2, %v1309_v61 }
 0x146   : > { %v605_v63 = vmul.f32 %v597_v62, %v597_v62 }
 0x148   : > { %v619_v0 = vsel %vm554_vm1, %v605_v63, 0.0 }
 0x149   : > { %620 = vadd.xlane.f32.xlu0 %v619_v0  ;;  %v569_v1 = vpop.xlane.xlu2 %568 }
 0x14a   : > { %v1315_v3 = vmul.f32 %v1288_v41, %v569_v1  ;;  %v538_v1 = vld [vmem:[%s1470_s3] sm:$0xff] }
 0x14c   : > { %v598_v4 = vsub.f32 %v1272_v9, %v1315_v3 }
 0x14e   : > { %v606_v5 = vmul.f32 %v598_v4, %v598_v4 }
 0x150   : > { %v622_v6 = vsel %vm554_vm1, %v606_v5, 0.0 }
 0x151   : > { %v572_v7 = vpop.xlane.xlu0 %571  ;;  %623 = vadd.xlane.f32.xlu1 %v622_v6 }
 0x152   : > { %v1321_v8 = vmul.f32 %v1288_v41, %v572_v7  ;;  %v864_v7 = vld [vmem:[%s1473_s6 + $0x30] sm:$0xff] }
 0x154   : > { %v599_v10 = vsub.f32 %v1276_v17, %v1321_v8 }
 0x156   : > { %v607_v11 = vmul.f32 %v599_v10, %v599_v10  ;;  %v865_v10 = vld [vmem:[%s1473_s6 + $0x38] sm:$0xff] }
 0x158   : > { %v625_v12 = vsel %vm554_vm1, %v607_v11, 0.0 }
 0x159   : > { %v575_v13 = vpop.xlane.xlu1 %574  ;;  %626 = vadd.xlane.f32.xlu2 %v625_v12  ;;  %v869_v12 = vpack.c.bf16 %v865_v10, %v864_v7  ;;  %v549_v10 = vld [vmem:[%s1471_s4 + $0x18] sm:$0xff] }
 0x15a   : > { %v1327_v14 = vmul.f32 %v1288_v41, %v575_v13 }
 0x15b   : > { %1017 = vmatmul.msk.bf16.gmra.mxu3 %vm438_vm0, %v869_v12 }
 0x15c   : > { %v600_v15 = vsub.f32 %v1280_v25, %v1327_v14 }
 0x15e   : > { %v608_v16 = vmul.f32 %v600_v15, %v600_v15 }
 0x160   : > { %v628_v18 = vsel %vm554_vm1, %v608_v16, 0.0  ;;  %v546_v16 = vld [vmem:[%s1471_s4] sm:$0xff] }
 0x161   : > { %629 = vadd.xlane.f32.xlu0 %v628_v18  ;;  %v578_v19 = vpop.xlane.xlu2 %577 }
 0x162   : > { %v1333_v20 = vmul.f32 %v1288_v41, %v578_v19 }
 0x164   : > { %v601_v21 = vsub.f32 %v1284_v33, %v1333_v20 }
 0x166   : > { %v609_v22 = vmul.f32 %v601_v21, %v601_v21 }
 0x168   : > { %v631_v23 = vsel %vm554_vm1, %v609_v22, 0.0 }
 0x169   : > { %632 = vadd.xlane.f32.xlu1 %v631_v23 }
 0x1a4   : > { %v612_v38 = vpop.xlane.xlu0 %611 }
 0x1a5   : > { %v634_v39 = vmul.f32 %v612_v38, %v1288_v41 }
 0x1a7   : > { %v642_v40 = vadd.f32 1e-05, %v634_v39 }
 0x1a9   : > { %1038 = vrsqrt.f32 %v642_v40  ;;  %vm656_vm4 = vweird.f32 %v642_v40 }
 0x1ac   : > { %v615_v47 = vpop.xlane.xlu1 %614 }
 0x1ad   : > { %v635_v48 = vmul.f32 %v615_v47, %v1288_v41 }
 0x1af   : > { %v1039_v51 = vpop.eup %1038  ;;  %v643_v52 = vadd.f32 1e-05, %v635_v48 }
 0x1b0   : > { %v651_v53 = vmul.f32 %v1039_v51, %v642_v40  ;;  %vm657_vm3 = vweird.f32 %v1039_v51  ;;  %v547_v40 = vld [vmem:[%s1471_s4 + $0x8] sm:$0xff] }
 0x1b1   : > { %1040 = vrsqrt.f32 %v643_v52  ;;  %vm658_vm5 = vmor %vm656_vm4, %vm657_vm3  ;;  %vm666_vm7 = vweird.f32 %v643_v52 }
 0x1b2   : > { %v652_v54 = vmul.f32 %v1039_v51, %v651_v53 }
 0x1b4   : > { %v653_v56 = vmul.f32 0.5, %v652_v54  ;;  %v618_v57 = vpop.xlane.xlu2 %617 }
 0x1b5   : > { %v636_v59 = vmul.f32 %v618_v57, %v1288_v41 }
 0x1b6   : > { %v654_v60 = vsub.f32 1.5, %v653_v56 }
 0x1b7   : > { %v1041_v62 = vpop.eup %1040  ;;  %v644_v63 = vadd.f32 1e-05, %v636_v59 }
 0x1b8   : > { %v661_v0 = vmul.f32 %v1041_v62, %v643_v52  ;;  %v655_v4 = vmul.f32 %v1039_v51, %v654_v60  ;;  %vm667_vm6 = vweird.f32 %v1041_v62 }
 0x1b9   : > { %1042 = vrsqrt.f32 %v644_v63  ;;  %vm668_vm8 = vmor %vm666_vm7, %vm667_vm6  ;;  %vm676_vm10 = vweird.f32 %v644_v63 }
 0x1ba   : > { %v662_v5 = vmul.f32 %v1041_v62, %v661_v0  ;;  %v659_v6 = vsel %vm658_vm5, %v1039_v51, %v655_v4  ;;  %v541_v0 = vld [vmem:[%s1470_s3 + $0x18] sm:$0xff] }
 0x1bb   : > { %v730_v11 = vmul.f32 %v659_v6, %v538_v1 }
 0x1bc   : > { %v663_v13 = vmul.f32 0.5, %v662_v5  ;;  %v621_v15 = vpop.xlane.xlu0 %620 }
 0x1bd   : > { %v637_v18 = vmul.f32 %v621_v15, %v1288_v41  ;;  %756 = vperm.xlu2 %1035, %v730_v11   ;;  %v738_v19 = vmul.f32 %v730_v11, %v1291_v44 }
 0x1be   : > { %v664_v21 = vsub.f32 1.5, %v663_v13 }
 0x1bf   : > { %v1043_v22 = vpop.eup %1042  ;;  %v645_v23 = vadd.f32 1e-05, %v637_v18  ;;  %v746_v24 = vsub.f32 %v546_v16, %v738_v19 }
 0x1c0   : > { %v671_v26 = vmul.f32 %v1043_v22, %v644_v63  ;;  %v665_v28 = vmul.f32 %v1041_v62, %v664_v21  ;;  %vm677_vm9 = vweird.f32 %v1043_v22  ;;  %v542_v21 = vld [vmem:[%s1470_s3 + $0x20] sm:$0xff] }
 0x1c1   : > { %1044 = vrsqrt.f32 %v645_v23  ;;  %804 = vperm.xlu1 %1034, %v746_v24   ;;  %vm678_vm11 = vmor %vm676_vm10, %vm677_vm9  ;;  %vm686_vm13 = vweird.f32 %v645_v23 }
 0x1c2   : > { %v672_v29 = vmul.f32 %v1043_v22, %v671_v26  ;;  %v669_v30 = vsel %vm668_vm8, %v1041_v62, %v665_v28  ;;  %v550_v28 = vld [vmem:[%s1471_s4 + $0x20] sm:$0xff] }
 0x1c3   : > { %v731_v44 = vmul.f32 %v669_v30, %v539_v27 }
 0x1c4   : > { %v673_v31 = vmul.f32 0.5, %v672_v29  ;;  %v624_v32 = vpop.xlane.xlu1 %623 }
 0x1c5   : > { %v638_v34 = vmul.f32 %v624_v32, %v1288_v41  ;;  %761 = vperm.xlu0 %1033, %v731_v44   ;;  %v739_v38 = vmul.f32 %v731_v44, %v1297_v49  ;;  %v548_v49 = vld [vmem:[%s1471_s4 + $0x10] sm:$0xff] }
 0x1c6   : > { %v674_v35 = vsub.f32 1.5, %v673_v31 }
 0x1c7   : > { %v1045_v36 = vpop.eup %1044  ;;  %v646_v37 = vadd.f32 1e-05, %v638_v34  ;;  %v747_v48 = vsub.f32 %v547_v40, %v739_v38 }
 0x1c8   : > { %v681_v39 = vmul.f32 %v1045_v36, %v645_v23  ;;  %v675_v45 = vmul.f32 %v1043_v22, %v674_v35  ;;  %vm687_vm12 = vweird.f32 %v1045_v36 }
 0x1c9   : > { %1046 = vrsqrt.f32 %v646_v37  ;;  %vm688_vm14 = vmor %vm686_vm13, %vm687_vm12  ;;  %vm696_vm0 = vweird.f32 %v646_v37 }
 0x1ca   : > { %v682_v46 = vmul.f32 %v1045_v36, %v681_v39  ;;  %v679_v47 = vsel %vm678_vm11, %v1043_v22, %v675_v45 }
 0x1cb   : > { %v732_v51 = vmul.f32 %v679_v47, %v540_v43 }
 0x1cc   : > { %v683_v52 = vmul.f32 0.5, %v682_v46  ;;  %v627_v53 = vpop.xlane.xlu2 %626  ;;  %v544_v46 = vld [vmem:[%s1470_s3 + $0x30] sm:$0xff] }
 0x1cd   : > { %v639_v54 = vmul.f32 %v627_v53, %v1288_v41  ;;  %809 = vperm.xlu0 %1033, %v747_v48   ;;  %766 = vperm.xlu1 %1034, %v732_v51   ;;  %v740_v56 = vmul.f32 %v732_v51, %v1303_v55 }
 0x1ce   : > { %v684_v57 = vsub.f32 1.5, %v683_v52 }
 0x1cf   : > { %v1047_v59 = vpop.eup %1046  ;;  %v647_v60 = vadd.f32 1e-05, %v639_v54  ;;  %v748_v62 = vsub.f32 %v548_v49, %v740_v56  ;;  %v552_v49 = vld [vmem:[%s1471_s4 + $0x30] sm:$0xff] }
 0x1d0   : > { %v691_v63 = vmul.f32 %v1047_v59, %v646_v37  ;;  %v685_v1 = vmul.f32 %v1045_v36, %v684_v57  ;;  %vm697_vm15 = vweird.f32 %v1047_v59 }
 0x1d1   : > { %1048 = vrsqrt.f32 %v647_v60  ;;  %814 = vperm.xlu2 %1035, %v748_v62   ;;  %vm698_vm2 = vmor %vm696_vm0, %vm697_vm15  ;;  %vm706_vm4 = vweird.f32 %v647_v60 }
 0x1d2   : > { %v692_v4 = vmul.f32 %v1047_v59, %v691_v63  ;;  %v689_v5 = vsel %vm688_vm14, %v1045_v36, %v685_v1  ;;  %v543_v36 = vld [vmem:[%s1470_s3 + $0x28] sm:$0xff] }
 0x1d3   : > { %v733_v6 = vmul.f32 %v689_v5, %v541_v0  ;;  %v553_v0 = vld [vmem:[%s1471_s4 + $0x38] sm:$0xff]  ;;  %v551_v5 = vld [vmem:[%s1471_s4 + $0x28] sm:$0xff] }
 0x1d4   : > { %v693_v7 = vmul.f32 0.5, %v692_v4  ;;  %v630_v55 = vpop.xlane.xlu0 %629 }
 0x1d5   : > { %v640_v11 = vmul.f32 %v630_v55, %v1288_v41  ;;  %771 = vperm.xlu0 %1033, %v733_v6   ;;  %v741_v12 = vmul.f32 %v733_v6, %v1309_v61 }
 0x1d6   : > { %v694_v13 = vsub.f32 1.5, %v693_v7  ;;  %v897_v7 = vpop.f32.mrf.mxu3 }
 0x1d7   : > { %v1049_v15 = vpop.eup %1048  ;;  %v648_v16 = vadd.f32 1e-05, %v640_v11  ;;  %v749_v18 = vsub.f32 %v549_v10, %v741_v12 }
 0x1d8   : > { %v701_v19 = vmul.f32 %v1049_v15, %v647_v60  ;;  %v695_v22 = vmul.f32 %v1047_v59, %v694_v13  ;;  %vm707_vm3 = vweird.f32 %v1049_v15 }
 0x1d9   : > { %1050 = vrsqrt.f32 %v648_v16  ;;  %819 = vperm.xlu1 %1034, %v749_v18   ;;  %vm708_vm5 = vmor %vm706_vm4, %vm707_vm3  ;;  %vm716_vm7 = vweird.f32 %v648_v16 }
 0x1da   : > { %v702_v23 = vmul.f32 %v1049_v15, %v701_v19  ;;  %v699_v24 = vsel %vm698_vm2, %v1047_v59, %v695_v22  ;;  %v545_v59 = vld [vmem:[%s1470_s3 + $0x38] sm:$0xff] }
 0x1db   : > { %v734_v26 = vmul.f32 %v699_v24, %v542_v21 }
 0x1dc   : > { %v703_v27 = vmul.f32 0.5, %v702_v23  ;;  %v633_v61 = vpop.xlane.xlu1 %632 }
 0x1dd   : > { %v641_v29 = vmul.f32 %v633_v61, %v1288_v41  ;;  %776 = vperm.xlu2 %1035, %v734_v26   ;;  %v742_v30 = vmul.f32 %v734_v26, %v1315_v3 }
 0x1de   : > { %v704_v44 = vsub.f32 1.5, %v703_v27  ;;  %v899_v11 = vpop.f32.mrf.mxu3 }
 0x1df   : > { %v1051_v31 = vpop.eup %1050  ;;  %v649_v32 = vadd.f32 1e-05, %v641_v29  ;;  %v750_v34 = vsub.f32 %v550_v28, %v742_v30 }
 0x1e0   : > { %v711_v35 = vmul.f32 %v1051_v31, %v648_v16  ;;  %v705_v37 = vmul.f32 %v1049_v15, %v704_v44  ;;  %vm717_vm6 = vweird.f32 %v1051_v31 }
 0x1e1   : > { %1052 = vrsqrt.f32 %v649_v32  ;;  %824 = vperm.xlu0 %1033, %v750_v34   ;;  %vm718_vm8 = vmor %vm716_vm7, %vm717_vm6  ;;  %vm726_vm10 = vweird.f32 %v649_v32 }
 0x1e2   : > { %v712_v38 = vmul.f32 %v1051_v31, %v711_v35  ;;  %v709_v41 = vsel %vm708_vm5, %v1049_v15, %v705_v37 }
 0x1e3   : > { %v735_v39 = vmul.f32 %v709_v41, %v543_v36 }
 0x1e4   : > { %v713_v40 = vmul.f32 0.5, %v712_v38 }
 0x1e5   : > { %781 = vperm.xlu1 %1034, %v735_v39   ;;  %v743_v4 = vmul.f32 %v735_v39, %v1321_v8 }
 0x1e6   : > { %v714_v3 = vsub.f32 1.5, %v713_v40  ;;  %v902_v16 = vpop.f32.mrf.mxu3 }
 0x1e7   : > { %v1053_v43 = vpop.eup %1052  ;;  %v751_v6 = vsub.f32 %v551_v5, %v743_v4 }
 0x1e8   : > { %v721_v45 = vmul.f32 %v1053_v43, %v649_v32  ;;  %v715_v47 = vmul.f32 %v1051_v31, %v714_v3  ;;  %vm727_vm9 = vweird.f32 %v1053_v43 }
 0x1e9   : > { %vm728_vm11 = vmor %vm726_vm10, %vm727_vm9 }
 0x1ea   : > { %v722_v48 = vmul.f32 %v1053_v43, %v721_v45  ;;  %v719_v51 = vsel %vm718_vm8, %v1051_v31, %v715_v47 }
 0x1eb   : > { %v736_v52 = vmul.f32 %v719_v51, %v544_v46 }
 0x1ec   : > { %v723_v53 = vmul.f32 0.5, %v722_v48 }
 0x1ed   : > { %786 = vperm.xlu0 %1033, %v736_v52   ;;  %v744_v54 = vmul.f32 %v736_v52, %v1327_v14 }
 0x1ee   : > { %v724_v56 = vsub.f32 1.5, %v723_v53  ;;  %v904_v29 = vpop.f32.mrf.mxu3 }
 0x1ef   : > { %v752_v57 = vsub.f32 %v552_v49, %v744_v54 }
 0x1f0   : > { %v725_v60 = vmul.f32 %v1053_v43, %v724_v56 }
 0x1f1   : > { %834 = vperm.xlu1 %1034, %v752_v57  }
 0x1f2   : > { %v729_v62 = vsel %vm728_vm11, %v1053_v43, %v725_v60 }
 0x1f3   : > { %v737_v63 = vmul.f32 %v729_v62, %v545_v59 }
 0x1f5   : > { %791 = vperm.xlu2 %1035, %v737_v63   ;;  %v745_v14 = vmul.f32 %v737_v63, %v1333_v20 }
 0x1f6   : > { %v907_v36 = vpop.f32.mrf.mxu3 }
 0x1f7   : > { %v753_v1 = vsub.f32 %v553_v0, %v745_v14 }
 0x1f9   : > { %839 = vperm.xlu0 %1033, %v753_v1  }
 0x1fd   : > { %829 = vperm.xlu2 %1035, %v751_v6  }
 0x1fe   : > { %v909_v46 = vpop.f32.mrf.mxu3 }
 0x206   : > { %v912_v49 = vpop.f32.mrf.mxu3 }
 0x20e   : > { %v914_v62 = vpop.f32.mrf.mxu3 }
 0x217   : > { %v757_v55 = vpop.permute.xlu2 %756 }
 0x218   : > { %v794_v10 = vmul.f32 %v757_v55, %v1256_v42 }
 0x22b   : > { %v815_v18 = vpop.permute.xlu2 %814 }
 0x233   : > { %v805_v12 = vpop.permute.xlu1 %804 }
 0x234   : > { %v842_v13 = vadd.f32 %v805_v12, %v794_v10 }
 0x236   : > { %v850_v15 = vmax.f32 %v842_v13, 0.0 }
 0x237   : > { %v762_v8 = vpop.permute.xlu0 %761  ;;  %v777_v30 = vpop.permute.xlu2 %776 }
 0x238   : > { %v917_v20 = vadd.f32 %v897_v7, %v850_v15  ;;  %v795_v42 = vmul.f32 %v762_v8, %v1260_v50  ;;  %v798_v37 = vmul.f32 %v777_v30, %v1272_v9 }
 0x23a   : > { %925 = vst.msk [vmem:[%s1439_s21] sm:$0xff] %vm554_vm1, %v917_v20 }
 0x23f   : > { %v810_v19 = vpop.permute.xlu0 %809  ;;  %v767_v21 = vpop.permute.xlu1 %766 }
 0x240   : > { %v843_v22 = vadd.f32 %v810_v19, %v795_v42  ;;  %v796_v23 = vmul.f32 %v767_v21, %v1264_v58 }
 0x242   : > { %v851_v24 = vmax.f32 %v843_v22, 0.0  ;;  %v844_v26 = vadd.f32 %v815_v18, %v796_v23 }
 0x244   : > { %v918_v27 = vadd.f32 %v899_v11, %v851_v24  ;;  %v852_v61 = vmax.f32 %v844_v26, 0.0 }
 0x246   : > { %926 = vst.msk [vmem:[%s1439_s21 + $0x8] sm:$0xff] %vm554_vm1, %v918_v27  ;;  %v919_v28 = vadd.f32 %v902_v16, %v852_v61 }
 0x247   : > { %v772_v44 = vpop.permute.xlu0 %771 }
 0x248   : > { %927 = vst.msk [vmem:[%s1439_s21 + $0x10] sm:$0xff] %vm554_vm1, %v919_v28  ;;  %v797_v50 = vmul.f32 %v772_v44, %v1268_v2 }
 0x24b   : > { %v820_v31 = vpop.permute.xlu1 %819 }
 0x24c   : > { %v845_v32 = vadd.f32 %v820_v31, %v797_v50 }
 0x24e   : > { %v853_v34 = vmax.f32 %v845_v32, 0.0 }
 0x24f   : > { %v792_v58 = vpop.permute.xlu2 %791 }
 0x250   : > { %v920_v35 = vadd.f32 %v904_v29, %v853_v34 }
 0x252   : > { %928 = vst.msk [vmem:[%s1439_s21 + $0x18] sm:$0xff] %vm554_vm1, %v920_v35 }
 0x253   : > { %v825_v38 = vpop.permute.xlu0 %824 }
 0x254   : > { %v846_v41 = vadd.f32 %v825_v38, %v798_v37 }
 0x256   : > { %v854_v39 = vmax.f32 %v846_v41, 0.0 }
 0x257   : > { %v782_v40 = vpop.permute.xlu1 %781  ;;  %v830_v2 = vpop.permute.xlu2 %829 }
 0x258   : > { %v921_v3 = vadd.f32 %v907_v36, %v854_v39  ;;  %v799_v43 = vmul.f32 %v782_v40, %v1276_v17  ;;  %v801_v17 = vmul.f32 %v792_v58, %v1284_v33 }
 0x25a   : > { %929 = vst.msk [vmem:[%s1439_s21 + $0x20] sm:$0xff] %vm554_vm1, %v921_v3  ;;  %v847_v45 = vadd.f32 %v830_v2, %v799_v43 }
 0x25c   : > { %v855_v47 = vmax.f32 %v847_v45, 0.0 }
 0x25e   : > { %v922_v48 = vadd.f32 %v909_v46, %v855_v47 }
 0x25f   : > { %v787_v51 = vpop.permute.xlu0 %786 }
 0x260   : > { %930 = vst.msk [vmem:[%s1439_s21 + $0x28] sm:$0xff] %vm554_vm1, %v922_v48  ;;  %v800_v9 = vmul.f32 %v787_v51, %v1280_v25 }
 0x263   : > { %v835_v52 = vpop.permute.xlu1 %834 }
 0x264   : > { %v848_v53 = vadd.f32 %v835_v52, %v800_v9 }
 0x266   : > { %v856_v54 = vmax.f32 %v848_v53, 0.0 }
 0x268   : > { %v923_v56 = vadd.f32 %v912_v49, %v856_v54 }
 0x26a   : > { %931 = vst.msk [vmem:[%s1439_s21 + $0x30] sm:$0xff] %vm554_vm1, %v923_v56 }
 0x26b   : > { %v840_v57 = vpop.permute.xlu0 %839 }
 0x26c   : > { %v849_v59 = vadd.f32 %v840_v57, %v801_v17 }
 0x26e   : > { %v857_v60 = vmax.f32 %v849_v59, 0.0 }
 0x270   : > { %v924_v63 = vadd.f32 %v914_v62, %v857_v60 }
 0x272   : > { %932 = vst.msk [vmem:[%s1439_s21 + $0x38] sm:$0xff] %vm554_vm1, %v924_v63 }
 0x273 PF: > { %s17_s24 = sadd.s32 1, %s1060_s24  }
 0x274   : > { %p14_p4 = scmp.ge.s32.totalorder %s17_s24, 8  }
 0x276   :  { %16 = sbr.rel (!%p14_p4) target bundleno = 1 (0x1), region = 81 }

// kernel: _lambda_.11
= control target key start
LH: loop header
LB: loop body
LE: loop exit
PB: predicated region body
PF: predicated region fallthrough
CT: control target
= control target key end

     0   :  { %s739_s24 = smov 0   ;;  %s1038_s0 = inlined_call_operand.vmem [shape: f32[6,16,576], index: 0, kind: input, shape index: {}]   ;;  %s1039_s1 = inlined_call_operand.vmem [shape: f32[576,128], index: 1, kind: input, shape index: {}]   ;;  %s1040_s2 = inlined_call_operand.vmem [shape: f32[1,128], index: 2, kind: input, shape index: {}]   ;;  %s1041_s3 = inlined_call_operand.vmem [shape: f32[1,128], index: 3, kind: input, shape index: {}]   ;;  %s1042_s4 = inlined_call_operand.vmem [shape: f32[1,128], index: 4, kind: input, shape index: {}]   ;;  %s1043_s5 = inlined_call_operand.vmem [shape: f32[6,16,64], index: 5, kind: input, shape index: {}]   ;;  %s1044_s6 = inlined_call_operand.vmem [shape: f32[64,128], index: 6, kind: input, shape index: {}]   ;;  %s1045_s7 = inlined_call_operand.vmem [shape: f32[6,16,128], index: 7, kind: output, shape index: {}]  }
   0x1 LB: > { %s659_s25 = sadd.s32 4294967295, %s696_s24   ;;  %p663_p0 = scmp.ge.s32.totalorder %s696_s24, 1  ;;  %s696_s24 = sphi %s739_s24, %s17_s24  }
   0x2   : > { %p247_p1 = scmp.lt.s32.totalorder %s696_s24, 7 }
   0x4   : > { %p248_p2 = pnand %p663_p0, %p247_p1 }
   0x5   : > { %p845_p3 = scmp.lt.s32.totalorder (!%p248_p2), %s659_s25, 5 }
   0x6   : > { %251 = sbr.rel (%p248_p2) target bundleno = 269 (0x10d), region = 48 }
   0xb   : > { %v329_v0 = vld [vmem:[%s1039_s1 + $0x70] sm:$0xff]  ;;  %v330_v1 = vld [vmem:[%s1039_s1 + $0x78] sm:$0xff]  ;;  %v327_v11 = vld [vmem:[%s1039_s1 + $0x60] sm:$0xff]  ;;  %s1048_s25 = smov (!%p845_p3, %s659_s25), 5  ;;  %vm427_vm0 = vcmask 523264  }
   0xc   : > { %v361_v2 = vld [vmem:[%s1039_s1 + $0x170] sm:$0xff]  ;;  %v394_v3 = vpack.c.bf16 %v330_v1, %v329_v0  ;;  %v362_v4 = vld [vmem:[%s1039_s1 + $0x178] sm:$0xff]  ;;  %v328_v13 = vld [vmem:[%s1039_s1 + $0x68] sm:$0xff]  ;;  %s675_s16 = smul.u32 80, %s1048_s25  ;;  %s673_s23 = sshll.u32 %s1048_s25, 4 }
   0xd   : > { %v377_v5 = vld [vmem:[%s1039_s1 + $0x1f0] sm:$0xff]  ;;  %v378_v6 = vld [vmem:[%s1039_s1 + $0x1f8] sm:$0xff]  ;;  %v410_v7 = vpack.c.bf16 %v362_v4, %v361_v2  ;;  %v359_v14 = vld [vmem:[%s1039_s1 + $0x160] sm:$0xff]  ;;  %v393_v16 = vpack.c.bf16 %v328_v13, %v327_v11  ;;  %s293_s29 = scalar_lea.vmem %s1043_s5, %s673_s23  ;;  %s298_s13 = scalar_lea.vmem %s1045_s7, %s673_s23 }
   0xe   : > { %v418_v8 = vpack.c.bf16 %v378_v6, %v377_v5  ;;  %v345_v9 = vld [vmem:[%s1039_s1 + $0xf0] sm:$0xff]  ;;  %v346_v10 = vld [vmem:[%s1039_s1 + $0xf8] sm:$0xff]  ;;  %431 = vmatpush.bf16.msra.mxu0 %v394_v3  ;;  %v360_v15 = vld [vmem:[%s1039_s1 + $0x168] sm:$0xff]  ;;  %s931_s14 = scalar_lea.vmem %s1038_s0, %s675_s16 }
   0xf   : > { %v402_v12 = vpack.c.bf16 %v346_v10, %v345_v9  ;;  %459 = vmatpush.bf16.msra.mxu2 %v410_v7  ;;  %v409_v17 = vpack.c.bf16 %v360_v15, %v359_v14  ;;  %v375_v18 = vld [vmem:[%s1039_s1 + $0x1e0] sm:$0xff]  ;;  %v376_v19 = vld [vmem:[%s1039_s1 + $0x1e8] sm:$0xff]  ;;  %v325_v23 = vld [vmem:[%s1039_s1 + $0x50] sm:$0xff] }
  0x10   : > { %473 = vmatpush.bf16.msra.mxu3 %v418_v8  ;;  %v343_v20 = vld [vmem:[%s1039_s1 + $0xe0] sm:$0xff]  ;;  %v417_v21 = vpack.c.bf16 %v376_v19, %v375_v18  ;;  %v344_v22 = vld [vmem:[%s1039_s1 + $0xe8] sm:$0xff]  ;;  %v326_v24 = vld [vmem:[%s1039_s1 + $0x58] sm:$0xff] }
  0x11   : > { %445 = vmatpush.bf16.msra.mxu1 %v402_v12  ;;  %v401_v25 = vpack.c.bf16 %v344_v22, %v343_v20  ;;  %v357_v26 = vld [vmem:[%s1039_s1 + $0x150] sm:$0xff]  ;;  %v358_v27 = vld [vmem:[%s1039_s1 + $0x158] sm:$0xff]  ;;  %v392_v29 = vpack.c.bf16 %v326_v24, %v325_v23  ;;  %v323_v35 = vld [vmem:[%s1039_s1 + $0x40] sm:$0xff] }
  0x12   : > { %v373_v28 = vld [vmem:[%s1039_s1 + $0x1d0] sm:$0xff]  ;;  %432 = vmatpush.bf16.msra.mxu0 %v393_v16  ;;  %v374_v30 = vld [vmem:[%s1039_s1 + $0x1d8] sm:$0xff]  ;;  %v408_v33 = vpack.c.bf16 %v358_v27, %v357_v26  ;;  %v324_v36 = vld [vmem:[%s1039_s1 + $0x48] sm:$0xff] }
  0x13   : > { %v341_v31 = vld [vmem:[%s1039_s1 + $0xd0] sm:$0xff]  ;;  %v342_v32 = vld [vmem:[%s1039_s1 + $0xd8] sm:$0xff]  ;;  %460 = vmatpush.bf16.msra.mxu2 %v409_v17  ;;  %v416_v34 = vpack.c.bf16 %v374_v30, %v373_v28  ;;  %v355_v37 = vld [vmem:[%s1039_s1 + $0x140] sm:$0xff]  ;;  %v391_v44 = vpack.c.bf16 %v324_v36, %v323_v35 }
  0x14   : > { %474 = vmatpush.bf16.msra.mxu3 %v417_v21  ;;  %v400_v38 = vpack.c.bf16 %v342_v32, %v341_v31  ;;  %v356_v39 = vld [vmem:[%s1039_s1 + $0x148] sm:$0xff]  ;;  %v371_v40 = vld [vmem:[%s1039_s1 + $0x1c0] sm:$0xff]  ;;  %v321_v47 = vld [vmem:[%s1039_s1 + $0x30] sm:$0xff] }
  0x15   : > { %446 = vmatpush.bf16.msra.mxu1 %v401_v25  ;;  %v372_v41 = vld [vmem:[%s1039_s1 + $0x1c8] sm:$0xff]  ;;  %v339_v42 = vld [vmem:[%s1039_s1 + $0xc0] sm:$0xff]  ;;  %v407_v45 = vpack.c.bf16 %v356_v39, %v355_v37  ;;  %v322_v48 = vld [vmem:[%s1039_s1 + $0x38] sm:$0xff] }
  0x16   : > { %v340_v43 = vld [vmem:[%s1039_s1 + $0xc8] sm:$0xff]  ;;  %433 = vmatpush.bf16.msra.mxu0 %v392_v29  ;;  %v415_v46 = vpack.c.bf16 %v372_v41, %v371_v40  ;;  %v353_v49 = vld [vmem:[%s1039_s1 + $0x130] sm:$0xff]  ;;  %v354_v51 = vld [vmem:[%s1039_s1 + $0x138] sm:$0xff]  ;;  %v390_v56 = vpack.c.bf16 %v322_v48, %v321_v47 }
  0x17   : > { %461 = vmatpush.bf16.msra.mxu2 %v408_v33  ;;  %v399_v50 = vpack.c.bf16 %v340_v43, %v339_v42  ;;  %v369_v52 = vld [vmem:[%s1039_s1 + $0x1b0] sm:$0xff]  ;;  %v370_v53 = vld [vmem:[%s1039_s1 + $0x1b8] sm:$0xff]  ;;  %v406_v57 = vpack.c.bf16 %v354_v51, %v353_v49  ;;  %v319_v59 = vld [vmem:[%s1039_s1 + $0x20] sm:$0xff] }
  0x18   : > { %475 = vmatpush.bf16.msra.mxu3 %v416_v34  ;;  %v337_v54 = vld [vmem:[%s1039_s1 + $0xb0] sm:$0xff]  ;;  %v338_v55 = vld [vmem:[%s1039_s1 + $0xb8] sm:$0xff]  ;;  %v414_v58 = vpack.c.bf16 %v370_v53, %v369_v52  ;;  %v320_v60 = vld [vmem:[%s1039_s1 + $0x28] sm:$0xff] }
  0x19   : > { %447 = vmatpush.bf16.msra.mxu1 %v400_v38  ;;  %v351_v61 = vld [vmem:[%s1039_s1 + $0x120] sm:$0xff]  ;;  %v398_v62 = vpack.c.bf16 %v338_v55, %v337_v54  ;;  %v352_v63 = vld [vmem:[%s1039_s1 + $0x128] sm:$0xff]  ;;  %v389_v4 = vpack.c.bf16 %v320_v60, %v319_v59  ;;  %v317_v7 = vld [vmem:[%s1039_s1 + $0x10] sm:$0xff] }
  0x1a   : > { %434 = vmatpush.bf16.msra.mxu0 %v391_v44  ;;  %v367_v0 = vld [vmem:[%s1039_s1 + $0x1a0] sm:$0xff]  ;;  %v368_v1 = vld [vmem:[%s1039_s1 + $0x1a8] sm:$0xff]  ;;  %v405_v5 = vpack.c.bf16 %v352_v63, %v351_v61  ;;  %v318_v8 = vld [vmem:[%s1039_s1 + $0x18] sm:$0xff] }
  0x1b   : > { %462 = vmatpush.bf16.msra.mxu2 %v407_v45  ;;  %v335_v2 = vld [vmem:[%s1039_s1 + $0xa0] sm:$0xff]  ;;  %v336_v3 = vld [vmem:[%s1039_s1 + $0xa8] sm:$0xff]  ;;  %v413_v6 = vpack.c.bf16 %v368_v1, %v367_v0  ;;  %v349_v9 = vld [vmem:[%s1039_s1 + $0x110] sm:$0xff]  ;;  %v388_v16 = vpack.c.bf16 %v318_v8, %v317_v7 }
  0x1c   : > { %476 = vmatpush.bf16.msra.mxu3 %v415_v46  ;;  %v397_v10 = vpack.c.bf16 %v336_v3, %v335_v2  ;;  %v350_v11 = vld [vmem:[%s1039_s1 + $0x118] sm:$0xff]  ;;  %v365_v12 = vld [vmem:[%s1039_s1 + $0x190] sm:$0xff]  ;;  %v315_v17 = vld [vmem:[%s1039_s1] sm:$0xff] }
  0x1d   : > { %448 = vmatpush.bf16.msra.mxu1 %v399_v50  ;;  %v366_v13 = vld [vmem:[%s1039_s1 + $0x198] sm:$0xff]  ;;  %v333_v14 = vld [vmem:[%s1039_s1 + $0x90] sm:$0xff]  ;;  %v316_v18 = vld [vmem:[%s1039_s1 + $0x8] sm:$0xff]  ;;  %v404_v20 = vpack.c.bf16 %v350_v11, %v349_v9 }
  0x1e   : > { %435 = vmatpush.bf16.msra.mxu0 %v390_v56  ;;  %v334_v15 = vld [vmem:[%s1039_s1 + $0x98] sm:$0xff]  ;;  %v347_v19 = vld [vmem:[%s1039_s1 + $0x100] sm:$0xff]  ;;  %v412_v21 = vpack.c.bf16 %v366_v13, %v365_v12  ;;  %v348_v22 = vld [vmem:[%s1039_s1 + $0x108] sm:$0xff]  ;;  %v387_v32 = vpack.c.bf16 %v316_v18, %v315_v17  ;;  %v698_v18 = vmov 16.0  }
  0x1f   : > { %463 = vmatpush.bf16.msra.mxu2 %v406_v57  ;;  %v363_v23 = vld [vmem:[%s1039_s1 + $0x180] sm:$0xff]  ;;  %v364_v24 = vld [vmem:[%s1039_s1 + $0x188] sm:$0xff]  ;;  %v396_v25 = vpack.c.bf16 %v334_v15, %v333_v14  ;;  %v385_v30 = vld [vmem:[%s1039_s1 + $0x230] sm:$0xff]  ;;  %v403_v36 = vpack.c.bf16 %v348_v22, %v347_v19  ;;  %686 = vrcp.f32 %v698_v18 }
  0x20   : > { %477 = vmatpush.bf16.msra.mxu3 %v414_v58  ;;  %v331_v26 = vld [vmem:[%s1039_s1 + $0x80] sm:$0xff]  ;;  %v332_v27 = vld [vmem:[%s1039_s1 + $0x88] sm:$0xff]  ;;  %v386_v31 = vld [vmem:[%s1039_s1 + $0x238] sm:$0xff]  ;;  %v411_v37 = vpack.c.bf16 %v364_v24, %v363_v23 }
  0x21   : > { %449 = vmatpush.bf16.msra.mxu1 %v398_v62  ;;  %v300_v28 = vld [vmem:[%s931_s14] sm:$0xff]  ;;  %v305_v29 = vld [vmem:[%s931_s14 + $0x28] sm:$0xff]  ;;  %v302_v33 = vld [vmem:[%s931_s14 + $0x10] sm:$0xff]  ;;  %v395_v41 = vpack.c.bf16 %v332_v27, %v331_v26  ;;  %v422_v42 = vpack.c.bf16 %v386_v31, %v385_v30 }
  0x22   : > { %436 = vmatpush.bf16.msra.mxu0 %v389_v4  ;;  %v565_v34 = vld [vmem:[%s1044_s6 + $0x30] sm:$0xff]  ;;  %v566_v35 = vld [vmem:[%s1044_s6 + $0x38] sm:$0xff]  ;;  %v308_v40 = vld [vmem:[%s931_s14 + $0x40] sm:$0xff]  ;;  %v310_v45 = vpack.c.bf16 %v305_v29, %v300_v28 }
  0x23   : > { %464 = vmatpush.bf16.msra.mxu2 %v405_v5  ;;  %v307_v38 = vld [vmem:[%s931_s14 + $0x38] sm:$0xff]  ;;  %v301_v43 = vld [vmem:[%s931_s14 + $0x8] sm:$0xff]  ;;  %v306_v44 = vld [vmem:[%s931_s14 + $0x30] sm:$0xff]  ;;  %v570_v48 = vpack.c.bf16 %v566_v35, %v565_v34 }
  0x24   : > { %478 = vmatpush.bf16.msra.mxu3 %v413_v6  ;;  %v303_v39 = vld [vmem:[%s931_s14 + $0x18] sm:$0xff]  ;;  %v383_v46 = vld [vmem:[%s1039_s1 + $0x220] sm:$0xff]  ;;  %v384_v47 = vld [vmem:[%s1039_s1 + $0x228] sm:$0xff]  ;;  %v312_v49 = vpack.c.bf16 %v307_v38, %v302_v33  ;;  %v311_v53 = vpack.c.bf16 %v306_v44, %v301_v43 }
  0x25   : > { %450 = vmatpush.bf16.msra.mxu1 %v397_v10  ;;  %v313_v50 = vpack.c.bf16 %v308_v40, %v303_v39  ;;  %v563_v51 = vld [vmem:[%s1044_s6 + $0x20] sm:$0xff]  ;;  %v564_v52 = vld [vmem:[%s1044_s6 + $0x28] sm:$0xff]  ;;  %v421_v54 = vpack.c.bf16 %v384_v47, %v383_v46  ;;  %v381_v55 = vld [vmem:[%s1039_s1 + $0x210] sm:$0xff]  ;;  %v687_v24 = vpop.eup %686 }
  0x26   : > { %437 = vmatpush.bf16.msra.mxu0 %v388_v16  ;;  %v382_v56 = vld [vmem:[%s1039_s1 + $0x218] sm:$0xff]  ;;  %v569_v57 = vpack.c.bf16 %v564_v52, %v563_v51  ;;  %v561_v58 = vld [vmem:[%s1044_s6 + $0x10] sm:$0xff]  ;;  %v379_v61 = vld [vmem:[%s1039_s1 + $0x200] sm:$0xff]  ;;  %v511_v28 = vmul.f32 16.0, %v687_v24  ;;  %vm515_vm1 = vweird.f32 %v687_v24 }
  0x27   : > { %465 = vmatpush.bf16.msra.mxu2 %v404_v20  ;;  %v562_v59 = vld [vmem:[%s1044_s6 + $0x18] sm:$0xff]  ;;  %v420_v60 = vpack.c.bf16 %v382_v56, %v381_v55  ;;  %v380_v62 = vld [vmem:[%s1039_s1 + $0x208] sm:$0xff]  ;;  %v559_v0 = vld [vmem:[%s1044_s6] sm:$0xff] }
  0x28   : > { %479 = vmatpush.bf16.msra.mxu3 %v412_v21  ;;  %v568_v63 = vpack.c.bf16 %v562_v59, %v561_v58  ;;  %v560_v1 = vld [vmem:[%s1044_s6 + $0x8] sm:$0xff]  ;;  %v419_v2 = vpack.c.bf16 %v380_v62, %v379_v61  ;;  %v304_v4 = vld [vmem:[%s931_s14 + $0x20] sm:$0xff]  ;;  %v512_v34 = vsub.f32 1.0, %v511_v28 }
  0x29   : > { %451 = vmatpush.bf16.msra.mxu1 %v396_v25  ;;  %v567_v3 = vpack.c.bf16 %v560_v1, %v559_v0  ;;  %v309_v5 = vld [vmem:[%s931_s14 + $0x48] sm:$0xff]  ;;  %v556_v6 = vld [vmem:[%s293_s29] sm:$0xff] }
  0x2a   : > { %438 = vmatpush.bf16.msra.mxu0 %v387_v32  ;;  %v557_v7 = vld [vmem:[%s293_s29 + $0x8] sm:$0xff]  ;;  %v314_v8 = vpack.c.bf16 %v309_v5, %v304_v4  ;;  %v685_v14 = vld [vmem:[%s1040_s2] ss:$0 sm:$0xff] }
  0x2b   : > { %466 = vmatpush.bf16.msra.mxu2 %v403_v36  ;;  %v558_v9 = vpack.c.bf16 %v557_v7, %v556_v6  ;;  %v501_v0 = vld [vmem:[%s1041_s3] sm:$0x1] }
  0x2c   : > { %480 = vmatpush.bf16.msra.mxu3 %v411_v37  ;;  %v513_v37 = vmul.f32 %v687_v24, %v512_v34  ;;  %v502_v4 = vld [vmem:[%s1042_s4] sm:$0x1] }
  0x2d   : > { %452 = vmatpush.bf16.msra.mxu1 %v395_v41  ;;  %439 = vmatmul.bf16.vlgmr.msra.gmra.mxu0 %v310_v45 }
  0x2e   : > { %491 = vmatpush.bf16.msrb.mxu0 %v422_v42  ;;  %467 = vmatmul.bf16.vlgmr.msra.gmra.mxu2 %v312_v49  ;;  %v514_v40 = vadd.f32 %v687_v24, %v513_v37 }
  0x2f   : > { %481 = vmatmul.bf16.vlgmr.msra.gmra.mxu3 %v313_v50 }
  0x30   : > { %453 = vmatmul.bf16.vlgmr.msra.gmra.mxu1 %v311_v53  ;;  %v516_v43 = vsel %vm515_vm1, %v687_v24, %v514_v40 }
  0x31   : > { %578 = vmatpush.bf16.msrb.mxu1 %v570_v48 }
  0x32   : > { %492 = vmatpush.bf16.msrb.mxu0 %v421_v54 }
  0x35   : > { %579 = vmatpush.bf16.msrb.mxu1 %v569_v57 }
  0x36   : > { %493 = vmatpush.bf16.msrb.mxu0 %v420_v60 }
  0x39   : > { %580 = vmatpush.bf16.msrb.mxu1 %v568_v63 }
  0x3a   : > { %494 = vmatpush.bf16.msrb.mxu0 %v419_v2 }
  0x3d   : > { %581 = vmatpush.bf16.msrb.mxu1 %v567_v3  ;;  %669 = vmatmul.msk.bf16.vlgmr.msrb.gmra.mxu0 %vm427_vm0, %v314_v8 }
  0x40   : > { %670 = vmatmul.msk.bf16.vlgmr.msrb.gmra.mxu1 %vm427_vm0, %v558_v9 }
  0xaa   : > { %v440_v10 = vpop.f32.mrf.mxu0 }
  0xab   : > { %v441_v16 = vadd.f32 %v685_v14, %v440_v10 }
  0xad   : > { %v454_v11 = vpop.f32.mrf.mxu1 }
  0xae   : > { %v455_v22 = vadd.f32 %v454_v11, %v441_v16 }
  0xb1   : > { %v468_v12 = vpop.f32.mrf.mxu2 }
  0xb2   : > { %v442_v13 = vpop.f32.mrf.mxu0  ;;  %v482_v15 = vpop.f32.mrf.mxu3  ;;  %v469_v25 = vadd.f32 %v468_v12, %v455_v22 }
  0xb3   : > { %v443_v17 = vadd.f32 %v685_v14, %v442_v13 }
  0xb4   : > { %v483_v29 = vadd.f32 %v482_v15, %v469_v25 }
  0xb5   : > { %v456_v19 = vpop.f32.mrf.mxu1 }
  0xb6   : > { %v457_v23 = vadd.f32 %v456_v19, %v443_v17 }
  0xb9   : > { %v470_v20 = vpop.f32.mrf.mxu2 }
  0xba   : > { %v496_v21 = vpop.f32.mrf.mxu0  ;;  %v471_v26 = vadd.f32 %v470_v20, %v457_v23  ;;  %v484_v27 = vpop.f32.mrf.mxu3 }
  0xbb   : > { %v497_v32 = vadd.f32 %v496_v21, %v483_v29 }
  0xbc   : > { %v485_v30 = vadd.f32 %v484_v27, %v471_v26 }
  0xbd   : > { %v583_v5 = vpop.f32.mrf.mxu1 }
  0xc2   : > { %v498_v31 = vpop.f32.mrf.mxu0 }
  0xc3   : > { %v499_v33 = vadd.f32 %v498_v31, %v485_v30 }
  0xc5   : > { %v503_v35 = vadd.f32 %v499_v33, %v497_v32  ;;  %v585_v16 = vpop.f32.mrf.mxu1 }
  0xc7   : > { %v504_v36 = vrot.slane %v503_v35, 4 }
  0xc9   : > { %v505_v38 = vadd.f32 %v504_v36, %v503_v35 }
  0xcb   : > { %v506_v39 = vrot.slane %v505_v38, 2 }
  0xcd   : > { %v507_v41 = vadd.f32 %v506_v39, %v505_v38 }
  0xcf   : > { %v508_v42 = vrot.slane %v507_v41, 1 }
  0xd1   : > { %v509_v44 = vadd.f32 %v508_v42, %v507_v41 }
  0xd3   : > { %v517_v45 = vmul.f32 %v516_v43, %v509_v44 }
  0xd5   : > { %v518_v46 = vsub.f32 %v497_v32, %v517_v45  ;;  %v519_v47 = vsub.f32 %v499_v33, %v517_v45 }
  0xd7   : > { %v520_v48 = vmul.f32 %v518_v46, %v518_v46  ;;  %v521_v49 = vmul.f32 %v519_v47, %v519_v47 }
  0xd9   : > { %v522_v50 = vadd.f32 %v521_v49, %v520_v48 }
  0xdb   : > { %v523_v51 = vrot.slane %v522_v50, 4 }
  0xdd   : > { %v524_v52 = vadd.f32 %v523_v51, %v522_v50 }
  0xdf   : > { %v525_v53 = vrot.slane %v524_v52, 2 }
  0xe1   : > { %v526_v54 = vadd.f32 %v525_v53, %v524_v52 }
  0xe3   : > { %v527_v55 = vrot.slane %v526_v54, 1 }
  0xe5   : > { %v528_v56 = vadd.f32 %v527_v55, %v526_v54 }
  0xe7   : > { %v529_v57 = vmul.f32 %v528_v56, %v516_v43 }
  0xe9   : > { %v530_v58 = vadd.f32 1e-05, %v529_v57 }
  0xeb   : > { %688 = vrsqrt.f32 %v530_v58  ;;  %vm537_vm3 = vweird.f32 %v530_v58 }
  0xf1   : > { %v689_v59 = vpop.eup %688 }
  0xf2   : > { %v532_v60 = vmul.f32 %v689_v59, %v530_v58  ;;  %vm538_vm2 = vweird.f32 %v689_v59 }
  0xf3   : > { %vm539_vm4 = vmor %vm537_vm3, %vm538_vm2 }
  0xf4   : > { %v533_v61 = vmul.f32 %v689_v59, %v532_v60 }
  0xf6   : > { %v534_v62 = vmul.f32 0.5, %v533_v61 }
  0xf8   : > { %v535_v63 = vsub.f32 1.5, %v534_v62 }
  0xfa   : > { %v536_v1 = vmul.f32 %v689_v59, %v535_v63 }
  0xfc   : > { %v540_v2 = vsel %vm539_vm4, %v689_v59, %v536_v1 }
  0xfd   : > { %v541_v3 = vmul.f32 %v540_v2, %v501_v0 }
  0xff   : > { %v542_v6 = vmul.f32 %v541_v3, %v517_v45  ;;  %v545_v7 = vperm.slane %v541_v3, 0 }
 0x101   : > { %v543_v8 = vsub.f32 %v502_v4, %v542_v6  ;;  %v547_v9 = vmul.f32 %v545_v7, %v497_v32  ;;  %v548_v11 = vmul.f32 %v545_v7, %v499_v33 }
 0x103   : > { %v550_v10 = vperm.slane %v543_v8, 0 }
 0x105   : > { %v552_v12 = vadd.f32 %v550_v10, %v547_v9  ;;  %v553_v13 = vadd.f32 %v550_v10, %v548_v11 }
 0x107   : > { %v554_v14 = vmax.f32 %v552_v12, 0.0  ;;  %v555_v15 = vmax.f32 %v553_v13, 0.0 }
 0x109   : > { %v588_v17 = vadd.f32 %v583_v5, %v554_v14  ;;  %v589_v18 = vadd.f32 %v585_v16, %v555_v15 }
 0x10b   : > { %590 = vst [vmem:[%s298_s13] sm:$0xff] %v588_v17 }
 0x10c   : > { %591 = vst [vmem:[%s298_s13 + $0x8] sm:$0xff] %v589_v18 }
 0x10d PF: > { %s17_s24 = sadd.s32 1, %s696_s24  }
 0x10e   : > { %p14_p4 = scmp.ge.s32.totalorder %s17_s24, 8  }
 0x110   :  { %16 = sbr.rel (!%p14_p4) target bundleno = 1 (0x1), region = 81 }

// kernel: _lambda_.12
= control target key start
LH: loop header
LB: loop body
LE: loop exit
PB: predicated region body
PF: predicated region fallthrough
CT: control target
= control target key end

     0   :  { %s773_s18 = smov 0   ;;  %s1254_s0 = inlined_call_operand.vmem [shape: f32[6,4,1152], index: 0, kind: input, shape index: {}]   ;;  %s1255_s1 = inlined_call_operand.vmem [shape: f32[1152,128], index: 1, kind: input, shape index: {}]   ;;  %s1256_s2 = inlined_call_operand.vmem [shape: f32[1,128], index: 2, kind: input, shape index: {}]   ;;  %s1257_s3 = inlined_call_operand.vmem [shape: f32[1,128], index: 3, kind: input, shape index: {}]   ;;  %s1258_s4 = inlined_call_operand.vmem [shape: f32[1,128], index: 4, kind: input, shape index: {}]   ;;  %s1259_s5 = inlined_call_operand.vmem [shape: f32[6,4,128], index: 5, kind: output, shape index: {}]  }
   0x1 LB: > { %s710_s19 = sadd.s32 4294967295, %s740_s18   ;;  %p714_p0 = scmp.ge.s32.totalorder %s740_s18, 1  ;;  %s740_s18 = sphi %s773_s18, %s15_s18  }
   0x2   : > { %p187_p1 = scmp.lt.s32.totalorder %s740_s18, 7 }
   0x4   : > { %p188_p2 = pnand %p714_p0, %p187_p1 }
   0x5   : > { %p915_p3 = scmp.lt.s32.totalorder (!%p188_p2), %s710_s19, 5 }
   0x6   : > { %191 = sbr.rel (%p188_p2) target bundleno = 304 (0x130), region = 40 }
   0xb   : > { %v282_v0 = vld [vmem:[%s1255_s1 + $0x70] sm:$0xff]  ;;  %v283_v1 = vld [vmem:[%s1255_s1 + $0x78] sm:$0xff]  ;;  %v280_v5 = vld [vmem:[%s1255_s1 + $0x60] sm:$0xff]  ;;  %s1262_s19 = smov (!%p915_p3, %s710_s19), 5  ;;  %vm607_vm0 = vcmask 1043456  }
   0xc   : > { %v314_v2 = vld [vmem:[%s1255_s1 + $0x170] sm:$0xff]  ;;  %v419_v3 = vpack.c.bf16 %v283_v1, %v282_v0  ;;  %v315_v4 = vld [vmem:[%s1255_s1 + $0x178] sm:$0xff]  ;;  %v281_v6 = vld [vmem:[%s1255_s1 + $0x68] sm:$0xff]  ;;  %s719_s9 = smul.u32 36, %s1262_s19  ;;  %s716_s23 = sshll.u32 %s1262_s19, 2 }
   0xd   : > { %v435_v7 = vpack.c.bf16 %v315_v4, %v314_v2  ;;  %v330_v8 = vld [vmem:[%s1255_s1 + $0x1f0] sm:$0xff]  ;;  %v331_v9 = vld [vmem:[%s1255_s1 + $0x1f8] sm:$0xff]  ;;  %v418_v11 = vpack.c.bf16 %v281_v6, %v280_v5  ;;  %v312_v14 = vld [vmem:[%s1255_s1 + $0x160] sm:$0xff] }
   0xe   : > { %v298_v10 = vld [vmem:[%s1255_s1 + $0xf0] sm:$0xff]  ;;  %488 = vmatpush.bf16.msra.mxu0 %v419_v3  ;;  %v443_v12 = vpack.c.bf16 %v331_v9, %v330_v8  ;;  %v299_v13 = vld [vmem:[%s1255_s1 + $0xf8] sm:$0xff]  ;;  %v313_v15 = vld [vmem:[%s1255_s1 + $0x168] sm:$0xff]  ;;  %s1019_s10 = scalar_lea.vmem %s1254_s0, %s719_s9 }
   0xf   : > { %514 = vmatpush.bf16.msra.mxu2 %v435_v7  ;;  %v427_v16 = vpack.c.bf16 %v299_v13, %v298_v10  ;;  %v434_v17 = vpack.c.bf16 %v313_v15, %v312_v14  ;;  %v278_v18 = vld [vmem:[%s1255_s1 + $0x50] sm:$0xff]  ;;  %v279_v19 = vld [vmem:[%s1255_s1 + $0x58] sm:$0xff]  ;;  %v328_v20 = vld [vmem:[%s1255_s1 + $0x1e0] sm:$0xff] }
  0x10   : > { %527 = vmatpush.bf16.msra.mxu3 %v443_v12  ;;  %v329_v21 = vld [vmem:[%s1255_s1 + $0x1e8] sm:$0xff]  ;;  %v296_v22 = vld [vmem:[%s1255_s1 + $0xe0] sm:$0xff]  ;;  %v310_v26 = vld [vmem:[%s1255_s1 + $0x150] sm:$0xff]  ;;  %v417_v28 = vpack.c.bf16 %v279_v19, %v278_v18 }
  0x11   : > { %v297_v23 = vld [vmem:[%s1255_s1 + $0xe8] sm:$0xff]  ;;  %501 = vmatpush.bf16.msra.mxu1 %v427_v16  ;;  %v442_v24 = vpack.c.bf16 %v329_v21, %v328_v20  ;;  %v311_v27 = vld [vmem:[%s1255_s1 + $0x158] sm:$0xff]  ;;  %v276_v29 = vld [vmem:[%s1255_s1 + $0x40] sm:$0xff] }
  0x12   : > { %v426_v25 = vpack.c.bf16 %v297_v23, %v296_v22  ;;  %489 = vmatpush.bf16.msra.mxu0 %v418_v11  ;;  %v326_v30 = vld [vmem:[%s1255_s1 + $0x1d0] sm:$0xff]  ;;  %v327_v31 = vld [vmem:[%s1255_s1 + $0x1d8] sm:$0xff]  ;;  %v433_v32 = vpack.c.bf16 %v311_v27, %v310_v26  ;;  %v277_v33 = vld [vmem:[%s1255_s1 + $0x48] sm:$0xff] }
  0x13   : > { %515 = vmatpush.bf16.msra.mxu2 %v434_v17  ;;  %v294_v34 = vld [vmem:[%s1255_s1 + $0xd0] sm:$0xff]  ;;  %v295_v35 = vld [vmem:[%s1255_s1 + $0xd8] sm:$0xff]  ;;  %v441_v36 = vpack.c.bf16 %v327_v31, %v326_v30  ;;  %v308_v37 = vld [vmem:[%s1255_s1 + $0x140] sm:$0xff]  ;;  %v416_v42 = vpack.c.bf16 %v277_v33, %v276_v29 }
  0x14   : > { %528 = vmatpush.bf16.msra.mxu3 %v442_v24  ;;  %v309_v38 = vld [vmem:[%s1255_s1 + $0x148] sm:$0xff]  ;;  %v425_v39 = vpack.c.bf16 %v295_v35, %v294_v34  ;;  %v324_v40 = vld [vmem:[%s1255_s1 + $0x1c0] sm:$0xff]  ;;  %v274_v46 = vld [vmem:[%s1255_s1 + $0x30] sm:$0xff] }
  0x15   : > { %502 = vmatpush.bf16.msra.mxu1 %v426_v25  ;;  %v325_v41 = vld [vmem:[%s1255_s1 + $0x1c8] sm:$0xff]  ;;  %v292_v43 = vld [vmem:[%s1255_s1 + $0xc0] sm:$0xff]  ;;  %v432_v45 = vpack.c.bf16 %v309_v38, %v308_v37  ;;  %v275_v47 = vld [vmem:[%s1255_s1 + $0x38] sm:$0xff] }
  0x16   : > { %490 = vmatpush.bf16.msra.mxu0 %v417_v28  ;;  %v293_v44 = vld [vmem:[%s1255_s1 + $0xc8] sm:$0xff]  ;;  %v440_v48 = vpack.c.bf16 %v325_v41, %v324_v40  ;;  %v306_v49 = vld [vmem:[%s1255_s1 + $0x130] sm:$0xff]  ;;  %v307_v50 = vld [vmem:[%s1255_s1 + $0x138] sm:$0xff]  ;;  %v415_v54 = vpack.c.bf16 %v275_v47, %v274_v46 }
  0x17   : > { %516 = vmatpush.bf16.msra.mxu2 %v433_v32  ;;  %v424_v51 = vpack.c.bf16 %v293_v44, %v292_v43  ;;  %v322_v52 = vld [vmem:[%s1255_s1 + $0x1b0] sm:$0xff]  ;;  %v323_v53 = vld [vmem:[%s1255_s1 + $0x1b8] sm:$0xff]  ;;  %v431_v57 = vpack.c.bf16 %v307_v50, %v306_v49  ;;  %v272_v58 = vld [vmem:[%s1255_s1 + $0x20] sm:$0xff] }
  0x18   : > { %529 = vmatpush.bf16.msra.mxu3 %v441_v36  ;;  %v290_v55 = vld [vmem:[%s1255_s1 + $0xb0] sm:$0xff]  ;;  %v291_v56 = vld [vmem:[%s1255_s1 + $0xb8] sm:$0xff]  ;;  %v273_v59 = vld [vmem:[%s1255_s1 + $0x28] sm:$0xff]  ;;  %v439_v60 = vpack.c.bf16 %v323_v53, %v322_v52 }
  0x19   : > { %503 = vmatpush.bf16.msra.mxu1 %v425_v39  ;;  %v304_v61 = vld [vmem:[%s1255_s1 + $0x120] sm:$0xff]  ;;  %v305_v62 = vld [vmem:[%s1255_s1 + $0x128] sm:$0xff]  ;;  %v423_v63 = vpack.c.bf16 %v291_v56, %v290_v55  ;;  %v414_v2 = vpack.c.bf16 %v273_v59, %v272_v58  ;;  %v270_v6 = vld [vmem:[%s1255_s1 + $0x10] sm:$0xff] }
  0x1a   : > { %491 = vmatpush.bf16.msra.mxu0 %v416_v42  ;;  %v320_v0 = vld [vmem:[%s1255_s1 + $0x1a0] sm:$0xff]  ;;  %v321_v1 = vld [vmem:[%s1255_s1 + $0x1a8] sm:$0xff]  ;;  %v430_v5 = vpack.c.bf16 %v305_v62, %v304_v61  ;;  %v271_v7 = vld [vmem:[%s1255_s1 + $0x18] sm:$0xff] }
  0x1b   : > { %517 = vmatpush.bf16.msra.mxu2 %v432_v45  ;;  %v288_v3 = vld [vmem:[%s1255_s1 + $0xa0] sm:$0xff]  ;;  %v289_v4 = vld [vmem:[%s1255_s1 + $0xa8] sm:$0xff]  ;;  %v438_v8 = vpack.c.bf16 %v321_v1, %v320_v0  ;;  %v302_v9 = vld [vmem:[%s1255_s1 + $0x110] sm:$0xff]  ;;  %v413_v15 = vpack.c.bf16 %v271_v7, %v270_v6 }
  0x1c   : > { %530 = vmatpush.bf16.msra.mxu3 %v440_v48  ;;  %v303_v10 = vld [vmem:[%s1255_s1 + $0x118] sm:$0xff]  ;;  %v422_v11 = vpack.c.bf16 %v289_v4, %v288_v3  ;;  %v268_v12 = vld [vmem:[%s1255_s1] sm:$0xff]  ;;  %v318_v13 = vld [vmem:[%s1255_s1 + $0x190] sm:$0xff] }
  0x1d   : > { %504 = vmatpush.bf16.msra.mxu1 %v424_v51  ;;  %v319_v14 = vld [vmem:[%s1255_s1 + $0x198] sm:$0xff]  ;;  %v269_v16 = vld [vmem:[%s1255_s1 + $0x8] sm:$0xff]  ;;  %v286_v17 = vld [vmem:[%s1255_s1 + $0x90] sm:$0xff]  ;;  %v429_v19 = vpack.c.bf16 %v303_v10, %v302_v9 }
  0x1e   : > { %492 = vmatpush.bf16.msra.mxu0 %v415_v54  ;;  %v287_v18 = vld [vmem:[%s1255_s1 + $0x98] sm:$0xff]  ;;  %v346_v20 = vld [vmem:[%s1255_s1 + $0x270] sm:$0xff]  ;;  %v300_v22 = vld [vmem:[%s1255_s1 + $0x100] sm:$0xff]  ;;  %v437_v23 = vpack.c.bf16 %v319_v14, %v318_v13  ;;  %v412_v31 = vpack.c.bf16 %v269_v16, %v268_v12 }
  0x1f   : > { %518 = vmatpush.bf16.msra.mxu2 %v431_v57  ;;  %v347_v21 = vld [vmem:[%s1255_s1 + $0x278] sm:$0xff]  ;;  %v301_v24 = vld [vmem:[%s1255_s1 + $0x108] sm:$0xff]  ;;  %v378_v25 = vld [vmem:[%s1255_s1 + $0x370] sm:$0xff]  ;;  %v421_v27 = vpack.c.bf16 %v287_v18, %v286_v17 }
  0x20   : > { %531 = vmatpush.bf16.msra.mxu3 %v439_v60  ;;  %v379_v26 = vld [vmem:[%s1255_s1 + $0x378] sm:$0xff]  ;;  %v316_v28 = vld [vmem:[%s1255_s1 + $0x180] sm:$0xff]  ;;  %v317_v29 = vld [vmem:[%s1255_s1 + $0x188] sm:$0xff]  ;;  %v451_v35 = vpack.c.bf16 %v347_v21, %v346_v20  ;;  %v428_v36 = vpack.c.bf16 %v301_v24, %v300_v22 }
  0x21   : > { %505 = vmatpush.bf16.msra.mxu1 %v423_v63  ;;  %v394_v30 = vld [vmem:[%s1255_s1 + $0x3f0] sm:$0xff]  ;;  %v395_v32 = vld [vmem:[%s1255_s1 + $0x3f8] sm:$0xff]  ;;  %v284_v33 = vld [vmem:[%s1255_s1 + $0x80] sm:$0xff]  ;;  %v467_v39 = vpack.c.bf16 %v379_v26, %v378_v25  ;;  %v436_v40 = vpack.c.bf16 %v317_v29, %v316_v28 }
  0x22   : > { %493 = vmatpush.bf16.msra.mxu0 %v414_v2  ;;  %v285_v34 = vld [vmem:[%s1255_s1 + $0x88] sm:$0xff]  ;;  %v362_v37 = vld [vmem:[%s1255_s1 + $0x2f0] sm:$0xff]  ;;  %v363_v38 = vld [vmem:[%s1255_s1 + $0x2f8] sm:$0xff]  ;;  %v475_v43 = vpack.c.bf16 %v395_v32, %v394_v30 }
  0x23   : > { %519 = vmatpush.bf16.msra.mxu2 %v430_v5  ;;  %v344_v41 = vld [vmem:[%s1255_s1 + $0x260] sm:$0xff]  ;;  %v345_v42 = vld [vmem:[%s1255_s1 + $0x268] sm:$0xff]  ;;  %v420_v44 = vpack.c.bf16 %v285_v34, %v284_v33  ;;  %v459_v47 = vpack.c.bf16 %v363_v38, %v362_v37  ;;  %v342_v55 = vld [vmem:[%s1255_s1 + $0x250] sm:$0xff] }
  0x24   : > { %532 = vmatpush.bf16.msra.mxu3 %v438_v8  ;;  %v376_v45 = vld [vmem:[%s1255_s1 + $0x360] sm:$0xff]  ;;  %v377_v46 = vld [vmem:[%s1255_s1 + $0x368] sm:$0xff]  ;;  %v450_v50 = vpack.c.bf16 %v345_v42, %v344_v41  ;;  %v343_v56 = vld [vmem:[%s1255_s1 + $0x258] sm:$0xff] }
  0x25   : > { %506 = vmatpush.bf16.msra.mxu1 %v422_v11  ;;  %v392_v48 = vld [vmem:[%s1255_s1 + $0x3e0] sm:$0xff]  ;;  %v393_v49 = vld [vmem:[%s1255_s1 + $0x3e8] sm:$0xff]  ;;  %v466_v54 = vpack.c.bf16 %v377_v46, %v376_v45  ;;  %v374_v59 = vld [vmem:[%s1255_s1 + $0x350] sm:$0xff]  ;;  %v449_v0 = vpack.c.bf16 %v343_v56, %v342_v55 }
  0x26   : > { %494 = vmatpush.bf16.msra.mxu0 %v413_v15  ;;  %v360_v51 = vld [vmem:[%s1255_s1 + $0x2e0] sm:$0xff]  ;;  %v361_v52 = vld [vmem:[%s1255_s1 + $0x2e8] sm:$0xff]  ;;  %v474_v58 = vpack.c.bf16 %v393_v49, %v392_v48  ;;  %v375_v60 = vld [vmem:[%s1255_s1 + $0x358] sm:$0xff] }
  0x27   : > { %520 = vmatpush.bf16.msra.mxu2 %v429_v19  ;;  %v224_v53 = vld [vmem:[%s1019_s10 + $0x8] sm:$0xff]  ;;  %v223_v57 = vld [vmem:[%s1019_s10] sm:$0xff]  ;;  %v458_v61 = vpack.c.bf16 %v361_v52, %v360_v51  ;;  %v390_v62 = vld [vmem:[%s1255_s1 + $0x3d0] sm:$0xff]  ;;  %v465_v3 = vpack.c.bf16 %v375_v60, %v374_v59 }
  0x28   : > { %533 = vmatpush.bf16.msra.mxu3 %v437_v23  ;;  %235 = vst [vmem:[#allocation1 + $0x10] ss:$2 sm:$0xff] %v224_v53  ;;  %v391_v63 = vld [vmem:[%s1255_s1 + $0x3d8] sm:$0xff]  ;;  %v358_v1 = vld [vmem:[%s1255_s1 + $0x2d0] sm:$0xff]  ;;  %v340_v4 = vld [vmem:[%s1255_s1 + $0x240] sm:$0xff] }
  0x29   : > { %507 = vmatpush.bf16.msra.mxu1 %v421_v27  ;;  %233 = vst [vmem:[#allocation1] ss:$2 sm:$0xff] %v223_v57  ;;  %v359_v2 = vld [vmem:[%s1255_s1 + $0x2d8] sm:$0xff]  ;;  %v341_v5 = vld [vmem:[%s1255_s1 + $0x248] sm:$0xff]  ;;  %v372_v6 = vld [vmem:[%s1255_s1 + $0x340] sm:$0xff]  ;;  %v473_v7 = vpack.c.bf16 %v391_v63, %v390_v62 }
  0x2a   : > { %495 = vmatpush.bf16.msra.mxu0 %v412_v31  ;;  %v373_v8 = vld [vmem:[%s1255_s1 + $0x348] sm:$0xff]  ;;  %v388_v9 = vld [vmem:[%s1255_s1 + $0x3c0] sm:$0xff]  ;;  %v457_v11 = vpack.c.bf16 %v359_v2, %v358_v1  ;;  %v338_v12 = vld [vmem:[%s1255_s1 + $0x230] sm:$0xff]  ;;  %v448_v17 = vpack.c.bf16 %v341_v5, %v340_v4 }
  0x2b   : > { %521 = vmatpush.bf16.msra.mxu2 %v428_v36  ;;  %v389_v10 = vld [vmem:[%s1255_s1 + $0x3c8] sm:$0xff]  ;;  %v339_v13 = vld [vmem:[%s1255_s1 + $0x238] sm:$0xff]  ;;  %v356_v14 = vld [vmem:[%s1255_s1 + $0x2c0] sm:$0xff]  ;;  %v464_v20 = vpack.c.bf16 %v373_v8, %v372_v6 }
  0x2c   : > { %534 = vmatpush.bf16.msra.mxu3 %v436_v40  ;;  %v357_v15 = vld [vmem:[%s1255_s1 + $0x2c8] sm:$0xff]  ;;  %v227_v16 = vld [vmem:[%s1019_s10 + $0x20] sm:$0xf]  ;;  %v472_v25 = vpack.c.bf16 %v389_v10, %v388_v9  ;;  %v370_v26 = vld [vmem:[%s1255_s1 + $0x330] sm:$0xff]  ;;  %v447_v33 = vpack.c.bf16 %v339_v13, %v338_v12 }
  0x2d   : > { %508 = vmatpush.bf16.msra.mxu1 %v420_v44  ;;  %v371_v27 = vld [vmem:[%s1255_s1 + $0x338] sm:$0xff]  ;;  %v456_v30 = vpack.c.bf16 %v357_v15, %v356_v14  ;;  %v386_v31 = vld [vmem:[%s1255_s1 + $0x3b0] sm:$0xff]  ;;  %v336_v37 = vld [vmem:[%s1255_s1 + $0x220] sm:$0xff] }
  0x2e   : > { %540 = vmatpush.bf16.msrb.mxu0 %v451_v35  ;;  %v387_v32 = vld [vmem:[%s1255_s1 + $0x3b8] sm:$0xff]  ;;  %v354_v34 = vld [vmem:[%s1255_s1 + $0x2b0] sm:$0xff]  ;;  %v463_v36 = vpack.c.bf16 %v371_v27, %v370_v26  ;;  %v337_v38 = vld [vmem:[%s1255_s1 + $0x228] sm:$0xff] }
  0x2f   : > { %566 = vmatpush.bf16.msrb.mxu2 %v467_v39  ;;  %v242_v18 = vld.sshfl [vmem:[#allocation1 + $0x10] sm:$0xff pattern:$0x75316420]  ;;  %v243_v19 = vld.sshfl [vmem:[#allocation1 + $0x18] sm:$0xff pattern:$0x75316420]  ;;  %v471_v39 = vpack.c.bf16 %v387_v32, %v386_v31 }
  0x30   : > { %579 = vmatpush.bf16.msrb.mxu3 %v475_v43  ;;  %v261_v21 = vpack.c.bf16 %v242_v18, %v242_v18  ;;  %v240_v22 = vld.sshfl [vmem:[#allocation1] sm:$0xff pattern:$0x75316420]  ;;  %v262_v23 = vpack.c.bf16 %v243_v19, %v243_v19  ;;  %v241_v24 = vld.sshfl [vmem:[#allocation1 + $0x8] sm:$0xff pattern:$0x75316420] }
  0x31   : > { %553 = vmatpush.bf16.msrb.mxu1 %v459_v47  ;;  %v259_v28 = vpack.c.bf16 %v240_v22, %v240_v22  ;;  %248 = vst [vmem:[#allocation1] ss:$2 sm:$0xff] %v227_v16  ;;  %v260_v29 = vpack.c.bf16 %v241_v24, %v241_v24  ;;  %v355_v35 = vld [vmem:[%s1255_s1 + $0x2b8] sm:$0xff]  ;;  %v368_v40 = vld [vmem:[%s1255_s1 + $0x320] sm:$0xff]  ;;  %v369_v41 = vld [vmem:[%s1255_s1 + $0x328] sm:$0xff]  ;;  %v446_v47 = vpack.c.bf16 %v337_v38, %v336_v37 }
  0x32   : > { %541 = vmatpush.bf16.msrb.mxu0 %v450_v50  ;;  %522 = vmatmul.bf16.vlgmr.msra.gmra.mxu2 %v261_v21  ;;  %v226_v42 = vld [vmem:[%s1019_s10 + $0x18] sm:$0xff]  ;;  %v455_v43 = vpack.c.bf16 %v355_v35, %v354_v34  ;;  %v384_v44 = vld [vmem:[%s1255_s1 + $0x3a0] sm:$0xff]  ;;  %v385_v45 = vld [vmem:[%s1255_s1 + $0x3a8] sm:$0xff]  ;;  %v462_v50 = vpack.c.bf16 %v369_v41, %v368_v40 }
  0x33   : > { %567 = vmatpush.bf16.msrb.mxu2 %v466_v54  ;;  %535 = vmatmul.bf16.vlgmr.msra.gmra.mxu3 %v262_v23  ;;  %239 = vst [vmem:[#allocation1 + $0x30] ss:$2 sm:$0xff] %v226_v42  ;;  %v225_v46 = vld [vmem:[%s1019_s10 + $0x10] sm:$0xff]  ;;  %v352_v48 = vld [vmem:[%s1255_s1 + $0x2a0] sm:$0xff]  ;;  %v353_v49 = vld [vmem:[%s1255_s1 + $0x2a8] sm:$0xff]  ;;  %v470_v53 = vpack.c.bf16 %v385_v45, %v384_v44  ;;  %s222_s10 = scalar_lea.vmem %s1259_s5, %s716_s23 }
  0x34   : > { %580 = vmatpush.bf16.msrb.mxu3 %v474_v58  ;;  %496 = vmatmul.bf16.vlgmr.msra.gmra.mxu0 %v259_v28  ;;  %237 = vst [vmem:[#allocation1 + $0x20] ss:$2 sm:$0xff] %v225_v46  ;;  %v334_v51 = vld [vmem:[%s1255_s1 + $0x210] sm:$0xff]  ;;  %v335_v52 = vld [vmem:[%s1255_s1 + $0x218] sm:$0xff]  ;;  %v454_v56 = vpack.c.bf16 %v353_v49, %v352_v48  ;;  %v332_v63 = vld [vmem:[%s1255_s1 + $0x200] sm:$0xff] }
  0x35   : > { %554 = vmatpush.bf16.msrb.mxu1 %v458_v61  ;;  %v366_v54 = vld [vmem:[%s1255_s1 + $0x310] sm:$0xff]  ;;  %v367_v55 = vld [vmem:[%s1255_s1 + $0x318] sm:$0xff]  ;;  %v445_v59 = vpack.c.bf16 %v335_v52, %v334_v51  ;;  %v364_v4 = vld [vmem:[%s1255_s1 + $0x300] sm:$0xff] }
  0x36   : > { %542 = vmatpush.bf16.msrb.mxu0 %v449_v0  ;;  %509 = vmatmul.bf16.vlgmr.msra.gmra.mxu1 %v260_v29  ;;  %v382_v57 = vld [vmem:[%s1255_s1 + $0x390] sm:$0xff]  ;;  %v383_v58 = vld [vmem:[%s1255_s1 + $0x398] sm:$0xff]  ;;  %v461_v62 = vpack.c.bf16 %v367_v55, %v366_v54  ;;  %v333_v0 = vld [vmem:[%s1255_s1 + $0x208] sm:$0xff] }
  0x37   : > { %568 = vmatpush.bf16.msrb.mxu2 %v465_v3  ;;  %v350_v60 = vld [vmem:[%s1255_s1 + $0x290] sm:$0xff]  ;;  %v351_v61 = vld [vmem:[%s1255_s1 + $0x298] sm:$0xff]  ;;  %v469_v2 = vpack.c.bf16 %v383_v58, %v382_v57  ;;  %v365_v5 = vld [vmem:[%s1255_s1 + $0x308] sm:$0xff]  ;;  %v444_v9 = vpack.c.bf16 %v333_v0, %v332_v63 }
  0x38   : > { %581 = vmatpush.bf16.msrb.mxu3 %v473_v7  ;;  %v410_v1 = vld [vmem:[%s1255_s1 + $0x470] sm:$0xff]  ;;  %v411_v3 = vld [vmem:[%s1255_s1 + $0x478] sm:$0xff]  ;;  %v453_v6 = vpack.c.bf16 %v351_v61, %v350_v60  ;;  %v380_v7 = vld [vmem:[%s1255_s1 + $0x380] sm:$0xff]  ;;  %v460_v14 = vpack.c.bf16 %v365_v5, %v364_v4  ;;  %v742_v5 = vmov 4.0  }
  0x39   : > { %555 = vmatpush.bf16.msrb.mxu1 %v457_v11  ;;  %v381_v8 = vld [vmem:[%s1255_s1 + $0x388] sm:$0xff]  ;;  %v348_v10 = vld [vmem:[%s1255_s1 + $0x280] sm:$0xff]  ;;  %v483_v13 = vpack.c.bf16 %v411_v3, %v410_v1  ;;  %v406_v26 = vld [vmem:[%s1255_s1 + $0x450] sm:$0xff]  ;;  %730 = vrcp.f32 %v742_v5 }
  0x3a   : > { %543 = vmatpush.bf16.msrb.mxu0 %v448_v17  ;;  %v349_v11 = vld [vmem:[%s1255_s1 + $0x288] sm:$0xff]  ;;  %v246_v15 = vld.sshfl [vmem:[#allocation1 + $0x30] sm:$0xff pattern:$0x75316420]  ;;  %v468_v16 = vpack.c.bf16 %v381_v8, %v380_v7  ;;  %v408_v17 = vld [vmem:[%s1255_s1 + $0x460] sm:$0xff] }
  0x3b   : > { %569 = vmatpush.bf16.msrb.mxu2 %v464_v20  ;;  %v244_v12 = vld.sshfl [vmem:[#allocation1 + $0x20] sm:$0xff pattern:$0x75316420]  ;;  %v409_v18 = vld [vmem:[%s1255_s1 + $0x468] sm:$0xff]  ;;  %v452_v20 = vpack.c.bf16 %v349_v11, %v348_v10  ;;  %v265_v23 = vpack.c.bf16 %v246_v15, %v246_v15  ;;  %v407_v27 = vld [vmem:[%s1255_s1 + $0x458] sm:$0xff] }
  0x3c   : > { %582 = vmatpush.bf16.msrb.mxu3 %v472_v25  ;;  %v247_v19 = vld.sshfl [vmem:[#allocation1 + $0x38] sm:$0xff pattern:$0x75316420]  ;;  %v263_v21 = vpack.c.bf16 %v244_v12, %v244_v12  ;;  %v245_v22 = vld.sshfl [vmem:[#allocation1 + $0x28] sm:$0xff pattern:$0x75316420]  ;;  %v482_v24 = vpack.c.bf16 %v409_v18, %v408_v17  ;;  %v481_v29 = vpack.c.bf16 %v407_v27, %v406_v26 }
  0x3d   : > { %556 = vmatpush.bf16.msrb.mxu1 %v456_v30  ;;  %v266_v25 = vpack.c.bf16 %v247_v19, %v247_v19  ;;  %v264_v28 = vpack.c.bf16 %v245_v22, %v245_v22  ;;  %v404_v30 = vld [vmem:[%s1255_s1 + $0x440] sm:$0xff]  ;;  %v405_v31 = vld [vmem:[%s1255_s1 + $0x448] sm:$0xff]  ;;  %v403_v34 = vld [vmem:[%s1255_s1 + $0x438] sm:$0xff] }
  0x3e   : > { %544 = vmatpush.bf16.msrb.mxu0 %v447_v33  ;;  %v480_v32 = vpack.c.bf16 %v405_v31, %v404_v30  ;;  %v402_v33 = vld [vmem:[%s1255_s1 + $0x430] sm:$0xff]  ;;  %v401_v37 = vld [vmem:[%s1255_s1 + $0x428] sm:$0xff]  ;;  %v399_v40 = vld [vmem:[%s1255_s1 + $0x418] sm:$0xff] }
  0x3f   : > { %570 = vmatpush.bf16.msrb.mxu2 %v463_v36  ;;  %v479_v35 = vpack.c.bf16 %v403_v34, %v402_v33  ;;  %v400_v36 = vld [vmem:[%s1255_s1 + $0x420] sm:$0xff]  ;;  %v731_v7 = vpop.eup %730 }
  0x40   : > { %583 = vmatpush.bf16.msrb.mxu3 %v471_v39  ;;  %v478_v38 = vpack.c.bf16 %v401_v37, %v400_v36  ;;  %v398_v39 = vld [vmem:[%s1255_s1 + $0x410] sm:$0xff]  ;;  %v396_v42 = vld [vmem:[%s1255_s1 + $0x400] sm:$0xff]  ;;  %vm620_vm1 = vweird.f32 %v731_v7 }
  0x41   : > { %557 = vmatpush.bf16.msrb.mxu1 %v455_v43  ;;  %v477_v41 = vpack.c.bf16 %v399_v40, %v398_v39  ;;  %v397_v43 = vld [vmem:[%s1255_s1 + $0x408] sm:$0xff]  ;;  %v249_v45 = vld.sshfl [vmem:[#allocation1] sm:$0xff pattern:$0x75316420] }
  0x42   : > { %545 = vmatpush.bf16.msrb.mxu0 %v446_v47  ;;  %v476_v44 = vpack.c.bf16 %v397_v43, %v396_v42  ;;  %v267_v46 = vpack.c.bf16 %v249_v45, %v249_v45  ;;  %v729_v55 = vld [vmem:[%s1256_s2] ss:$0 sm:$0xff] }
  0x43   : > { %571 = vmatpush.bf16.msrb.mxu2 %v462_v50  ;;  %v605_v42 = vld [vmem:[%s1257_s3] sm:$0x1] }
  0x44   : > { %584 = vmatpush.bf16.msrb.mxu3 %v470_v53 }
  0x45   : > { %558 = vmatpush.bf16.msrb.mxu1 %v454_v56 }
  0x46   : > { %546 = vmatpush.bf16.msrb.mxu0 %v445_v59 }
  0x47   : > { %572 = vmatpush.bf16.msrb.mxu2 %v461_v62 }
  0x48   : > { %585 = vmatpush.bf16.msrb.mxu3 %v469_v2 }
  0x49   : > { %559 = vmatpush.bf16.msrb.mxu1 %v453_v6 }
  0x4a   : > { %547 = vmatpush.bf16.msrb.mxu0 %v444_v9  ;;  %v616_v9 = vmul.f32 4.0, %v731_v7 }
  0x4b   : > { %573 = vmatpush.bf16.msrb.mxu2 %v460_v14 }
  0x4c   : > { %586 = vmatpush.bf16.msrb.mxu3 %v468_v16 }
  0x4d   : > { %560 = vmatpush.bf16.msrb.mxu1 %v452_v20  ;;  %548 = vmatmul.bf16.vlgmr.msrb.gmra.mxu0 %v263_v21 }
  0x4e   : > { %592 = vmatpush.bf16.msra.mxu0 %v483_v13  ;;  %574 = vmatmul.bf16.vlgmr.msrb.gmra.mxu2 %v265_v23  ;;  %v617_v13 = vsub.f32 1.0, %v616_v9 }
  0x4f   : > { %587 = vmatmul.bf16.vlgmr.msrb.gmra.mxu3 %v266_v25 }
  0x50   : > { %561 = vmatmul.bf16.vlgmr.msrb.gmra.mxu1 %v264_v28  ;;  %v618_v16 = vmul.f32 %v731_v7, %v617_v13 }
  0x52   : > { %593 = vmatpush.bf16.msra.mxu0 %v482_v24  ;;  %v619_v20 = vadd.f32 %v731_v7, %v618_v16 }
  0x54   : > { %v621_v23 = vsel %vm620_vm1, %v731_v7, %v619_v20 }
  0x56   : > { %594 = vmatpush.bf16.msra.mxu0 %v481_v29 }
  0x5a   : > { %595 = vmatpush.bf16.msra.mxu0 %v480_v32 }
  0x5e   : > { %596 = vmatpush.bf16.msra.mxu0 %v479_v35 }
  0x62   : > { %597 = vmatpush.bf16.msra.mxu0 %v478_v38 }
  0x66   : > { %598 = vmatpush.bf16.msra.mxu0 %v477_v41 }
  0x6a   : > { %599 = vmatpush.bf16.msra.mxu0 %v476_v44 }
  0x6d   : > { %600 = vmatmul.bf16.vlgmr.msra.gmra.mxu0 %v267_v46  ;;  %v606_v46 = vld [vmem:[%s1258_s4] sm:$0x1] }
  0xb1   : > { %v497_v47 = vpop.f32.mrf.mxu0 }
  0xb2   : > { %v498_v56 = vadd.f32 %v729_v55, %v497_v47 }
  0xb3   : > { %v510_v48 = vpop.f32.mrf.mxu1 }
  0xb4   : > { %v511_v59 = vadd.f32 %v510_v48, %v498_v56 }
  0xb5   : > { %v523_v49 = vpop.f32.mrf.mxu2 }
  0xb6   : > { %v536_v50 = vpop.f32.mrf.mxu3  ;;  %v524_v61 = vadd.f32 %v523_v49, %v511_v59 }
  0xb8   : > { %v537_v1 = vadd.f32 %v536_v50, %v524_v61 }
  0xb9   : > { %v499_v51 = vpop.f32.mrf.mxu0 }
  0xbb   : > { %v512_v52 = vpop.f32.mrf.mxu1 }
  0xbd   : > { %v525_v53 = vpop.f32.mrf.mxu2 }
  0xbe   : > { %v538_v54 = vpop.f32.mrf.mxu3 }
  0xca   : > { %v549_v57 = vpop.f32.mrf.mxu0 }
  0xcb   : > { %v550_v3 = vadd.f32 %v549_v57, %v537_v1 }
  0xcd   : > { %v562_v58 = vpop.f32.mrf.mxu1 }
  0xce   : > { %v563_v6 = vadd.f32 %v562_v58, %v550_v3 }
  0xd1   : > { %v575_v60 = vpop.f32.mrf.mxu2 }
  0xd2   : > { %v588_v62 = vpop.f32.mrf.mxu3  ;;  %v551_v63 = vpop.f32.mrf.mxu0  ;;  %v576_v8 = vadd.f32 %v575_v60, %v563_v6 }
  0xd4   : > { %v589_v10 = vadd.f32 %v588_v62, %v576_v8 }
  0xd5   : > { %v564_v0 = vpop.f32.mrf.mxu1 }
  0xd9   : > { %v577_v2 = vpop.f32.mrf.mxu2 }
  0xda   : > { %v590_v4 = vpop.f32.mrf.mxu3 }
  0xea   : > { %v601_v11 = vpop.f32.mrf.mxu0 }
  0xeb   : > { %v602_v12 = vadd.f32 %v601_v11, %v589_v10 }
  0xed   : > { %v608_v14 = vsel %vm607_vm0, %v602_v12, 0.0 }
  0xee   : > { %v609_v15 = vrot.slane %v608_v14, 4 }
  0xf0   : > { %v610_v17 = vadd.f32 %v609_v15, %v608_v14 }
  0xf2   : > { %v611_v18 = vrot.slane %v610_v17, 2  ;;  %v603_v19 = vpop.f32.mrf.mxu0 }
  0xf4   : > { %v612_v21 = vadd.f32 %v611_v18, %v610_v17 }
  0xf6   : > { %v613_v22 = vrot.slane %v612_v21, 1 }
  0xf8   : > { %v614_v24 = vadd.f32 %v613_v22, %v612_v21 }
  0xfa   : > { %v622_v25 = vmul.f32 %v621_v23, %v614_v24 }
  0xfc   : > { %v623_v26 = vsub.f32 %v602_v12, %v622_v25 }
  0xfe   : > { %v624_v27 = vmul.f32 %v623_v26, %v623_v26 }
 0x100   : > { %v625_v28 = vsel %vm607_vm0, %v624_v27, 0.0 }
 0x101   : > { %v626_v29 = vrot.slane %v625_v28, 4 }
 0x103   : > { %v627_v30 = vadd.f32 %v626_v29, %v625_v28 }
 0x105   : > { %v628_v31 = vrot.slane %v627_v30, 2 }
 0x107   : > { %v629_v32 = vadd.f32 %v628_v31, %v627_v30 }
 0x109   : > { %v630_v33 = vrot.slane %v629_v32, 1 }
 0x10b   : > { %v631_v34 = vadd.f32 %v630_v33, %v629_v32 }
 0x10d   : > { %v632_v35 = vmul.f32 %v631_v34, %v621_v23 }
 0x10f   : > { %v633_v36 = vadd.f32 1e-05, %v632_v35 }
 0x111   : > { %732 = vrsqrt.f32 %v633_v36  ;;  %vm640_vm3 = vweird.f32 %v633_v36 }
 0x117   : > { %v733_v37 = vpop.eup %732 }
 0x118   : > { %v635_v38 = vmul.f32 %v733_v37, %v633_v36  ;;  %vm641_vm2 = vweird.f32 %v733_v37 }
 0x119   : > { %vm642_vm4 = vmor %vm640_vm3, %vm641_vm2 }
 0x11a   : > { %v636_v39 = vmul.f32 %v733_v37, %v635_v38 }
 0x11c   : > { %v637_v40 = vmul.f32 0.5, %v636_v39 }
 0x11e   : > { %v638_v41 = vsub.f32 1.5, %v637_v40 }
 0x120   : > { %v639_v43 = vmul.f32 %v733_v37, %v638_v41 }
 0x122   : > { %v643_v44 = vsel %vm642_vm4, %v733_v37, %v639_v43 }
 0x123   : > { %v644_v45 = vmul.f32 %v643_v44, %v605_v42 }
 0x125   : > { %v645_v47 = vmul.f32 %v644_v45, %v622_v25  ;;  %v648_v48 = vperm.slane %v644_v45, 0 }
 0x127   : > { %v646_v49 = vsub.f32 %v606_v46, %v645_v47  ;;  %v650_v50 = vmul.f32 %v648_v48, %v602_v12 }
 0x129   : > { %v652_v51 = vperm.slane %v646_v49, 0 }
 0x12b   : > { %v654_v52 = vadd.f32 %v652_v51, %v650_v50 }
 0x12d   : > { %v655_v53 = vmax.f32 %v654_v52, 0.0 }
 0x12f   : > { %656 = vst [vmem:[%s222_s10] sm:$0xf] %v655_v53 }
 0x130 PF: > { %s15_s18 = sadd.s32 1, %s740_s18  }
 0x131   : > { %p12_p4 = scmp.ge.s32.totalorder %s15_s18, 8  }
 0x133   :  { %14 = sbr.rel (!%p12_p4) target bundleno = 1 (0x1), region = 73 }

// kernel: _lambda_.14
= control target key start
LH: loop header
LB: loop body
LE: loop exit
PB: predicated region body
PF: predicated region fallthrough
CT: control target
= control target key end

     0   :  { %s835_s21 = smov 0   ;;  %s1321_s0 = inlined_call_operand.vmem [shape: f32[6,4,1152], index: 0, kind: input, shape index: {}]   ;;  %s1322_s1 = inlined_call_operand.vmem [shape: f32[1152,128], index: 1, kind: input, shape index: {}]   ;;  %s1323_s2 = inlined_call_operand.vmem [shape: f32[1,128], index: 2, kind: input, shape index: {}]   ;;  %s1324_s3 = inlined_call_operand.vmem [shape: f32[1,128], index: 3, kind: input, shape index: {}]   ;;  %s1325_s4 = inlined_call_operand.vmem [shape: f32[1,128], index: 4, kind: input, shape index: {}]   ;;  %s1326_s5 = inlined_call_operand.vmem [shape: f32[6,4,128], index: 5, kind: input, shape index: {}]   ;;  %s1327_s6 = inlined_call_operand.vmem [shape: f32[6,1,128], index: 6, kind: output, shape index: {}]  }
   0x1 LB: > { %s767_s22 = sadd.s32 4294967295, %s797_s21   ;;  %p771_p0 = scmp.ge.s32.totalorder %s797_s21, 1  ;;  %s797_s21 = sphi %s835_s21, %s16_s21  }
   0x2   : > { %p221_p1 = scmp.lt.s32.totalorder %s797_s21, 7 }
   0x4   : > { %p222_p2 = pnand %p771_p0, %p221_p1 }
   0x5   : > { %p977_p3 = scmp.lt.s32.totalorder (!%p222_p2), %s767_s22, 5 }
   0x6   : > { %225 = sbr.rel (%p222_p2) target bundleno = 319 (0x13f), region = 44 }
   0xb   : > { %v324_v0 = vld [vmem:[%s1322_s1 + $0x70] sm:$0xff]  ;;  %v325_v1 = vld [vmem:[%s1322_s1 + $0x78] sm:$0xff]  ;;  %v322_v5 = vld [vmem:[%s1322_s1 + $0x60] sm:$0xff]  ;;  %s1330_s22 = smov (!%p977_p3, %s767_s22), 5  ;;  %vm649_vm0 = vcmask 1043456  }
   0xc   : > { %v356_v2 = vld [vmem:[%s1322_s1 + $0x170] sm:$0xff]  ;;  %v461_v3 = vpack.c.bf16 %v325_v1, %v324_v0  ;;  %v357_v4 = vld [vmem:[%s1322_s1 + $0x178] sm:$0xff]  ;;  %v323_v6 = vld [vmem:[%s1322_s1 + $0x68] sm:$0xff]  ;;  %s776_s18 = smul.u32 36, %s1330_s22  ;;  %s264_s23 = scalar_lea.vmem %s1327_s6, %s1330_s22 }
   0xd   : > { %v477_v7 = vpack.c.bf16 %v357_v4, %v356_v2  ;;  %v372_v8 = vld [vmem:[%s1322_s1 + $0x1f0] sm:$0xff]  ;;  %v373_v9 = vld [vmem:[%s1322_s1 + $0x1f8] sm:$0xff]  ;;  %v460_v11 = vpack.c.bf16 %v323_v6, %v322_v5  ;;  %v354_v14 = vld [vmem:[%s1322_s1 + $0x160] sm:$0xff] }
   0xe   : > { %v340_v10 = vld [vmem:[%s1322_s1 + $0xf0] sm:$0xff]  ;;  %530 = vmatpush.bf16.msra.mxu0 %v461_v3  ;;  %v485_v12 = vpack.c.bf16 %v373_v9, %v372_v8  ;;  %v341_v13 = vld [vmem:[%s1322_s1 + $0xf8] sm:$0xff]  ;;  %v355_v15 = vld [vmem:[%s1322_s1 + $0x168] sm:$0xff]  ;;  %s1081_s20 = scalar_lea.vmem %s1321_s0, %s776_s18 }
   0xf   : > { %556 = vmatpush.bf16.msra.mxu2 %v477_v7  ;;  %v469_v16 = vpack.c.bf16 %v341_v13, %v340_v10  ;;  %v476_v17 = vpack.c.bf16 %v355_v15, %v354_v14  ;;  %v320_v18 = vld [vmem:[%s1322_s1 + $0x50] sm:$0xff]  ;;  %v321_v19 = vld [vmem:[%s1322_s1 + $0x58] sm:$0xff]  ;;  %v370_v20 = vld [vmem:[%s1322_s1 + $0x1e0] sm:$0xff] }
  0x10   : > { %569 = vmatpush.bf16.msra.mxu3 %v485_v12  ;;  %v371_v21 = vld [vmem:[%s1322_s1 + $0x1e8] sm:$0xff]  ;;  %v338_v22 = vld [vmem:[%s1322_s1 + $0xe0] sm:$0xff]  ;;  %v352_v26 = vld [vmem:[%s1322_s1 + $0x150] sm:$0xff]  ;;  %v459_v28 = vpack.c.bf16 %v321_v19, %v320_v18 }
  0x11   : > { %v339_v23 = vld [vmem:[%s1322_s1 + $0xe8] sm:$0xff]  ;;  %543 = vmatpush.bf16.msra.mxu1 %v469_v16  ;;  %v484_v24 = vpack.c.bf16 %v371_v21, %v370_v20  ;;  %v353_v27 = vld [vmem:[%s1322_s1 + $0x158] sm:$0xff]  ;;  %v318_v29 = vld [vmem:[%s1322_s1 + $0x40] sm:$0xff] }
  0x12   : > { %v468_v25 = vpack.c.bf16 %v339_v23, %v338_v22  ;;  %531 = vmatpush.bf16.msra.mxu0 %v460_v11  ;;  %v368_v30 = vld [vmem:[%s1322_s1 + $0x1d0] sm:$0xff]  ;;  %v369_v31 = vld [vmem:[%s1322_s1 + $0x1d8] sm:$0xff]  ;;  %v475_v32 = vpack.c.bf16 %v353_v27, %v352_v26  ;;  %v319_v33 = vld [vmem:[%s1322_s1 + $0x48] sm:$0xff] }
  0x13   : > { %557 = vmatpush.bf16.msra.mxu2 %v476_v17  ;;  %v336_v34 = vld [vmem:[%s1322_s1 + $0xd0] sm:$0xff]  ;;  %v337_v35 = vld [vmem:[%s1322_s1 + $0xd8] sm:$0xff]  ;;  %v483_v36 = vpack.c.bf16 %v369_v31, %v368_v30  ;;  %v350_v37 = vld [vmem:[%s1322_s1 + $0x140] sm:$0xff]  ;;  %v458_v42 = vpack.c.bf16 %v319_v33, %v318_v29 }
  0x14   : > { %570 = vmatpush.bf16.msra.mxu3 %v484_v24  ;;  %v351_v38 = vld [vmem:[%s1322_s1 + $0x148] sm:$0xff]  ;;  %v467_v39 = vpack.c.bf16 %v337_v35, %v336_v34  ;;  %v366_v40 = vld [vmem:[%s1322_s1 + $0x1c0] sm:$0xff]  ;;  %v316_v46 = vld [vmem:[%s1322_s1 + $0x30] sm:$0xff] }
  0x15   : > { %544 = vmatpush.bf16.msra.mxu1 %v468_v25  ;;  %v367_v41 = vld [vmem:[%s1322_s1 + $0x1c8] sm:$0xff]  ;;  %v334_v43 = vld [vmem:[%s1322_s1 + $0xc0] sm:$0xff]  ;;  %v474_v45 = vpack.c.bf16 %v351_v38, %v350_v37  ;;  %v317_v47 = vld [vmem:[%s1322_s1 + $0x38] sm:$0xff] }
  0x16   : > { %532 = vmatpush.bf16.msra.mxu0 %v459_v28  ;;  %v335_v44 = vld [vmem:[%s1322_s1 + $0xc8] sm:$0xff]  ;;  %v482_v48 = vpack.c.bf16 %v367_v41, %v366_v40  ;;  %v348_v49 = vld [vmem:[%s1322_s1 + $0x130] sm:$0xff]  ;;  %v349_v50 = vld [vmem:[%s1322_s1 + $0x138] sm:$0xff]  ;;  %v457_v54 = vpack.c.bf16 %v317_v47, %v316_v46 }
  0x17   : > { %558 = vmatpush.bf16.msra.mxu2 %v475_v32  ;;  %v466_v51 = vpack.c.bf16 %v335_v44, %v334_v43  ;;  %v364_v52 = vld [vmem:[%s1322_s1 + $0x1b0] sm:$0xff]  ;;  %v365_v53 = vld [vmem:[%s1322_s1 + $0x1b8] sm:$0xff]  ;;  %v473_v57 = vpack.c.bf16 %v349_v50, %v348_v49  ;;  %v314_v58 = vld [vmem:[%s1322_s1 + $0x20] sm:$0xff] }
  0x18   : > { %571 = vmatpush.bf16.msra.mxu3 %v483_v36  ;;  %v332_v55 = vld [vmem:[%s1322_s1 + $0xb0] sm:$0xff]  ;;  %v333_v56 = vld [vmem:[%s1322_s1 + $0xb8] sm:$0xff]  ;;  %v315_v59 = vld [vmem:[%s1322_s1 + $0x28] sm:$0xff]  ;;  %v481_v60 = vpack.c.bf16 %v365_v53, %v364_v52 }
  0x19   : > { %545 = vmatpush.bf16.msra.mxu1 %v467_v39  ;;  %v346_v61 = vld [vmem:[%s1322_s1 + $0x120] sm:$0xff]  ;;  %v347_v62 = vld [vmem:[%s1322_s1 + $0x128] sm:$0xff]  ;;  %v465_v63 = vpack.c.bf16 %v333_v56, %v332_v55  ;;  %v456_v2 = vpack.c.bf16 %v315_v59, %v314_v58  ;;  %v312_v6 = vld [vmem:[%s1322_s1 + $0x10] sm:$0xff] }
  0x1a   : > { %533 = vmatpush.bf16.msra.mxu0 %v458_v42  ;;  %v362_v0 = vld [vmem:[%s1322_s1 + $0x1a0] sm:$0xff]  ;;  %v363_v1 = vld [vmem:[%s1322_s1 + $0x1a8] sm:$0xff]  ;;  %v472_v5 = vpack.c.bf16 %v347_v62, %v346_v61  ;;  %v313_v7 = vld [vmem:[%s1322_s1 + $0x18] sm:$0xff] }
  0x1b   : > { %559 = vmatpush.bf16.msra.mxu2 %v474_v45  ;;  %v330_v3 = vld [vmem:[%s1322_s1 + $0xa0] sm:$0xff]  ;;  %v331_v4 = vld [vmem:[%s1322_s1 + $0xa8] sm:$0xff]  ;;  %v480_v8 = vpack.c.bf16 %v363_v1, %v362_v0  ;;  %v344_v9 = vld [vmem:[%s1322_s1 + $0x110] sm:$0xff]  ;;  %v455_v15 = vpack.c.bf16 %v313_v7, %v312_v6 }
  0x1c   : > { %572 = vmatpush.bf16.msra.mxu3 %v482_v48  ;;  %v345_v10 = vld [vmem:[%s1322_s1 + $0x118] sm:$0xff]  ;;  %v464_v11 = vpack.c.bf16 %v331_v4, %v330_v3  ;;  %v310_v12 = vld [vmem:[%s1322_s1] sm:$0xff]  ;;  %v360_v13 = vld [vmem:[%s1322_s1 + $0x190] sm:$0xff] }
  0x1d   : > { %546 = vmatpush.bf16.msra.mxu1 %v466_v51  ;;  %v361_v14 = vld [vmem:[%s1322_s1 + $0x198] sm:$0xff]  ;;  %v311_v16 = vld [vmem:[%s1322_s1 + $0x8] sm:$0xff]  ;;  %v328_v17 = vld [vmem:[%s1322_s1 + $0x90] sm:$0xff]  ;;  %v471_v19 = vpack.c.bf16 %v345_v10, %v344_v9 }
  0x1e   : > { %534 = vmatpush.bf16.msra.mxu0 %v457_v54  ;;  %v329_v18 = vld [vmem:[%s1322_s1 + $0x98] sm:$0xff]  ;;  %v388_v20 = vld [vmem:[%s1322_s1 + $0x270] sm:$0xff]  ;;  %v342_v22 = vld [vmem:[%s1322_s1 + $0x100] sm:$0xff]  ;;  %v479_v23 = vpack.c.bf16 %v361_v14, %v360_v13  ;;  %v454_v31 = vpack.c.bf16 %v311_v16, %v310_v12 }
  0x1f   : > { %560 = vmatpush.bf16.msra.mxu2 %v473_v57  ;;  %v389_v21 = vld [vmem:[%s1322_s1 + $0x278] sm:$0xff]  ;;  %v343_v24 = vld [vmem:[%s1322_s1 + $0x108] sm:$0xff]  ;;  %v420_v25 = vld [vmem:[%s1322_s1 + $0x370] sm:$0xff]  ;;  %v463_v27 = vpack.c.bf16 %v329_v18, %v328_v17 }
  0x20   : > { %573 = vmatpush.bf16.msra.mxu3 %v481_v60  ;;  %v421_v26 = vld [vmem:[%s1322_s1 + $0x378] sm:$0xff]  ;;  %v358_v28 = vld [vmem:[%s1322_s1 + $0x180] sm:$0xff]  ;;  %v359_v29 = vld [vmem:[%s1322_s1 + $0x188] sm:$0xff]  ;;  %v493_v35 = vpack.c.bf16 %v389_v21, %v388_v20  ;;  %v470_v36 = vpack.c.bf16 %v343_v24, %v342_v22 }
  0x21   : > { %547 = vmatpush.bf16.msra.mxu1 %v465_v63  ;;  %v436_v30 = vld [vmem:[%s1322_s1 + $0x3f0] sm:$0xff]  ;;  %v437_v32 = vld [vmem:[%s1322_s1 + $0x3f8] sm:$0xff]  ;;  %v326_v33 = vld [vmem:[%s1322_s1 + $0x80] sm:$0xff]  ;;  %v509_v39 = vpack.c.bf16 %v421_v26, %v420_v25  ;;  %v478_v40 = vpack.c.bf16 %v359_v29, %v358_v28 }
  0x22   : > { %535 = vmatpush.bf16.msra.mxu0 %v456_v2  ;;  %v327_v34 = vld [vmem:[%s1322_s1 + $0x88] sm:$0xff]  ;;  %v404_v37 = vld [vmem:[%s1322_s1 + $0x2f0] sm:$0xff]  ;;  %v405_v38 = vld [vmem:[%s1322_s1 + $0x2f8] sm:$0xff]  ;;  %v517_v43 = vpack.c.bf16 %v437_v32, %v436_v30 }
  0x23   : > { %561 = vmatpush.bf16.msra.mxu2 %v472_v5  ;;  %v386_v41 = vld [vmem:[%s1322_s1 + $0x260] sm:$0xff]  ;;  %v387_v42 = vld [vmem:[%s1322_s1 + $0x268] sm:$0xff]  ;;  %v462_v44 = vpack.c.bf16 %v327_v34, %v326_v33  ;;  %v501_v47 = vpack.c.bf16 %v405_v38, %v404_v37  ;;  %v384_v55 = vld [vmem:[%s1322_s1 + $0x250] sm:$0xff] }
  0x24   : > { %574 = vmatpush.bf16.msra.mxu3 %v480_v8  ;;  %v418_v45 = vld [vmem:[%s1322_s1 + $0x360] sm:$0xff]  ;;  %v419_v46 = vld [vmem:[%s1322_s1 + $0x368] sm:$0xff]  ;;  %v492_v50 = vpack.c.bf16 %v387_v42, %v386_v41  ;;  %v385_v56 = vld [vmem:[%s1322_s1 + $0x258] sm:$0xff] }
  0x25   : > { %548 = vmatpush.bf16.msra.mxu1 %v464_v11  ;;  %v434_v48 = vld [vmem:[%s1322_s1 + $0x3e0] sm:$0xff]  ;;  %v435_v49 = vld [vmem:[%s1322_s1 + $0x3e8] sm:$0xff]  ;;  %v508_v54 = vpack.c.bf16 %v419_v46, %v418_v45  ;;  %v416_v59 = vld [vmem:[%s1322_s1 + $0x350] sm:$0xff]  ;;  %v491_v0 = vpack.c.bf16 %v385_v56, %v384_v55 }
  0x26   : > { %536 = vmatpush.bf16.msra.mxu0 %v455_v15  ;;  %v402_v51 = vld [vmem:[%s1322_s1 + $0x2e0] sm:$0xff]  ;;  %v403_v52 = vld [vmem:[%s1322_s1 + $0x2e8] sm:$0xff]  ;;  %v516_v58 = vpack.c.bf16 %v435_v49, %v434_v48  ;;  %v417_v60 = vld [vmem:[%s1322_s1 + $0x358] sm:$0xff] }
  0x27   : > { %562 = vmatpush.bf16.msra.mxu2 %v471_v19  ;;  %v266_v53 = vld [vmem:[%s1081_s20 + $0x8] sm:$0xff]  ;;  %v265_v57 = vld [vmem:[%s1081_s20] sm:$0xff]  ;;  %v500_v61 = vpack.c.bf16 %v403_v52, %v402_v51  ;;  %v432_v62 = vld [vmem:[%s1322_s1 + $0x3d0] sm:$0xff]  ;;  %v507_v3 = vpack.c.bf16 %v417_v60, %v416_v59 }
  0x28   : > { %575 = vmatpush.bf16.msra.mxu3 %v479_v23  ;;  %277 = vst [vmem:[#allocation1 + $0x10] ss:$2 sm:$0xff] %v266_v53  ;;  %v433_v63 = vld [vmem:[%s1322_s1 + $0x3d8] sm:$0xff]  ;;  %v400_v1 = vld [vmem:[%s1322_s1 + $0x2d0] sm:$0xff]  ;;  %v382_v4 = vld [vmem:[%s1322_s1 + $0x240] sm:$0xff] }
  0x29   : > { %549 = vmatpush.bf16.msra.mxu1 %v463_v27  ;;  %275 = vst [vmem:[#allocation1] ss:$2 sm:$0xff] %v265_v57  ;;  %v401_v2 = vld [vmem:[%s1322_s1 + $0x2d8] sm:$0xff]  ;;  %v383_v5 = vld [vmem:[%s1322_s1 + $0x248] sm:$0xff]  ;;  %v414_v6 = vld [vmem:[%s1322_s1 + $0x340] sm:$0xff]  ;;  %v515_v7 = vpack.c.bf16 %v433_v63, %v432_v62 }
  0x2a   : > { %537 = vmatpush.bf16.msra.mxu0 %v454_v31  ;;  %v415_v8 = vld [vmem:[%s1322_s1 + $0x348] sm:$0xff]  ;;  %v430_v9 = vld [vmem:[%s1322_s1 + $0x3c0] sm:$0xff]  ;;  %v499_v11 = vpack.c.bf16 %v401_v2, %v400_v1  ;;  %v380_v12 = vld [vmem:[%s1322_s1 + $0x230] sm:$0xff]  ;;  %v490_v17 = vpack.c.bf16 %v383_v5, %v382_v4 }
  0x2b   : > { %563 = vmatpush.bf16.msra.mxu2 %v470_v36  ;;  %v431_v10 = vld [vmem:[%s1322_s1 + $0x3c8] sm:$0xff]  ;;  %v381_v13 = vld [vmem:[%s1322_s1 + $0x238] sm:$0xff]  ;;  %v398_v14 = vld [vmem:[%s1322_s1 + $0x2c0] sm:$0xff]  ;;  %v506_v20 = vpack.c.bf16 %v415_v8, %v414_v6 }
  0x2c   : > { %576 = vmatpush.bf16.msra.mxu3 %v478_v40  ;;  %v399_v15 = vld [vmem:[%s1322_s1 + $0x2c8] sm:$0xff]  ;;  %v269_v16 = vld [vmem:[%s1081_s20 + $0x20] sm:$0xf]  ;;  %v514_v25 = vpack.c.bf16 %v431_v10, %v430_v9  ;;  %v412_v26 = vld [vmem:[%s1322_s1 + $0x330] sm:$0xff]  ;;  %v489_v33 = vpack.c.bf16 %v381_v13, %v380_v12 }
  0x2d   : > { %550 = vmatpush.bf16.msra.mxu1 %v462_v44  ;;  %v413_v27 = vld [vmem:[%s1322_s1 + $0x338] sm:$0xff]  ;;  %v498_v30 = vpack.c.bf16 %v399_v15, %v398_v14  ;;  %v428_v31 = vld [vmem:[%s1322_s1 + $0x3b0] sm:$0xff]  ;;  %v378_v37 = vld [vmem:[%s1322_s1 + $0x220] sm:$0xff] }
  0x2e   : > { %582 = vmatpush.bf16.msrb.mxu0 %v493_v35  ;;  %v429_v32 = vld [vmem:[%s1322_s1 + $0x3b8] sm:$0xff]  ;;  %v396_v34 = vld [vmem:[%s1322_s1 + $0x2b0] sm:$0xff]  ;;  %v505_v36 = vpack.c.bf16 %v413_v27, %v412_v26  ;;  %v379_v38 = vld [vmem:[%s1322_s1 + $0x228] sm:$0xff] }
  0x2f   : > { %608 = vmatpush.bf16.msrb.mxu2 %v509_v39  ;;  %v284_v18 = vld.sshfl [vmem:[#allocation1 + $0x10] sm:$0xff pattern:$0x75316420]  ;;  %v285_v19 = vld.sshfl [vmem:[#allocation1 + $0x18] sm:$0xff pattern:$0x75316420]  ;;  %v513_v39 = vpack.c.bf16 %v429_v32, %v428_v31 }
  0x30   : > { %621 = vmatpush.bf16.msrb.mxu3 %v517_v43  ;;  %v303_v21 = vpack.c.bf16 %v284_v18, %v284_v18  ;;  %v282_v22 = vld.sshfl [vmem:[#allocation1] sm:$0xff pattern:$0x75316420]  ;;  %v304_v23 = vpack.c.bf16 %v285_v19, %v285_v19  ;;  %v283_v24 = vld.sshfl [vmem:[#allocation1 + $0x8] sm:$0xff pattern:$0x75316420] }
  0x31   : > { %595 = vmatpush.bf16.msrb.mxu1 %v501_v47  ;;  %v301_v28 = vpack.c.bf16 %v282_v22, %v282_v22  ;;  %290 = vst [vmem:[#allocation1] ss:$2 sm:$0xff] %v269_v16  ;;  %v302_v29 = vpack.c.bf16 %v283_v24, %v283_v24  ;;  %v397_v35 = vld [vmem:[%s1322_s1 + $0x2b8] sm:$0xff]  ;;  %v410_v40 = vld [vmem:[%s1322_s1 + $0x320] sm:$0xff]  ;;  %v411_v41 = vld [vmem:[%s1322_s1 + $0x328] sm:$0xff]  ;;  %v488_v47 = vpack.c.bf16 %v379_v38, %v378_v37 }
  0x32   : > { %583 = vmatpush.bf16.msrb.mxu0 %v492_v50  ;;  %564 = vmatmul.bf16.vlgmr.msra.gmra.mxu2 %v303_v21  ;;  %v268_v42 = vld [vmem:[%s1081_s20 + $0x18] sm:$0xff]  ;;  %v497_v43 = vpack.c.bf16 %v397_v35, %v396_v34  ;;  %v426_v44 = vld [vmem:[%s1322_s1 + $0x3a0] sm:$0xff]  ;;  %v427_v45 = vld [vmem:[%s1322_s1 + $0x3a8] sm:$0xff]  ;;  %v504_v50 = vpack.c.bf16 %v411_v41, %v410_v40 }
  0x33   : > { %609 = vmatpush.bf16.msrb.mxu2 %v508_v54  ;;  %577 = vmatmul.bf16.vlgmr.msra.gmra.mxu3 %v304_v23  ;;  %281 = vst [vmem:[#allocation1 + $0x30] ss:$2 sm:$0xff] %v268_v42  ;;  %v267_v46 = vld [vmem:[%s1081_s20 + $0x10] sm:$0xff]  ;;  %v394_v48 = vld [vmem:[%s1322_s1 + $0x2a0] sm:$0xff]  ;;  %v395_v49 = vld [vmem:[%s1322_s1 + $0x2a8] sm:$0xff]  ;;  %v512_v53 = vpack.c.bf16 %v427_v45, %v426_v44  ;;  %s773_s20 = sshll.u32 %s1330_s22, 2 }
  0x34   : > { %622 = vmatpush.bf16.msrb.mxu3 %v516_v58  ;;  %538 = vmatmul.bf16.vlgmr.msra.gmra.mxu0 %v301_v28  ;;  %279 = vst [vmem:[#allocation1 + $0x20] ss:$2 sm:$0xff] %v267_v46  ;;  %v376_v51 = vld [vmem:[%s1322_s1 + $0x210] sm:$0xff]  ;;  %v377_v52 = vld [vmem:[%s1322_s1 + $0x218] sm:$0xff]  ;;  %v496_v56 = vpack.c.bf16 %v395_v49, %v394_v48  ;;  %v374_v63 = vld [vmem:[%s1322_s1 + $0x200] sm:$0xff]  ;;  %s261_s17 = scalar_lea.vmem %s1326_s5, %s773_s20 }
  0x35   : > { %596 = vmatpush.bf16.msrb.mxu1 %v500_v61  ;;  %v408_v54 = vld [vmem:[%s1322_s1 + $0x310] sm:$0xff]  ;;  %v409_v55 = vld [vmem:[%s1322_s1 + $0x318] sm:$0xff]  ;;  %v487_v59 = vpack.c.bf16 %v377_v52, %v376_v51  ;;  %v406_v4 = vld [vmem:[%s1322_s1 + $0x300] sm:$0xff] }
  0x36   : > { %584 = vmatpush.bf16.msrb.mxu0 %v491_v0  ;;  %551 = vmatmul.bf16.vlgmr.msra.gmra.mxu1 %v302_v29  ;;  %v424_v57 = vld [vmem:[%s1322_s1 + $0x390] sm:$0xff]  ;;  %v425_v58 = vld [vmem:[%s1322_s1 + $0x398] sm:$0xff]  ;;  %v503_v62 = vpack.c.bf16 %v409_v55, %v408_v54  ;;  %v375_v0 = vld [vmem:[%s1322_s1 + $0x208] sm:$0xff] }
  0x37   : > { %610 = vmatpush.bf16.msrb.mxu2 %v507_v3  ;;  %v392_v60 = vld [vmem:[%s1322_s1 + $0x290] sm:$0xff]  ;;  %v393_v61 = vld [vmem:[%s1322_s1 + $0x298] sm:$0xff]  ;;  %v511_v2 = vpack.c.bf16 %v425_v58, %v424_v57  ;;  %v407_v5 = vld [vmem:[%s1322_s1 + $0x308] sm:$0xff]  ;;  %v486_v9 = vpack.c.bf16 %v375_v0, %v374_v63 }
  0x38   : > { %623 = vmatpush.bf16.msrb.mxu3 %v515_v7  ;;  %v452_v1 = vld [vmem:[%s1322_s1 + $0x470] sm:$0xff]  ;;  %v453_v3 = vld [vmem:[%s1322_s1 + $0x478] sm:$0xff]  ;;  %v495_v6 = vpack.c.bf16 %v393_v61, %v392_v60  ;;  %v422_v7 = vld [vmem:[%s1322_s1 + $0x380] sm:$0xff]  ;;  %v502_v14 = vpack.c.bf16 %v407_v5, %v406_v4  ;;  %v799_v5 = vmov 4.0  }
  0x39   : > { %597 = vmatpush.bf16.msrb.mxu1 %v499_v11  ;;  %v423_v8 = vld [vmem:[%s1322_s1 + $0x388] sm:$0xff]  ;;  %v390_v10 = vld [vmem:[%s1322_s1 + $0x280] sm:$0xff]  ;;  %v525_v13 = vpack.c.bf16 %v453_v3, %v452_v1  ;;  %v448_v26 = vld [vmem:[%s1322_s1 + $0x450] sm:$0xff]  ;;  %787 = vrcp.f32 %v799_v5 }
  0x3a   : > { %585 = vmatpush.bf16.msrb.mxu0 %v490_v17  ;;  %v391_v11 = vld [vmem:[%s1322_s1 + $0x288] sm:$0xff]  ;;  %v288_v15 = vld.sshfl [vmem:[#allocation1 + $0x30] sm:$0xff pattern:$0x75316420]  ;;  %v510_v16 = vpack.c.bf16 %v423_v8, %v422_v7  ;;  %v450_v17 = vld [vmem:[%s1322_s1 + $0x460] sm:$0xff] }
  0x3b   : > { %611 = vmatpush.bf16.msrb.mxu2 %v506_v20  ;;  %v286_v12 = vld.sshfl [vmem:[#allocation1 + $0x20] sm:$0xff pattern:$0x75316420]  ;;  %v451_v18 = vld [vmem:[%s1322_s1 + $0x468] sm:$0xff]  ;;  %v494_v20 = vpack.c.bf16 %v391_v11, %v390_v10  ;;  %v307_v23 = vpack.c.bf16 %v288_v15, %v288_v15  ;;  %v449_v27 = vld [vmem:[%s1322_s1 + $0x458] sm:$0xff] }
  0x3c   : > { %624 = vmatpush.bf16.msrb.mxu3 %v514_v25  ;;  %v289_v19 = vld.sshfl [vmem:[#allocation1 + $0x38] sm:$0xff pattern:$0x75316420]  ;;  %v305_v21 = vpack.c.bf16 %v286_v12, %v286_v12  ;;  %v287_v22 = vld.sshfl [vmem:[#allocation1 + $0x28] sm:$0xff pattern:$0x75316420]  ;;  %v524_v24 = vpack.c.bf16 %v451_v18, %v450_v17  ;;  %v523_v29 = vpack.c.bf16 %v449_v27, %v448_v26 }
  0x3d   : > { %598 = vmatpush.bf16.msrb.mxu1 %v498_v30  ;;  %v308_v25 = vpack.c.bf16 %v289_v19, %v289_v19  ;;  %v306_v28 = vpack.c.bf16 %v287_v22, %v287_v22  ;;  %v446_v30 = vld [vmem:[%s1322_s1 + $0x440] sm:$0xff]  ;;  %v447_v31 = vld [vmem:[%s1322_s1 + $0x448] sm:$0xff]  ;;  %v445_v34 = vld [vmem:[%s1322_s1 + $0x438] sm:$0xff] }
  0x3e   : > { %586 = vmatpush.bf16.msrb.mxu0 %v489_v33  ;;  %v522_v32 = vpack.c.bf16 %v447_v31, %v446_v30  ;;  %v444_v33 = vld [vmem:[%s1322_s1 + $0x430] sm:$0xff]  ;;  %v443_v37 = vld [vmem:[%s1322_s1 + $0x428] sm:$0xff]  ;;  %v441_v40 = vld [vmem:[%s1322_s1 + $0x418] sm:$0xff] }
  0x3f   : > { %612 = vmatpush.bf16.msrb.mxu2 %v505_v36  ;;  %v521_v35 = vpack.c.bf16 %v445_v34, %v444_v33  ;;  %v442_v36 = vld [vmem:[%s1322_s1 + $0x420] sm:$0xff]  ;;  %v788_v7 = vpop.eup %787 }
  0x40   : > { %625 = vmatpush.bf16.msrb.mxu3 %v513_v39  ;;  %v520_v38 = vpack.c.bf16 %v443_v37, %v442_v36  ;;  %v440_v39 = vld [vmem:[%s1322_s1 + $0x410] sm:$0xff]  ;;  %v438_v42 = vld [vmem:[%s1322_s1 + $0x400] sm:$0xff]  ;;  %vm662_vm1 = vweird.f32 %v788_v7 }
  0x41   : > { %599 = vmatpush.bf16.msrb.mxu1 %v497_v43  ;;  %v519_v41 = vpack.c.bf16 %v441_v40, %v440_v39  ;;  %v439_v43 = vld [vmem:[%s1322_s1 + $0x408] sm:$0xff]  ;;  %v291_v45 = vld.sshfl [vmem:[#allocation1] sm:$0xff pattern:$0x75316420] }
  0x42   : > { %587 = vmatpush.bf16.msrb.mxu0 %v488_v47  ;;  %v518_v44 = vpack.c.bf16 %v439_v43, %v438_v42  ;;  %v309_v46 = vpack.c.bf16 %v291_v45, %v291_v45  ;;  %v786_v55 = vld [vmem:[%s1323_s2] ss:$0 sm:$0xff] }
  0x43   : > { %613 = vmatpush.bf16.msrb.mxu2 %v504_v50  ;;  %v647_v42 = vld [vmem:[%s1324_s3] sm:$0x1] }
  0x44   : > { %626 = vmatpush.bf16.msrb.mxu3 %v512_v53 }
  0x45   : > { %600 = vmatpush.bf16.msrb.mxu1 %v496_v56 }
  0x46   : > { %588 = vmatpush.bf16.msrb.mxu0 %v487_v59 }
  0x47   : > { %614 = vmatpush.bf16.msrb.mxu2 %v503_v62 }
  0x48   : > { %627 = vmatpush.bf16.msrb.mxu3 %v511_v2 }
  0x49   : > { %601 = vmatpush.bf16.msrb.mxu1 %v495_v6 }
  0x4a   : > { %589 = vmatpush.bf16.msrb.mxu0 %v486_v9  ;;  %v658_v9 = vmul.f32 4.0, %v788_v7 }
  0x4b   : > { %615 = vmatpush.bf16.msrb.mxu2 %v502_v14 }
  0x4c   : > { %628 = vmatpush.bf16.msrb.mxu3 %v510_v16 }
  0x4d   : > { %602 = vmatpush.bf16.msrb.mxu1 %v494_v20  ;;  %590 = vmatmul.bf16.vlgmr.msrb.gmra.mxu0 %v305_v21 }
  0x4e   : > { %634 = vmatpush.bf16.msra.mxu0 %v525_v13  ;;  %616 = vmatmul.bf16.vlgmr.msrb.gmra.mxu2 %v307_v23  ;;  %v659_v13 = vsub.f32 1.0, %v658_v9 }
  0x4f   : > { %629 = vmatmul.bf16.vlgmr.msrb.gmra.mxu3 %v308_v25 }
  0x50   : > { %603 = vmatmul.bf16.vlgmr.msrb.gmra.mxu1 %v306_v28  ;;  %v660_v16 = vmul.f32 %v788_v7, %v659_v13 }
  0x52   : > { %635 = vmatpush.bf16.msra.mxu0 %v524_v24  ;;  %v661_v20 = vadd.f32 %v788_v7, %v660_v16 }
  0x54   : > { %v663_v23 = vsel %vm662_vm1, %v788_v7, %v661_v20 }
  0x56   : > { %636 = vmatpush.bf16.msra.mxu0 %v523_v29 }
  0x5a   : > { %637 = vmatpush.bf16.msra.mxu0 %v522_v32 }
  0x5e   : > { %638 = vmatpush.bf16.msra.mxu0 %v521_v35 }
  0x62   : > { %639 = vmatpush.bf16.msra.mxu0 %v520_v38 }
  0x66   : > { %640 = vmatpush.bf16.msra.mxu0 %v519_v41 }
  0x6a   : > { %641 = vmatpush.bf16.msra.mxu0 %v518_v44 }
  0x6d   : > { %642 = vmatmul.bf16.vlgmr.msra.gmra.mxu0 %v309_v46  ;;  %v648_v46 = vld [vmem:[%s1325_s4] sm:$0x1] }
  0xb1   : > { %v539_v47 = vpop.f32.mrf.mxu0 }
  0xb2   : > { %v540_v56 = vadd.f32 %v786_v55, %v539_v47 }
  0xb3   : > { %v552_v48 = vpop.f32.mrf.mxu1 }
  0xb4   : > { %v553_v59 = vadd.f32 %v552_v48, %v540_v56 }
  0xb5   : > { %v565_v49 = vpop.f32.mrf.mxu2 }
  0xb6   : > { %v578_v50 = vpop.f32.mrf.mxu3  ;;  %v566_v61 = vadd.f32 %v565_v49, %v553_v59 }
  0xb8   : > { %v579_v1 = vadd.f32 %v578_v50, %v566_v61 }
  0xb9   : > { %v541_v51 = vpop.f32.mrf.mxu0 }
  0xbb   : > { %v554_v52 = vpop.f32.mrf.mxu1 }
  0xbd   : > { %v567_v53 = vpop.f32.mrf.mxu2 }
  0xbe   : > { %v580_v54 = vpop.f32.mrf.mxu3  ;;  %v698_v53 = vld [vmem:[%s261_s17] sm:$0xf] }
  0xca   : > { %v591_v57 = vpop.f32.mrf.mxu0 }
  0xcb   : > { %v592_v3 = vadd.f32 %v591_v57, %v579_v1 }
  0xcd   : > { %v604_v58 = vpop.f32.mrf.mxu1 }
  0xce   : > { %v605_v6 = vadd.f32 %v604_v58, %v592_v3 }
  0xd1   : > { %v617_v60 = vpop.f32.mrf.mxu2 }
  0xd2   : > { %v630_v62 = vpop.f32.mrf.mxu3  ;;  %v593_v63 = vpop.f32.mrf.mxu0  ;;  %v618_v8 = vadd.f32 %v617_v60, %v605_v6 }
  0xd4   : > { %v631_v10 = vadd.f32 %v630_v62, %v618_v8 }
  0xd5   : > { %v606_v0 = vpop.f32.mrf.mxu1 }
  0xd9   : > { %v619_v2 = vpop.f32.mrf.mxu2 }
  0xda   : > { %v632_v4 = vpop.f32.mrf.mxu3 }
  0xea   : > { %v643_v11 = vpop.f32.mrf.mxu0 }
  0xeb   : > { %v644_v12 = vadd.f32 %v643_v11, %v631_v10 }
  0xed   : > { %v650_v14 = vsel %vm649_vm0, %v644_v12, 0.0 }
  0xee   : > { %v651_v15 = vrot.slane %v650_v14, 4 }
  0xf0   : > { %v652_v17 = vadd.f32 %v651_v15, %v650_v14 }
  0xf2   : > { %v653_v18 = vrot.slane %v652_v17, 2  ;;  %v645_v19 = vpop.f32.mrf.mxu0 }
  0xf4   : > { %v654_v21 = vadd.f32 %v653_v18, %v652_v17 }
  0xf6   : > { %v655_v22 = vrot.slane %v654_v21, 1 }
  0xf8   : > { %v656_v24 = vadd.f32 %v655_v22, %v654_v21 }
  0xfa   : > { %v664_v25 = vmul.f32 %v663_v23, %v656_v24 }
  0xfc   : > { %v665_v26 = vsub.f32 %v644_v12, %v664_v25 }
  0xfe   : > { %v666_v27 = vmul.f32 %v665_v26, %v665_v26 }
 0x100   : > { %v667_v28 = vsel %vm649_vm0, %v666_v27, 0.0 }
 0x101   : > { %v668_v29 = vrot.slane %v667_v28, 4 }
 0x103   : > { %v669_v30 = vadd.f32 %v668_v29, %v667_v28 }
 0x105   : > { %v670_v31 = vrot.slane %v669_v30, 2 }
 0x107   : > { %v671_v32 = vadd.f32 %v670_v31, %v669_v30 }
 0x109   : > { %v672_v33 = vrot.slane %v671_v32, 1 }
 0x10b   : > { %v673_v34 = vadd.f32 %v672_v33, %v671_v32 }
 0x10d   : > { %v674_v35 = vmul.f32 %v673_v34, %v663_v23 }
 0x10f   : > { %v675_v36 = vadd.f32 1e-05, %v674_v35 }
 0x111   : > { %789 = vrsqrt.f32 %v675_v36  ;;  %vm682_vm3 = vweird.f32 %v675_v36 }
 0x117   : > { %v790_v37 = vpop.eup %789 }
 0x118   : > { %v677_v38 = vmul.f32 %v790_v37, %v675_v36  ;;  %vm683_vm2 = vweird.f32 %v790_v37 }
 0x119   : > { %vm684_vm4 = vmor %vm682_vm3, %vm683_vm2 }
 0x11a   : > { %v678_v39 = vmul.f32 %v790_v37, %v677_v38 }
 0x11c   : > { %v679_v40 = vmul.f32 0.5, %v678_v39 }
 0x11e   : > { %v680_v41 = vsub.f32 1.5, %v679_v40 }
 0x120   : > { %v681_v43 = vmul.f32 %v790_v37, %v680_v41 }
 0x122   : > { %v685_v44 = vsel %vm684_vm4, %v790_v37, %v681_v43 }
 0x123   : > { %v686_v45 = vmul.f32 %v685_v44, %v647_v42 }
 0x125   : > { %v687_v47 = vmul.f32 %v686_v45, %v664_v25  ;;  %v690_v48 = vperm.slane %v686_v45, 0 }
 0x127   : > { %v688_v49 = vsub.f32 %v648_v46, %v687_v47  ;;  %v692_v50 = vmul.f32 %v690_v48, %v644_v12 }
 0x129   : > { %v694_v51 = vperm.slane %v688_v49, 0 }
 0x12b   : > { %v696_v52 = vadd.f32 %v694_v51, %v692_v50 }
 0x12d   : > { %v697_v54 = vmax.f32 %v696_v52, 0.0 }
 0x12f   : > { %v699_v55 = vadd.f32 %v698_v53, %v697_v54 }
 0x131   : > { %v700_v56 = vsel %vm649_vm0, %v699_v55, -inf }
 0x132   : > { %v701_v57 = vrot.slane %v700_v56, 4 }
 0x134   : > { %v702_v58 = vmax.f32 %v700_v56, %v701_v57 }
 0x136   : > { %v703_v59 = vrot.slane %v702_v58, 2 }
 0x138   : > { %v704_v60 = vmax.f32 %v702_v58, %v703_v59 }
 0x13a   : > { %v705_v61 = vrot.slane %v704_v60, 1 }
 0x13c   : > { %v706_v62 = vmax.f32 %v704_v60, %v705_v61 }
 0x13e   : > { %707 = vst [vmem:[%s264_s23] sm:$0x1] %v706_v62 }
 0x13f PF: > { %s16_s21 = sadd.s32 1, %s797_s21  }
 0x140   : > { %p13_p4 = scmp.ge.s32.totalorder %s16_s21, 8  }
 0x142   :  { %15 = sbr.rel (!%p13_p4) target bundleno = 1 (0x1), region = 80 }

// kernel: _lambda_.15
= control target key start
LH: loop header
LB: loop body
LE: loop exit
PB: predicated region body
PF: predicated region fallthrough
CT: control target
= control target key end

     0   :  { %vm473_vm0 = vcmask 1024   ;;  %s1145_s1 = inlined_call_operand.vmem [shape: f32[128,128], index: 1, kind: input, shape index: {}]   ;;  %s1146_s3 = inlined_call_operand.vmem [shape: f32[3,128,256], index: 3, kind: input, shape index: {}]   ;;  %s1147_s2 = inlined_call_operand.vmem [shape: f32[1,128], index: 2, kind: input, shape index: {}]   ;;  %s1148_s0 = inlined_call_operand.vmem [shape: f32[3,2,128], index: 0, kind: input, shape index: {}]   ;;  %s1149_s4 = inlined_call_operand.vmem [shape: f32[1,256], index: 4, kind: input, shape index: {}]   ;;  %s1150_s5 = inlined_call_operand.vmem [shape: f32[256,128], index: 5, kind: input, shape index: {}]   ;;  %s1151_s6 = inlined_call_operand.vmem [shape: f32[1,128], index: 6, kind: input, shape index: {}]   ;;  %s1152_s7 = inlined_call_operand.vmem [shape: f32[128,1], index: 7, kind: input, shape index: {}]   ;;  %s1153_s8 = inlined_call_operand.<no memory space> [shape: f32[1,1], index: 8, kind: input, shape index: {}]   ;;  %s1154_s9 = inlined_call_operand.vmem [shape: f32[2,1], index: 9, kind: output, shape index: {}]  }
   0x1   :  { %v48_v0 = vld [vmem:[%s1145_s1 + $0x70] sm:$0xff]  ;;  %v49_v1 = vld [vmem:[%s1145_s1 + $0x78] sm:$0xff]  ;;  %v46_v2 = vld [vmem:[%s1145_s1 + $0x60] sm:$0xff] }
   0x2   :  { %v607_v3 = vpack.c.bf16 %v49_v1, %v48_v0  ;;  %v47_v4 = vld [vmem:[%s1145_s1 + $0x68] sm:$0xff]  ;;  %v44_v6 = vld [vmem:[%s1145_s1 + $0x50] sm:$0xff]  ;;  %v45_v7 = vld [vmem:[%s1145_s1 + $0x58] sm:$0xff] }
   0x3   :  { %v614_v5 = vpack.c.bf16 %v47_v4, %v46_v2  ;;  %v42_v8 = vld [vmem:[%s1145_s1 + $0x40] sm:$0xff]  ;;  %v109_v10 = vld [vmem:[%s1146_s3 + $0xf0] sm:$0xff]  ;;  %v108_v11 = vld [vmem:[%s1146_s3 + $0xe8] sm:$0xff]  ;;  %v636_v12 = vpack.c.bf16 %v45_v7, %v44_v6 }
   0x4   :  { %65 = vmatpush.bf16.msra.mxu0 %v607_v3  ;;  %163 = vmatpush.bf16.msra.mxu3 %v607_v3  ;;  %v107_v9 = vld [vmem:[%s1146_s3 + $0xe0] sm:$0xff]  ;;  %v110_v14 = vld [vmem:[%s1146_s3 + $0xf8] sm:$0xff]  ;;  %v105_v16 = vld [vmem:[%s1146_s3 + $0xd0] sm:$0xff] }
   0x5   :  { %v125_v13 = vpack.c.bf16 %v109_v10, %v107_v9  ;;  %v103_v15 = vld [vmem:[%s1146_s3 + $0xc0] sm:$0xff]  ;;  %v43_v17 = vld [vmem:[%s1145_s1 + $0x48] sm:$0xff]  ;;  %v126_v18 = vpack.c.bf16 %v110_v14, %v108_v11  ;;  %v106_v20 = vld [vmem:[%s1146_s3 + $0xd8] sm:$0xff] }
   0x6   :  { %v104_v19 = vld [vmem:[%s1146_s3 + $0xc8] sm:$0xff]  ;;  %v123_v21 = vpack.c.bf16 %v105_v16, %v103_v15  ;;  %v99_v23 = vld [vmem:[%s1146_s3 + $0xa0] sm:$0xff]  ;;  %v101_v24 = vld [vmem:[%s1146_s3 + $0xb0] sm:$0xff]  ;;  %v664_v25 = vpack.c.bf16 %v43_v17, %v42_v8 }
   0x7   :  { %127 = vmatpush.bf16.msra.mxu1 %v125_v13  ;;  %140 = vmatpush.bf16.msra.mxu2 %v126_v18  ;;  %v124_v22 = vpack.c.bf16 %v106_v20, %v104_v19  ;;  %v100_v26 = vld [vmem:[%s1146_s3 + $0xa8] sm:$0xff]  ;;  %v102_v27 = vld [vmem:[%s1146_s3 + $0xb8] sm:$0xff]  ;;  %v40_v28 = vld [vmem:[%s1145_s1 + $0x30] sm:$0xff]  ;;  %v121_v30 = vpack.c.bf16 %v101_v24, %v99_v23 }
   0x8   :  { %66 = vmatpush.bf16.msra.mxu0 %v614_v5  ;;  %164 = vmatpush.bf16.msra.mxu3 %v614_v5  ;;  %v41_v29 = vld [vmem:[%s1145_s1 + $0x38] sm:$0xff]  ;;  %v122_v31 = vpack.c.bf16 %v102_v27, %v100_v26  ;;  %v95_v32 = vld [vmem:[%s1146_s3 + $0x80] sm:$0xff]  ;;  %v97_v33 = vld [vmem:[%s1146_s3 + $0x90] sm:$0xff] }
   0x9   :  { %v686_v34 = vpack.c.bf16 %v41_v29, %v40_v28  ;;  %v96_v35 = vld [vmem:[%s1146_s3 + $0x88] sm:$0xff]  ;;  %v98_v36 = vld [vmem:[%s1146_s3 + $0x98] sm:$0xff]  ;;  %v38_v37 = vld [vmem:[%s1145_s1 + $0x20] sm:$0xff]  ;;  %v119_v39 = vpack.c.bf16 %v97_v33, %v95_v32 }
   0xa   :  { %v39_v38 = vld [vmem:[%s1145_s1 + $0x28] sm:$0xff]  ;;  %v120_v40 = vpack.c.bf16 %v98_v36, %v96_v35  ;;  %v91_v41 = vld [vmem:[%s1146_s3 + $0x60] sm:$0xff]  ;;  %v93_v42 = vld [vmem:[%s1146_s3 + $0x70] sm:$0xff] }
   0xb   :  { %128 = vmatpush.bf16.msra.mxu1 %v123_v21  ;;  %141 = vmatpush.bf16.msra.mxu2 %v124_v22  ;;  %v708_v43 = vpack.c.bf16 %v39_v38, %v38_v37  ;;  %v92_v44 = vld [vmem:[%s1146_s3 + $0x68] sm:$0xff]  ;;  %v94_v45 = vld [vmem:[%s1146_s3 + $0x78] sm:$0xff]  ;;  %v36_v46 = vld [vmem:[%s1145_s1 + $0x10] sm:$0xff]  ;;  %v117_v48 = vpack.c.bf16 %v93_v42, %v91_v41 }
   0xc   :  { %67 = vmatpush.bf16.msra.mxu0 %v636_v12  ;;  %165 = vmatpush.bf16.msra.mxu3 %v636_v12  ;;  %v37_v47 = vld [vmem:[%s1145_s1 + $0x18] sm:$0xff]  ;;  %v118_v49 = vpack.c.bf16 %v94_v45, %v92_v44  ;;  %v87_v50 = vld [vmem:[%s1146_s3 + $0x40] sm:$0xff]  ;;  %v89_v51 = vld [vmem:[%s1146_s3 + $0x50] sm:$0xff] }
   0xd   :  { %v730_v52 = vpack.c.bf16 %v37_v47, %v36_v46  ;;  %v88_v53 = vld [vmem:[%s1146_s3 + $0x48] sm:$0xff]  ;;  %v90_v54 = vld [vmem:[%s1146_s3 + $0x58] sm:$0xff]  ;;  %v34_v55 = vld [vmem:[%s1145_s1] sm:$0xff]  ;;  %v115_v59 = vpack.c.bf16 %v89_v51, %v87_v50 }
   0xe   :  { %v35_v56 = vld [vmem:[%s1145_s1 + $0x8] sm:$0xff]  ;;  %v508_v57 = vld [vmem:[%s1146_s3 + $0x1e0] sm:$0xff]  ;;  %v510_v58 = vld [vmem:[%s1146_s3 + $0x1f0] sm:$0xff]  ;;  %v116_v60 = vpack.c.bf16 %v90_v54, %v88_v53 }
   0xf   :  { %129 = vmatpush.bf16.msra.mxu1 %v121_v30  ;;  %142 = vmatpush.bf16.msra.mxu2 %v122_v31  ;;  %v83_v61 = vld [vmem:[%s1146_s3 + $0x20] sm:$0xff]  ;;  %v85_v62 = vld [vmem:[%s1146_s3 + $0x30] sm:$0xff]  ;;  %v50_v63 = vpack.c.bf16 %v35_v56, %v34_v55  ;;  %v224_v2 = vpack.c.bf16 %v510_v58, %v508_v57  ;;  %v84_v4 = vld [vmem:[%s1146_s3 + $0x28] sm:$0xff] }
  0x10   :  { %68 = vmatpush.bf16.msra.mxu0 %v664_v25  ;;  %166 = vmatpush.bf16.msra.mxu3 %v664_v25  ;;  %v59_v0 = vld [vmem:[%s1148_s0] sm:$0x3]  ;;  %v479_v1 = vld [vmem:[%s1148_s0 + $0x2] sm:$0x3]  ;;  %v86_v6 = vld [vmem:[%s1146_s3 + $0x38] sm:$0xff]  ;;  %v113_v9 = vpack.c.bf16 %v85_v62, %v83_v61 }
  0x11   :  { %v504_v7 = vld [vmem:[%s1146_s3 + $0x1c0] sm:$0xff]  ;;  %v506_v8 = vld [vmem:[%s1146_s3 + $0x1d0] sm:$0xff]  ;;  %v60_v10 = vpack.c.bf16 %v59_v0, %v59_v0  ;;  %v162_v11 = vpack.c.bf16 %v479_v1, %v479_v1  ;;  %v114_v15 = vpack.c.bf16 %v86_v6, %v84_v4  ;;  %v509_v16 = vld [vmem:[%s1146_s3 + $0x1e8] sm:$0xff] }
  0x12   :  { %v79_v13 = vld [vmem:[%s1146_s3] sm:$0xff]  ;;  %v81_v14 = vld [vmem:[%s1146_s3 + $0x10] sm:$0xff]  ;;  %v511_v17 = vld [vmem:[%s1146_s3 + $0x1f8] sm:$0xff]  ;;  %v222_v18 = vpack.c.bf16 %v506_v8, %v504_v7 }
  0x13   :  { %130 = vmatpush.bf16.msra.mxu1 %v119_v39  ;;  %143 = vmatpush.bf16.msra.mxu2 %v120_v40  ;;  %v80_v19 = vld [vmem:[%s1146_s3 + $0x8] sm:$0xff]  ;;  %v82_v20 = vld [vmem:[%s1146_s3 + $0x18] sm:$0xff]  ;;  %v500_v21 = vld [vmem:[%s1146_s3 + $0x1a0] sm:$0xff]  ;;  %v111_v23 = vpack.c.bf16 %v81_v14, %v79_v13  ;;  %v225_v24 = vpack.c.bf16 %v511_v17, %v509_v16 }
  0x14   :  { %69 = vmatpush.bf16.msra.mxu0 %v686_v34  ;;  %167 = vmatpush.bf16.msra.mxu3 %v686_v34  ;;  %v502_v22 = vld [vmem:[%s1146_s3 + $0x1b0] sm:$0xff]  ;;  %v112_v26 = vpack.c.bf16 %v82_v20, %v80_v19  ;;  %v505_v27 = vld [vmem:[%s1146_s3 + $0x1c8] sm:$0xff]  ;;  %v507_v28 = vld [vmem:[%s1146_s3 + $0x1d8] sm:$0xff] }
  0x15   :  { %v220_v29 = vpack.c.bf16 %v502_v22, %v500_v21  ;;  %v496_v30 = vld [vmem:[%s1146_s3 + $0x180] sm:$0xff]  ;;  %v498_v31 = vld [vmem:[%s1146_s3 + $0x190] sm:$0xff]  ;;  %v223_v32 = vpack.c.bf16 %v507_v28, %v505_v27  ;;  %v501_v33 = vld [vmem:[%s1146_s3 + $0x1a8] sm:$0xff] }
  0x16   :  { %v503_v35 = vld [vmem:[%s1146_s3 + $0x1b8] sm:$0xff]  ;;  %v218_v36 = vpack.c.bf16 %v498_v31, %v496_v30  ;;  %v492_v37 = vld [vmem:[%s1146_s3 + $0x160] sm:$0xff]  ;;  %v494_v38 = vld [vmem:[%s1146_s3 + $0x170] sm:$0xff] }
  0x17   :  { %131 = vmatpush.bf16.msra.mxu1 %v117_v48  ;;  %144 = vmatpush.bf16.msra.mxu2 %v118_v49  ;;  %v221_v39 = vpack.c.bf16 %v503_v35, %v501_v33  ;;  %v216_v40 = vpack.c.bf16 %v494_v38, %v492_v37  ;;  %v484_v42 = vld [vmem:[%s1146_s3 + $0x120] sm:$0xff]  ;;  %v493_v45 = vld [vmem:[%s1146_s3 + $0x168] sm:$0xff]  ;;  %v495_v46 = vld [vmem:[%s1146_s3 + $0x178] sm:$0xff] }
  0x18   :  { %70 = vmatpush.bf16.msra.mxu0 %v708_v43  ;;  %168 = vmatpush.bf16.msra.mxu3 %v708_v43  ;;  %v217_v47 = vpack.c.bf16 %v495_v46, %v493_v45  ;;  %v480_v48 = vld [vmem:[%s1146_s3 + $0x100] sm:$0xff]  ;;  %v482_v49 = vld [vmem:[%s1146_s3 + $0x110] sm:$0xff]  ;;  %v489_v51 = vld [vmem:[%s1146_s3 + $0x148] sm:$0xff] }
  0x19   :  { %v210_v50 = vpack.c.bf16 %v482_v49, %v480_v48  ;;  %v485_v54 = vld [vmem:[%s1146_s3 + $0x128] sm:$0xff]  ;;  %v487_v55 = vld [vmem:[%s1146_s3 + $0x138] sm:$0xff]  ;;  %v543_v61 = vld [vmem:[%s1146_s3 + $0x2f0] sm:$0xff] }
  0x1a   :  { %v481_v56 = vld [vmem:[%s1146_s3 + $0x108] sm:$0xff]  ;;  %v213_v57 = vpack.c.bf16 %v487_v55, %v485_v54  ;;  %v483_v58 = vld [vmem:[%s1146_s3 + $0x118] sm:$0xff]  ;;  %v512_v13 = vld [vmem:[%s1148_s0 + $0x4] sm:$0x3] }
  0x1b   :  { %132 = vmatpush.bf16.msra.mxu1 %v115_v59  ;;  %145 = vmatpush.bf16.msra.mxu2 %v116_v60  ;;  %v211_v59 = vpack.c.bf16 %v483_v58, %v481_v56  ;;  %v541_v60 = vld [vmem:[%s1146_s3 + $0x2e0] sm:$0xff]  ;;  %v542_v62 = vld [vmem:[%s1146_s3 + $0x2e8] sm:$0xff]  ;;  %v544_v0 = vld [vmem:[%s1146_s3 + $0x2f8] sm:$0xff] }
  0x1c   :  { %71 = vmatpush.bf16.msra.mxu0 %v730_v52  ;;  %169 = vmatpush.bf16.msra.mxu3 %v730_v52  ;;  %v319_v1 = vpack.c.bf16 %v544_v0, %v542_v62  ;;  %v537_v16 = vld [vmem:[%s1146_s3 + $0x2c0] sm:$0xff]  ;;  %v539_v17 = vld [vmem:[%s1146_s3 + $0x2d0] sm:$0xff]  ;;  %v540_v20 = vld [vmem:[%s1146_s3 + $0x2d8] sm:$0xff] }
  0x1d   :  { %v316_v19 = vpack.c.bf16 %v539_v17, %v537_v16  ;;  %v533_v22 = vld [vmem:[%s1146_s3 + $0x2a0] sm:$0xff]  ;;  %v536_v27 = vld [vmem:[%s1146_s3 + $0x2b8] sm:$0xff]  ;;  %v531_v30 = vld [vmem:[%s1146_s3 + $0x290] sm:$0xff] }
  0x1e   :  { %v530_v31 = vld [vmem:[%s1146_s3 + $0x288] sm:$0xff]  ;;  %v532_v33 = vld [vmem:[%s1146_s3 + $0x298] sm:$0xff]  ;;  %v527_v37 = vld [vmem:[%s1146_s3 + $0x270] sm:$0xff] }
  0x1f   :  { %133 = vmatpush.bf16.msra.mxu1 %v113_v9  ;;  %146 = vmatpush.bf16.msra.mxu2 %v114_v15  ;;  %v256_v15 = vpack.c.bf16 %v512_v13, %v512_v13  ;;  %v313_v35 = vpack.c.bf16 %v532_v33, %v530_v31  ;;  %v526_v38 = vld [vmem:[%s1146_s3 + $0x268] sm:$0xff]  ;;  %v513_v49 = vld [vmem:[%s1146_s3 + $0x200] sm:$0xff]  ;;  %v382_v56 = vld [vmem:[%s1150_s5 + $0xf0] sm:$0xff] }
  0x20   :  { %72 = vmatpush.bf16.msra.mxu0 %v50_v63  ;;  %170 = vmatpush.bf16.msra.mxu3 %v50_v63  ;;  %v518_v45 = vld [vmem:[%s1146_s3 + $0x228] sm:$0xff]  ;;  %v58_v55 = vld [vmem:[%s1149_s4] sm:$0x3]  ;;  %v367_v62 = vld [vmem:[%s1150_s5 + $0x78] sm:$0xff] }
  0x21   :  { %v380_v58 = vld [vmem:[%s1150_s5 + $0xe0] sm:$0xff]  ;;  %v363_v13 = vld [vmem:[%s1150_s5 + $0x58] sm:$0xff]  ;;  %v358_v31 = vld [vmem:[%s1150_s5 + $0x30] sm:$0xff] }
  0x23   :  { %73 = vmatmul.bf16.vlgmr.msra.gmra.mxu0 %v60_v10  ;;  %171 = vmatmul.bf16.vlgmr.msra.gmra.mxu3 %v162_v11 }
  0x24   :  { %226 = vmatpush.bf16.msrb.mxu0 %v224_v2  ;;  %134 = vmatpush.bf16.msra.mxu1 %v111_v23  ;;  %v894_v2 = vld [vmem:[%s1147_s2] ss:$0 sm:$0xff]  ;;  %v535_v23 = vld [vmem:[%s1146_s3 + $0x2b0] sm:$0xff] }
  0x25   :  { %147 = vmatpush.bf16.msra.mxu2 %v112_v26  ;;  %v314_v26 = vpack.c.bf16 %v535_v23, %v533_v22  ;;  %v360_v22 = vld [vmem:[%s1150_s5 + $0x40] sm:$0xff]  ;;  %v361_v23 = vld [vmem:[%s1150_s5 + $0x48] sm:$0xff] }
  0x28   :  { %227 = vmatpush.bf16.msrb.mxu0 %v222_v18  ;;  %239 = vmatpush.bf16.msrb.mxu1 %v225_v24  ;;  %v538_v18 = vld [vmem:[%s1146_s3 + $0x2c8] sm:$0xff] }
  0x29   :  { %257 = vmatpush.bf16.msrb.mxu2 %v607_v3  ;;  %v488_v3 = vld [vmem:[%s1146_s3 + $0x140] sm:$0xff]  ;;  %v317_v21 = vpack.c.bf16 %v540_v20, %v538_v18  ;;  %v534_v24 = vld [vmem:[%s1146_s3 + $0x2a8] sm:$0xff] }
  0x2a   :  { %v315_v28 = vpack.c.bf16 %v536_v27, %v534_v24  ;;  %v376_v18 = vld [vmem:[%s1150_s5 + $0xc0] sm:$0xff]  ;;  %v374_v27 = vld [vmem:[%s1150_s5 + $0xb0] sm:$0xff] }
  0x2c   :  { %228 = vmatpush.bf16.msrb.mxu0 %v220_v29  ;;  %240 = vmatpush.bf16.msrb.mxu1 %v223_v32  ;;  %v529_v29 = vld [vmem:[%s1146_s3 + $0x280] sm:$0xff] }
  0x2d   :  { %258 = vmatpush.bf16.msrb.mxu2 %v614_v5  ;;  %v490_v5 = vld [vmem:[%s1146_s3 + $0x150] sm:$0xff]  ;;  %v312_v32 = vpack.c.bf16 %v531_v30, %v529_v29  ;;  %v388_v29 = vpack.c.bf16 %v361_v23, %v360_v22  ;;  %v155_v30 = vperm.slane %v58_v55, 1 }
  0x2e   :  { %v214_v41 = vpack.c.bf16 %v490_v5, %v488_v3  ;;  %v521_v5 = vld [vmem:[%s1146_s3 + $0x240] sm:$0xff] }
  0x30   :  { %229 = vmatpush.bf16.msrb.mxu0 %v218_v36  ;;  %241 = vmatpush.bf16.msrb.mxu1 %v221_v39  ;;  %v525_v36 = vld [vmem:[%s1146_s3 + $0x260] sm:$0xff] }
  0x31   :  { %259 = vmatpush.bf16.msrb.mxu2 %v636_v12  ;;  %v497_v12 = vld [vmem:[%s1146_s3 + $0x188] sm:$0xff]  ;;  %v310_v39 = vpack.c.bf16 %v527_v37, %v525_v36  ;;  %v372_v37 = vld [vmem:[%s1150_s5 + $0xa0] sm:$0xff] }
  0x34   :  { %230 = vmatpush.bf16.msrb.mxu0 %v216_v40  ;;  %v528_v40 = vld [vmem:[%s1146_s3 + $0x278] sm:$0xff] }
  0x35   :  { %260 = vmatpush.bf16.msrb.mxu2 %v664_v25  ;;  %v499_v25 = vld [vmem:[%s1146_s3 + $0x198] sm:$0xff]  ;;  %v311_v3 = vpack.c.bf16 %v528_v40, %v526_v38  ;;  %v373_v38 = vld [vmem:[%s1150_s5 + $0xa8] sm:$0xff] }
  0x38   :  { %231 = vmatpush.bf16.msrb.mxu0 %v214_v41  ;;  %v523_v41 = vld [vmem:[%s1146_s3 + $0x250] sm:$0xff] }
  0x39   :  { %261 = vmatpush.bf16.msrb.mxu2 %v686_v34  ;;  %v219_v34 = vpack.c.bf16 %v499_v25, %v497_v12  ;;  %v522_v12 = vld [vmem:[%s1146_s3 + $0x248] sm:$0xff]  ;;  %v308_v25 = vpack.c.bf16 %v523_v41, %v521_v5  ;;  %v394_v41 = vpack.c.bf16 %v373_v38, %v372_v37 }
  0x3b   :  { %242 = vmatpush.bf16.msrb.mxu1 %v219_v34  ;;  %v524_v34 = vld [vmem:[%s1146_s3 + $0x258] sm:$0xff] }
  0x3d   :  { %262 = vmatpush.bf16.msrb.mxu2 %v708_v43  ;;  %v486_v43 = vld [vmem:[%s1146_s3 + $0x130] sm:$0xff] }
  0x3e   :  { %v212_v44 = vpack.c.bf16 %v486_v43, %v484_v42  ;;  %v309_v42 = vpack.c.bf16 %v524_v34, %v522_v12  ;;  %v517_v43 = vld [vmem:[%s1146_s3 + $0x220] sm:$0xff] }
  0x3f   :  { %243 = vmatpush.bf16.msrb.mxu1 %v217_v47  ;;  %v520_v47 = vld [vmem:[%s1146_s3 + $0x238] sm:$0xff] }
  0x40   :  { %232 = vmatpush.bf16.msrb.mxu0 %v212_v44  ;;  %v519_v44 = vld [vmem:[%s1146_s3 + $0x230] sm:$0xff]  ;;  %v307_v48 = vpack.c.bf16 %v520_v47, %v518_v45  ;;  %v371_v45 = vld [vmem:[%s1150_s5 + $0x98] sm:$0xff]  ;;  %v356_v47 = vld [vmem:[%s1150_s5 + $0x20] sm:$0xff] }
  0x41   :  { %263 = vmatpush.bf16.msrb.mxu2 %v730_v52  ;;  %v491_v52 = vld [vmem:[%s1146_s3 + $0x158] sm:$0xff]  ;;  %v306_v46 = vpack.c.bf16 %v519_v44, %v517_v43  ;;  %v370_v44 = vld [vmem:[%s1150_s5 + $0x90] sm:$0xff] }
  0x42   :  { %v215_v53 = vpack.c.bf16 %v491_v52, %v489_v51  ;;  %v514_v51 = vld [vmem:[%s1146_s3 + $0x208] sm:$0xff] }
  0x44   :  { %233 = vmatpush.bf16.msrb.mxu0 %v210_v50  ;;  %244 = vmatpush.bf16.msrb.mxu1 %v215_v53  ;;  %v515_v50 = vld [vmem:[%s1146_s3 + $0x210] sm:$0xff]  ;;  %v516_v53 = vld [vmem:[%s1146_s3 + $0x218] sm:$0xff] }
  0x45   :  { %264 = vmatpush.bf16.msrb.mxu2 %v50_v63  ;;  %v318_v63 = vpack.c.bf16 %v543_v61, %v541_v60  ;;  %v304_v52 = vpack.c.bf16 %v515_v50, %v513_v49  ;;  %v305_v54 = vpack.c.bf16 %v516_v53, %v514_v51  ;;  %v381_v60 = vld [vmem:[%s1150_s5 + $0xe8] sm:$0xff]  ;;  %v366_v61 = vld [vmem:[%s1150_s5 + $0x70] sm:$0xff]  ;;  %v368_v49 = vld [vmem:[%s1150_s5 + $0x80] sm:$0xff] }
  0x46   :  { %v391_v0 = vpack.c.bf16 %v367_v62, %v366_v61  ;;  %v369_v50 = vld [vmem:[%s1150_s5 + $0x88] sm:$0xff]  ;;  %v355_v53 = vld [vmem:[%s1150_s5 + $0x18] sm:$0xff] }
  0x47   :  { %320 = vmatpush.bf16.msrb.mxu3 %v318_v63  ;;  %v392_v51 = vpack.c.bf16 %v369_v50, %v368_v49  ;;  %v445_v62 = vld [vmem:[%s1152_s7 + $0x68] sm:$0xff] }
  0x48   :  { %245 = vmatpush.bf16.msrb.mxu1 %v213_v57  ;;  %333 = vmatpush.bf16.msra.mxu0 %v319_v1  ;;  %v383_v57 = vld [vmem:[%s1150_s5 + $0xf8] sm:$0xff]  ;;  %v364_v1 = vld [vmem:[%s1150_s5 + $0x60] sm:$0xff] }
  0x4b   :  { %321 = vmatpush.bf16.msrb.mxu3 %v316_v19  ;;  %v377_v19 = vld [vmem:[%s1150_s5 + $0xc8] sm:$0xff] }
  0x4c   :  { %246 = vmatpush.bf16.msrb.mxu1 %v211_v59  ;;  %334 = vmatpush.bf16.msra.mxu0 %v317_v21  ;;  %v399_v59 = vpack.c.bf16 %v383_v57, %v382_v56  ;;  %v353_v56 = vld [vmem:[%s1150_s5 + $0x8] sm:$0xff] }
  0x4f   :  { %322 = vmatpush.bf16.msrb.mxu3 %v314_v26  ;;  %v396_v26 = vpack.c.bf16 %v377_v19, %v376_v18 }
  0x50   :  { %335 = vmatpush.bf16.msra.mxu0 %v315_v28  ;;  %v375_v28 = vld [vmem:[%s1150_s5 + $0xb8] sm:$0xff] }
  0x51   :  { %v395_v33 = vpack.c.bf16 %v375_v28, %v374_v27  ;;  %v434_v28 = vld [vmem:[%s1152_s7 + $0x10] sm:$0xff] }
  0x53   :  { %323 = vmatpush.bf16.msrb.mxu3 %v312_v32  ;;  %v359_v32 = vld [vmem:[%s1150_s5 + $0x38] sm:$0xff] }
  0x54   :  { %336 = vmatpush.bf16.msra.mxu0 %v313_v35 }
  0x57   :  { %324 = vmatpush.bf16.msrb.mxu3 %v310_v39  ;;  %v387_v39 = vpack.c.bf16 %v359_v32, %v358_v31  ;;  %v433_v31 = vld [vmem:[%s1152_s7 + $0x8] sm:$0xff] }
  0x58   :  { %337 = vmatpush.bf16.msra.mxu0 %v311_v3 }
  0x5b   :  { %325 = vmatpush.bf16.msrb.mxu3 %v308_v25 }
  0x5c   :  { %338 = vmatpush.bf16.msra.mxu0 %v309_v42 }
  0x5f   :  { %326 = vmatpush.bf16.msrb.mxu3 %v306_v46  ;;  %v393_v46 = vpack.c.bf16 %v371_v45, %v370_v44 }
  0x60   :  { %339 = vmatpush.bf16.msra.mxu0 %v307_v48 }
  0x63   :  { %327 = vmatpush.bf16.msrb.mxu3 %v304_v52  ;;  %v354_v52 = vld [vmem:[%s1150_s5 + $0x10] sm:$0xff] }
  0x64   :  { %340 = vmatpush.bf16.msra.mxu0 %v305_v54  ;;  %v385_v54 = vpack.c.bf16 %v355_v53, %v354_v52 }
  0xa0   :  { %v74_v4 = vpop.f32.mrf.mxu0 }
  0xa1   :  { %v75_v6 = vadd.f32 %v894_v2, %v74_v4  ;;  %v154_v4 = vperm.slane %v58_v55, 0  ;;  %v352_v55 = vld [vmem:[%s1150_s5] sm:$0xff] }
  0xa2   :  { %v384_v57 = vpack.c.bf16 %v353_v56, %v352_v55 }
  0xa3   :  { %v78_v7 = vpack.c.bf16 %v75_v6, %v75_v6  ;;  %v398_v6 = vpack.c.bf16 %v381_v60, %v380_v58  ;;  %v446_v58 = vld [vmem:[%s1152_s7 + $0x70] sm:$0xff]  ;;  %v444_v60 = vld [vmem:[%s1152_s7 + $0x60] sm:$0xff] }
  0xa5   :  { %135 = vmatmul.bf16.vlgmr.msra.gmra.mxu1 %v78_v7  ;;  %148 = vmatmul.bf16.vlgmr.msra.gmra.mxu2 %v78_v7  ;;  %v365_v7 = vld [vmem:[%s1150_s5 + $0x68] sm:$0xff] }
  0xa6   :  { %v172_v8 = vpop.f32.mrf.mxu3  ;;  %417 = vmatpush.bf16.msra.mxu2 %v399_v59  ;;  %404 = vmatpush.bf16.msra.mxu1 %v391_v0  ;;  %v447_v59 = vld [vmem:[%s1152_s7 + $0x78] sm:$0xff]  ;;  %v442_v0 = vld [vmem:[%s1152_s7 + $0x50] sm:$0xff] }
  0xa7   :  { %v173_v9 = vadd.f32 %v894_v2, %v172_v8  ;;  %v378_v8 = vld [vmem:[%s1150_s5 + $0xd0] sm:$0xff]  ;;  %v455_v61 = vpack.c.bf16 %v447_v59, %v446_v58 }
  0xa8   :  { %v76_v10 = vpop.f32.mrf.mxu0 }
  0xa9   :  { %v176_v11 = vpack.c.bf16 %v173_v9, %v173_v9  ;;  %v379_v9 = vld [vmem:[%s1150_s5 + $0xd8] sm:$0xff]  ;;  %v390_v10 = vpack.c.bf16 %v365_v7, %v364_v1  ;;  %460 = vmatpush.bf16.msra.mxu3 %v455_v61  ;;  %v441_v7 = vld [vmem:[%s1152_s7 + $0x48] sm:$0xff] }
  0xaa   :  { %418 = vmatpush.bf16.msra.mxu2 %v398_v6  ;;  %v443_v1 = vld [vmem:[%s1152_s7 + $0x58] sm:$0xff]  ;;  %v440_v6 = vld [vmem:[%s1152_s7 + $0x40] sm:$0xff] }
  0xab   :  { %234 = vmatmul.bf16.vlgmr.msrb.gmra.mxu0 %v176_v11  ;;  %405 = vmatpush.bf16.msra.mxu1 %v390_v10  ;;  %v439_v10 = vld [vmem:[%s1152_s7 + $0x38] sm:$0xff] }
  0xae   :  { %v174_v14 = vpop.f32.mrf.mxu3 }
  0xb5   :  { %247 = vmatmul.bf16.vlgmr.msrb.gmra.mxu1 %v176_v11  ;;  %265 = vmatmul.bf16.vlgmr.msrb.gmra.mxu2 %v256_v15  ;;  %v362_v11 = vld [vmem:[%s1150_s5 + $0x50] sm:$0xff]  ;;  %v397_v15 = vpack.c.bf16 %v379_v9, %v378_v8  ;;  %v452_v8 = vpack.c.bf16 %v441_v7, %v440_v6 }
  0xb6   :  { %v389_v20 = vpack.c.bf16 %v363_v13, %v362_v11  ;;  %v438_v9 = vld [vmem:[%s1152_s7 + $0x30] sm:$0xff]  ;;  %v436_v13 = vld [vmem:[%s1152_s7 + $0x20] sm:$0xff] }
  0xb7   :  { %419 = vmatpush.bf16.msra.mxu2 %v397_v15  ;;  %v451_v11 = vpack.c.bf16 %v439_v10, %v438_v9 }
  0xb8   :  { %406 = vmatpush.bf16.msra.mxu1 %v389_v20 }
  0xbb   :  { %420 = vmatpush.bf16.msra.mxu2 %v396_v26 }
  0xbc   :  { %407 = vmatpush.bf16.msra.mxu1 %v388_v29  ;;  %v435_v29 = vld [vmem:[%s1152_s7 + $0x18] sm:$0xff] }
  0xbf   :  { %421 = vmatpush.bf16.msra.mxu2 %v395_v33  ;;  %v14_v33 = vstv %s1153_s8 }
  0xc0   :  { %408 = vmatpush.bf16.msra.mxu1 %v387_v39  ;;  %15 = vst [vmem:[#allocation2] sm:$0x1] %v14_v33 }
  0xc3   :  { %422 = vmatpush.bf16.msra.mxu2 %v394_v41 }
  0xc7   :  { %423 = vmatpush.bf16.msra.mxu2 %v393_v46 }
  0xcb   :  { %424 = vmatpush.bf16.msra.mxu2 %v392_v51 }
 0x122   :  { %v136_v63 = vpop.f32.mrf.mxu1 }
 0x123   :  { %v158_v14 = vadd.f32 %v154_v4, %v136_v63  ;;  %v454_v63 = vpack.c.bf16 %v445_v62, %v444_v60  ;;  %v453_v4 = vpack.c.bf16 %v443_v1, %v442_v0 }
 0x125   :  { %461 = vmatpush.bf16.msra.mxu3 %v454_v63 }
 0x128   :  { %v149_v16 = vpop.f32.mrf.mxu2  ;;  %v235_v17 = vpop.f32.mrf.mxu0 }
 0x129   :  { %v1030_v21 = vadd.f32 %v235_v17, %v158_v14  ;;  %v159_v40 = vadd.f32 %v155_v30, %v149_v16  ;;  %462 = vmatpush.bf16.msra.mxu3 %v453_v4  ;;  %v437_v14 = vld [vmem:[%s1152_s7 + $0x28] sm:$0xff]  ;;  %v449_v30 = vpack.c.bf16 %v435_v29, %v434_v28 }
 0x12a   :  { %v138_v24 = vpop.f32.mrf.mxu1  ;;  %v450_v17 = vpack.c.bf16 %v437_v14, %v436_v13 }
 0x12d   :  { %463 = vmatpush.bf16.msra.mxu3 %v452_v8 }
 0x130   :  { %v151_v35 = vpop.f32.mrf.mxu2  ;;  %v237_v36 = vpop.f32.mrf.mxu0 }
 0x131   :  { %464 = vmatpush.bf16.msra.mxu3 %v451_v11  ;;  %v546_v35 = vld [vmem:[%s1151_s6] ss:$0 sm:$0xff] }
 0x132   :  { %v248_v3 = vpop.f32.mrf.mxu1 }
 0x133   :  { %v253_v5 = vadd.f32 %v248_v3, %v159_v40 }
 0x135   :  { %465 = vmatpush.bf16.msra.mxu3 %v450_v17 }
 0x138   :  { %v266_v12 = vpop.f32.mrf.mxu2 }
 0x139   :  { %v267_v25 = vadd.f32 %v894_v2, %v266_v12  ;;  %v357_v2 = vld [vmem:[%s1150_s5 + $0x28] sm:$0xff]  ;;  %466 = vmatpush.bf16.msra.mxu3 %v449_v30  ;;  %v547_v12 = vld [vmem:[#allocation2] ss:$0 sm:$0xff] }
 0x13a   :  { %v250_v34 = vpop.f32.mrf.mxu1  ;;  %v386_v48 = vpack.c.bf16 %v357_v2, %v356_v47 }
 0x13b   :  { %v270_v42 = vpack.c.bf16 %v267_v25, %v267_v25 }
 0x13c   :  { %409 = vmatpush.bf16.msra.mxu1 %v386_v48 }
 0x13d   :  { %328 = vmatmul.bf16.vlgmr.msrb.gmra.mxu3 %v270_v42  ;;  %341 = vmatmul.bf16.vlgmr.msra.gmra.mxu0 %v270_v42 }
 0x140   :  { %v268_v43 = vpop.f32.mrf.mxu2  ;;  %410 = vmatpush.bf16.msra.mxu1 %v385_v54 }
 0x144   :  { %411 = vmatpush.bf16.msra.mxu1 %v384_v57 }
 0x1ba   :  { %v342_v15 = vpop.f32.mrf.mxu0 }
 0x1bb   :  { %v347_v16 = vadd.f32 %v342_v15, %v253_v5 }
 0x1bd   :  { %v349_v18 = vmax.f32 %v347_v16, 0.0 }
 0x1bf   :  { %v351_v19 = vpack.c.bf16 %v349_v18, %v349_v18 }
 0x1c0   :  { %v329_v20 = vpop.f32.mrf.mxu3 }
 0x1c1   :  { %v346_v22 = vadd.f32 %v329_v20, %v1030_v21  ;;  %425 = vmatmul.bf16.vlgmr.msra.gmra.mxu2 %v351_v19  ;;  %v432_v21 = vld [vmem:[%s1152_s7] sm:$0xff] }
 0x1c2   :  { %v344_v23 = vpop.f32.mrf.mxu0  ;;  %v448_v32 = vpack.c.bf16 %v433_v31, %v432_v21 }
 0x1c3   :  { %v348_v24 = vmax.f32 %v346_v22, 0.0 }
 0x1c4   :  { %467 = vmatpush.bf16.msra.mxu3 %v448_v32 }
 0x1c5   :  { %v350_v26 = vpack.c.bf16 %v348_v24, %v348_v24 }
 0x1c7   :  { %412 = vmatmul.bf16.vlgmr.msra.gmra.mxu1 %v350_v26 }
 0x1c8   :  { %v331_v27 = vpop.f32.mrf.mxu3 }
 0x244   :  { %v413_v36 = vpop.f32.mrf.mxu1  ;;  %v426_v37 = vpop.f32.mrf.mxu2 }
 0x245   :  { %v414_v38 = vadd.f32 %v546_v35, %v413_v36 }
 0x247   :  { %v427_v39 = vadd.f32 %v426_v37, %v414_v38 }
 0x249   :  { %v430_v40 = vmax.f32 %v427_v39, 0.0 }
 0x24b   :  { %v431_v3 = vpack.c.bf16 %v430_v40, %v430_v40 }
 0x24c   :  { %v415_v5 = vpop.f32.mrf.mxu1  ;;  %v428_v41 = vpop.f32.mrf.mxu2 }
 0x24d   :  { %468 = vmatmul.bf16.vlgmr.msra.gmra.mxu3 %v431_v3 }
 0x2d0   :  { %v469_v25 = vpop.f32.mrf.mxu3 }
 0x2d1   :  { %v470_v34 = vadd.f32 %v547_v12, %v469_v25 }
 0x2d3   :  { %474 = vst.msk [vmem:[%s1154_s9] sm:$0x3] %vm473_vm0, %v470_v34 }
 0x2d8   :  { %v471_v42 = vpop.f32.mrf.mxu3 }

</bundles_post_ra>
